<compile_context>
chip_gen: v7x
topology: tpu7x:2x2x1
jax: 0.10.0
libtpu: 0.0.40
codegen_flags: <defaults>
</compile_context>

<pallas_src>
import functools

import jax
import jax.numpy as jnp
from jax.experimental import pallas as pl
from jax.experimental.pallas import tpu as pltpu

LN_EPS = 1e-12          # BERT layer_norm_eps
_SQRT_HALF = 0.7071067811865476
_VMEM_LIMIT = 32 * 1024 * 1024   # > v5e 16 MiB scoped default, safe on v6e/v7x


# ---------------------------------------------------------------------------
# helpers
# ---------------------------------------------------------------------------
def _fit_tile(dim, target, bases=(256, 128)):
    """Largest tile <= target that divides `dim`, preferring multiples of 256 (full
    2x256 MXU passes on v6e/v7x) and falling back to 128, then to the full dim.
    TODO(synk): the full-dim fallback can produce one huge block for awkward dims."""
    if dim <= target:
        return dim
    for base in bases:
        t = (target // base) * base
        while t >= base:
            if dim % t == 0:
                return t
            t -= base
    return dim


def _erf(z):
    # Abramowitz & Stegun 7.1.26 rational approximation, |err| < 1.5e-7.
    az = jnp.abs(z)
    t = 1.0 / (1.0 + 0.3275911 * az)
    poly = ((((1.061405429 * t - 1.453152027) * t + 1.421413741) * t
             - 0.284496736) * t + 0.254829592) * t
    e = 1.0 - poly * jnp.exp(-az * az)
    return jnp.where(z >= 0.0, e, -e)


def _gelu_exact(x):
    # erf-form GELU (matches HF BERT "gelu"); runs only in the last-k epilogue.
    return 0.5 * x * (1.0 + _erf(x * _SQRT_HALF))


# ---------------------------------------------------------------------------
# tiled matmul kernels (bias / GELU / residual+LayerNorm fused in the epilogue)
# ---------------------------------------------------------------------------
def _matmul_kernel(x_ref, w_ref, b_ref, o_ref, acc_ref, *, activation):
    @pl.when(pl.program_id(2) == 0)
    def _():
        acc_ref[...] = jnp.zeros_like(acc_ref)

    acc_ref[...] += jnp.dot(x_ref[...].astype(jnp.bfloat16),
                            w_ref[...].astype(jnp.bfloat16),
                            preferred_element_type=jnp.float32)

    @pl.when(pl.program_id(2) == pl.num_programs(2) - 1)
    def _():
        y = acc_ref[...] + b_ref[...].astype(jnp.float32)
        if activation == "gelu":
            y = _gelu_exact(y)
        elif activation == "tanh":
            y = jnp.tanh(y)
        o_ref[...] = y.astype(o_ref.dtype)


def pallas_linear(x, w, b, *, activation=None, out_dtype=jnp.bfloat16,
                  tm=512, tn=1024, tk=1024):
    """activation(x @ w + b): (tm, tn, tk)-tiled matmul with an f32 accumulator.
    Output stored bf16 by default (halves HBM writeback of qkv / GELU intermediate)."""
    M, K = x.shape
    N = w.shape[1]
    tm = _fit_tile(M, tm, bases=(8,))
    tn = _fit_tile(N, tn)
    tk = _fit_tile(K, tk)
    grid = (M // tm, N // tn, K // tk)
    return pl.pallas_call(
        functools.partial(_matmul_kernel, activation=activation),
        out_shape=jax.ShapeDtypeStruct((M, N), out_dtype),
        grid_spec=pltpu.PrefetchScalarGridSpec(
            num_scalar_prefetch=0,
            grid=grid,
            in_specs=[pl.BlockSpec((tm, tk), lambda i, j, k: (i, k)),
                      pl.BlockSpec((tk, tn), lambda i, j, k: (k, j)),
                      pl.BlockSpec((1, tn), lambda i, j, k: (0, j))],
            out_specs=pl.BlockSpec((tm, tn), lambda i, j, k: (i, j)),
            scratch_shapes=[pltpu.VMEM((tm, tn), jnp.float32)]),
        compiler_params=pltpu.CompilerParams(
            dimension_semantics=("parallel", "parallel", "arbitrary"),
            vmem_limit_bytes=_VMEM_LIMIT),
    )(x, w, b.reshape(1, N))


def _matmul_add_ln_kernel(x_ref, w_ref, b_ref, r_ref, g_ref, bb_ref,
                          o_ref, acc_ref, *, eps):
    @pl.when(pl.program_id(1) == 0)
    def _():
        acc_ref[...] = jnp.zeros_like(acc_ref)

    acc_ref[...] += jnp.dot(x_ref[...].astype(jnp.bfloat16),
                            w_ref[...].astype(jnp.bfloat16),
                            preferred_element_type=jnp.float32)

    @pl.when(pl.program_id(1) == pl.num_programs(1) - 1)
    def _():
        y = acc_ref[...] + b_ref[...] + r_ref[...].astype(jnp.float32)
        mu = jnp.mean(y, axis=-1, keepdims=True)
        var = jnp.mean((y - mu) ** 2, axis=-1, keepdims=True)
        yn = (y - mu) * jax.lax.rsqrt(var + eps)
        o_ref[...] = (yn * g_ref[...] + bb_ref[...]).astype(o_ref.dtype)


def pallas_linear_add_layernorm(x, w, b, residual, gamma, beta, *,
                                eps=LN_EPS, out_dtype=jnp.bfloat16,
                                tm=512, tk=1024):
    """LayerNorm(x @ w + b + residual): projection with bias + residual-add + LN fused
    in the epilogue. Output tile spans the full hidden dim so the row stats are local.
    tk defaults to full-K for the H->H projection (no k-loop); output stored bf16."""
    M, K = x.shape
    N = w.shape[1]
    tm = _fit_tile(M, tm, bases=(8,))
    tk = _fit_tile(K, tk)
    grid = (M // tm, K // tk)
    return pl.pallas_call(
        functools.partial(_matmul_add_ln_kernel, eps=eps),
        out_shape=jax.ShapeDtypeStruct((M, N), out_dtype),
        grid_spec=pltpu.PrefetchScalarGridSpec(
            num_scalar_prefetch=0,
            grid=grid,
            in_specs=[pl.BlockSpec((tm, tk), lambda i, k: (i, k)),
                      pl.BlockSpec((tk, N), lambda i, k: (k, 0)),
                      pl.BlockSpec((1, N), lambda i, k: (0, 0)),
                      pl.BlockSpec((tm, N), lambda i, k: (i, 0)),
                      pl.BlockSpec((1, N), lambda i, k: (0, 0)),
                      pl.BlockSpec((1, N), lambda i, k: (0, 0))],
            out_specs=pl.BlockSpec((tm, N), lambda i, k: (i, 0)),
            scratch_shapes=[pltpu.VMEM((tm, N), jnp.float32)]),
        compiler_params=pltpu.CompilerParams(
            dimension_semantics=("parallel", "arbitrary"),
            vmem_limit_bytes=_VMEM_LIMIT),
    )(x, w, b.reshape(1, N), residual, gamma.reshape(1, N), beta.reshape(1, N))


# ---------------------------------------------------------------------------
# fused embedding add (word + pos + type) + LayerNorm
# ---------------------------------------------------------------------------
def _emb_ln_kernel(w_ref, p_ref, t_ref, g_ref, b_ref, o_ref, *, eps):
    x = (w_ref[0].astype(jnp.float32) + p_ref[...].astype(jnp.float32)
         + t_ref[...].astype(jnp.float32))
    mu = jnp.mean(x, axis=-1, keepdims=True)
    var = jnp.mean((x - mu) ** 2, axis=-1, keepdims=True)
    o_ref[0] = ((x - mu) * jax.lax.rsqrt(var + eps) * g_ref[...]
                + b_ref[...]).astype(o_ref.dtype)


def pallas_embedding_layernorm(word, pos, tok, gamma, beta, *,
                               eps=LN_EPS, out_dtype=jnp.bfloat16, ts=256):
    """LayerNorm(word + pos + token_type) with the three-way add fused in-kernel
    (no [B*S,H] f32 'emb' HBM round trip). word: [B,S,H], pos: [S,H], tok: [1,H]."""
    B, S, H = word.shape
    ts = _fit_tile(S, ts, bases=(8,))
    return pl.pallas_call(
        functools.partial(_emb_ln_kernel, eps=eps),
        out_shape=jax.ShapeDtypeStruct((B, S, H), out_dtype),
        grid=(B, S // ts),
        in_specs=[pl.BlockSpec((1, ts, H), lambda b, s: (b, s, 0)),
                  pl.BlockSpec((ts, H), lambda b, s: (s, 0)),
                  pl.BlockSpec((1, H), lambda b, s: (0, 0)),
                  pl.BlockSpec((1, H), lambda b, s: (0, 0)),
                  pl.BlockSpec((1, H), lambda b, s: (0, 0))],
        out_specs=pl.BlockSpec((1, ts, H), lambda b, s: (b, s, 0)),
        compiler_params=pltpu.CompilerParams(
            dimension_semantics=("parallel", "parallel")),
    )(word, pos, tok, gamma.reshape(1, H), beta.reshape(1, H))


# ---------------------------------------------------------------------------
# flash-style attention: online softmax over key tiles, head slicing via index_maps,
# single lane-dense (tq, W) output store per grid step
# ---------------------------------------------------------------------------
def _attn_kernel(q_ref, k_ref, v_ref, mb_ref, o_ref, m_sc, l_sc, acc_sc, *,
                 scale, nh_blk, head_dim):
    kv = pl.program_id(3)

    @pl.when(kv == 0)
    def _():
        m_sc[...] = jnp.full_like(m_sc, -1e30)
        l_sc[...] = jnp.zeros_like(l_sc)
        acc_sc[...] = jnp.zeros_like(acc_sc)

    mb = mb_ref[0].astype(jnp.float32)   # (1, tkv) additive key mask, broadcast over q
    q = q_ref[0]                         # (tq, W)
    k = k_ref[0]                         # (tkv, W)
    v = v_ref[0]
    for hh in range(nh_blk):             # static unroll; nh_blk is 1 or 2
        lo, hi = hh * head_dim, (hh + 1) * head_dim
        # fold 1/sqrt(Dh) into q (S*Dh multiplies instead of S*S on the scores)
        qh = (q[:, lo:hi].astype(jnp.float32) * scale).astype(jnp.bfloat16)
        kh = k[:, lo:hi].astype(jnp.bfloat16)
        vh = v[:, lo:hi].astype(jnp.bfloat16)
        s = jax.lax.dot_general(qh, kh, (((1,), (1,)), ((), ())),
                                preferred_element_type=jnp.float32) + mb   # (tq, tkv)
        m_prev = m_sc[hh]                                                  # (tq, 1)
        m_new = jnp.maximum(m_prev, jnp.max(s, axis=-1, keepdims=True))
        alpha = jnp.exp(m_prev - m_new)
        p = jnp.exp(s - m_new)
        l_sc[hh] = alpha * l_sc[hh] + jnp.sum(p, axis=-1, keepdims=True)
        acc_sc[hh] = alpha * acc_sc[hh] + jnp.dot(p.astype(jnp.bfloat16), vh,
                                                  preferred_element_type=jnp.float32)
        m_sc[hh] = m_new

    @pl.when(kv == pl.num_programs(3) - 1)
    def _():
        outs = [acc_sc[hh] * pl.reciprocal(l_sc[hh], approx=True)
                for hh in range(nh_blk)]
        ctx = outs[0] if nh_blk == 1 else jnp.concatenate(outs, axis=-1)
        o_ref[0] = ctx.astype(o_ref.dtype)        # one unmasked lane-dense (tq, W) store


def pallas_attention(qkv, mask_bias, *, num_heads, tq=256, tkv=512):
    """qkv: [B, S, 3H] fused projection (Q|K|V column stripes), mask_bias: [B, 1, S].
    Flash-style online softmax over key tiles (no (S,S) score materialization), query
    tiles for grid occupancy, head columns sliced directly via BlockSpec index_maps,
    per-head contexts concatenated into a single lane-dense output store."""
    B, S, H3 = qkv.shape
    H = H3 // 3
    Dh = H // num_heads
    # Group heads per block so the block lane width is a multiple of 128 (lane-dense).
    nh_blk = 1
    while (nh_blk * Dh) % 128 != 0 and num_heads % (nh_blk * 2) == 0:
        nh_blk *= 2
    nhb = num_heads // nh_blk            # head groups per Q/K/V stripe
    W = nh_blk * Dh                      # block lane width
    scale = 1.0 / (Dh ** 0.5)
    tq = _fit_tile(S, tq, bases=(8,))
    tkv = _fit_tile(S, tkv)              # multiple of 128 (mask lane dim) or full S
    grid = (B, nhb, S // tq, S // tkv)
    return pl.pallas_call(
        functools.partial(_attn_kernel, scale=scale, nh_blk=nh_blk, head_dim=Dh),
        out_shape=jax.ShapeDtypeStruct((B, S, H), jnp.bfloat16),
        grid_spec=pltpu.PrefetchScalarGridSpec(
            num_scalar_prefetch=0,
            grid=grid,
            in_specs=[
                pl.BlockSpec((1, tq, W), lambda b, g, qi, ki: (b, qi, g)),          # Q
                pl.BlockSpec((1, tkv, W), lambda b, g, qi, ki: (b, ki, g + nhb)),   # K
                pl.BlockSpec((1, tkv, W), lambda b, g, qi, ki: (b, ki, g + 2 * nhb)),
                pl.BlockSpec((1, 1, tkv), lambda b, g, qi, ki: (b, 0, ki))],        # mask
            out_specs=pl.BlockSpec((1, tq, W), lambda b, g, qi, ki: (b, qi, g)),
            scratch_shapes=[pltpu.VMEM((nh_blk, tq, 1), jnp.float32),   # m
                            pltpu.VMEM((nh_blk, tq, 1), jnp.float32),   # l
                            pltpu.VMEM((nh_blk, tq, Dh), jnp.float32)]  # acc
        ),
        compiler_params=pltpu.CompilerParams(
            dimension_semantics=("parallel", "parallel", "parallel", "arbitrary"),
            vmem_limit_bytes=_VMEM_LIMIT),
    )(qkv, qkv, qkv, mask_bias)


# ---------------------------------------------------------------------------
# pooler (tanh) + dim_adapter fused into one small kernel
# ---------------------------------------------------------------------------
def _pooler_adapter_kernel(x_ref, wp_ref, bp_ref, wa_ref, ba_ref, o_ref):
    pooled = jnp.tanh(jnp.dot(x_ref[...].astype(jnp.bfloat16),
                              wp_ref[...].astype(jnp.bfloat16),
                              preferred_element_type=jnp.float32) + bp_ref[...])
    y = jnp.dot(pooled.astype(jnp.bfloat16), wa_ref[...].astype(jnp.bfloat16),
                preferred_element_type=jnp.float32) + ba_ref[...]
    o_ref[...] = y.astype(o_ref.dtype)


def pallas_pooler_adapter(cls_tok, wp, bp, wa, ba):
    B = cls_tok.shape[0]
    out_dim = wa.shape[1]
    return pl.pallas_call(
        _pooler_adapter_kernel,
        out_shape=jax.ShapeDtypeStruct((B, out_dim), jnp.float32),
    )(cls_tok, wp, bp.reshape(1, -1), wa, ba.reshape(1, -1))


# ---------------------------------------------------------------------------
# Parameter init (deterministic, synthetic — stands in for BertModel.from_pretrained)
# ---------------------------------------------------------------------------
def init_params(key, *, vocab_size, hidden, num_layers, intermediate,
                max_pos, type_vocab, output_dim):
    keys = iter(jax.random.split(key, 5 + 6 * num_layers))

    def normal(shape):
        return (0.02 * jax.random.normal(next(keys), shape)).astype(jnp.float32)

    def bf16(x):
        return x.astype(jnp.bfloat16)   # MXU weights stored bf16 (f32 accumulation)

    params = {
        "word_emb": normal((vocab_size, hidden)),
        "pos_emb": normal((max_pos, hidden)),
        "type_emb": normal((type_vocab, hidden)),
        "emb_ln_g": jnp.ones((hidden,), jnp.float32),
        "emb_ln_b": jnp.zeros((hidden,), jnp.float32),
        "layers": [],
        "pool_w": None, "pool_b": jnp.zeros((hidden,), jnp.float32),
        "adapt_w": None, "adapt_b": jnp.zeros((output_dim,), jnp.float32),
    }
    for _ in range(num_layers):
        wq, wk, wv = (normal((hidden, hidden)) for _ in range(3))
        params["layers"].append({
            "wqkv": bf16(jnp.concatenate([wq, wk, wv], axis=1)),   # fused Q|K|V
            "bqkv": jnp.zeros((3 * hidden,), jnp.float32),
            "wo": bf16(normal((hidden, hidden))),
            "bo": jnp.zeros((hidden,), jnp.float32),
            "ln1_g": jnp.ones((hidden,), jnp.float32),
            "ln1_b": jnp.zeros((hidden,), jnp.float32),
            "w1": bf16(normal((hidden, intermediate))),
            "b1": jnp.zeros((intermediate,), jnp.float32),
            "w2": bf16(normal((intermediate, hidden))),
            "b2": jnp.zeros((hidden,), jnp.float32),
            "ln2_g": jnp.ones((hidden,), jnp.float32),
            "ln2_b": jnp.zeros((hidden,), jnp.float32),
        })
    params["pool_w"] = bf16(normal((hidden, hidden)))
    params["adapt_w"] = bf16(normal((hidden, output_dim)))
    return params


# ---------------------------------------------------------------------------
# Forward pass  ==  InstructionBertEncoder.forward({"input_ids", "attention_mask"})
# ---------------------------------------------------------------------------
def instruction_bert_encoder_forward(params, input_ids, attention_mask, *, num_heads):
    B, S = input_ids.shape
    H = params["word_emb"].shape[1]

    # --- embeddings: word gather (XLA) + fused (word+pos+type) add + LayerNorm kernel
    word = jnp.take(params["word_emb"], input_ids, axis=0)      # [B, S, H]
    pos = params["pos_emb"][:S]                                 # [S, H]
    tok = params["type_emb"][0:1]                               # token_type_ids = 0
    hidden = pallas_embedding_layernorm(word, pos, tok,
                                        params["emb_ln_g"],
                                        params["emb_ln_b"]).reshape(B * S, H)

    # BERT extended attention mask: (1 - mask) * -10000, broadcast over heads/queries
    mask_bias = ((1.0 - attention_mask.astype(jnp.float32)) * -10000.0).reshape(B, 1, S)

    for layer in params["layers"]:
        # --- self-attention: fused QKV projection + flash-style transpose-free attention
        qkv = pallas_linear(hidden, layer["wqkv"], layer["bqkv"])           # [B*S, 3H] bf16
        ctx = pallas_attention(qkv.reshape(B, S, 3 * H), mask_bias,
                               num_heads=num_heads).reshape(B * S, H)
        # output projection with bias + residual + LayerNorm fused in the epilogue
        hidden = pallas_linear_add_layernorm(ctx, layer["wo"], layer["bo"],
                                             hidden, layer["ln1_g"], layer["ln1_b"])

        # --- feed-forward: GELU fused into the intermediate matmul epilogue ---
        inter = pallas_linear(hidden, layer["w1"], layer["b1"], activation="gelu")
        hidden = pallas_linear_add_layernorm(inter, layer["w2"], layer["b2"],
                                             hidden, layer["ln2_g"], layer["ln2_b"])

    # --- pooler: tanh(W h_[CLS] + b)  +  dim_adapter: Linear(bert_dim -> output_dim) ---
    cls = hidden.reshape(B, S, H)[:, 0, :]
    return pallas_pooler_adapter(cls, params["pool_w"], params["pool_b"],
                                 params["adapt_w"], params["adapt_b"])


# ---------------------------------------------------------------------------
if __name__ == "__main__":
    # small synthetic "BERT" config (head_dim kept 128-lane aligned: H=256, 2 heads)
    B, S = 2, 8
    HIDDEN, NUM_HEADS, NUM_LAYERS, INTERMEDIATE = 256, 2, 2, 512
    VOCAB, MAX_POS, TYPE_VOCAB = 100, 32, 2
    OUTPUT_DIM = 512   # module default output_dim=512 != hidden -> dim_adapter is a real Linear

    key = jax.random.PRNGKey(0)
    pkey, ikey = jax.random.split(key)
    params = init_params(pkey, vocab_size=VOCAB, hidden=HIDDEN,
                         num_layers=NUM_LAYERS, intermediate=INTERMEDIATE,
                         max_pos=MAX_POS, type_vocab=TYPE_VOCAB,
                         output_dim=OUTPUT_DIM)

    # instruction = {"input_ids", "attention_mask"} (second sequence is padded)
    input_ids = jax.random.randint(ikey, (B, S), 0, VOCAB, dtype=jnp.int32)
    attention_mask = jnp.array([[1, 1, 1, 1, 1, 1, 1, 1],
                                [1, 1, 1, 1, 1, 0, 0, 0]], dtype=jnp.int32)

    fwd = jax.jit(functools.partial(instruction_bert_encoder_forward, num_heads=NUM_HEADS))
    out = jax.block_until_ready(fwd(params, input_ids, attention_mask))

    assert out.shape == (B, OUTPUT_DIM), out.shape
    assert out.dtype == jnp.float32
    assert bool(jnp.all(jnp.isfinite(out)))
    print("KERNEL_OK")
</pallas_src>

<mosaic_0001>
module attributes {stable_mosaic.version = 11 : i64} {
  func.func @_emb_ln_kernel(%arg0: i32, %arg1: i32, %arg2: memref<1x8x256xf32, #tpu.memory_space<vmem>>, %arg3: memref<8x256xf32, #tpu.memory_space<vmem>>, %arg4: memref<1x256xf32, #tpu.memory_space<vmem>>, %arg5: memref<1x256xf32, #tpu.memory_space<vmem>>, %arg6: memref<1x256xf32, #tpu.memory_space<vmem>>, %arg7: memref<1x8x256xbf16, #tpu.memory_space<vmem>>) attributes {dimension_semantics = [#tpu.dimension_semantics<parallel>, #tpu.dimension_semantics<parallel>], iteration_bounds = array<i64: 2, 1>, scalar_prefetch = 0 : i64, scratch_operands = 0 : i64, tpu.core_type = #tpu.core_type<tc>, window_params = [{transform_indices = @transform_0, window_bounds = array<i64: 1, 8, 256>}, {transform_indices = @transform_1, window_bounds = array<i64: 8, 256>}, {pipeline_mode = #tpu.pipeline_mode<synchronous>, transform_indices = @transform_2, window_bounds = array<i64: 1, 256>}, {pipeline_mode = #tpu.pipeline_mode<synchronous>, transform_indices = @transform_3, window_bounds = array<i64: 1, 256>}, {pipeline_mode = #tpu.pipeline_mode<synchronous>, transform_indices = @transform_4, window_bounds = array<i64: 1, 256>}, {transform_indices = @transform_5, window_bounds = array<i64: 1, 8, 256>}]} {
    %c0 = arith.constant 0 : index
    %c0_0 = arith.constant 0 : index
    %c0_1 = arith.constant 0 : index
    %0 = vector.load %arg2[%c0, %c0_0, %c0_1] : memref<1x8x256xf32, #tpu.memory_space<vmem>>, vector<1x8x256xf32>
    %1 = vector.shape_cast %0 : vector<1x8x256xf32> to vector<8x256xf32>
    %c0_2 = arith.constant 0 : index
    %c0_3 = arith.constant 0 : index
    %2 = vector.load %arg3[%c0_2, %c0_3] : memref<8x256xf32, #tpu.memory_space<vmem>>, vector<8x256xf32>
    %3 = arith.addf %1, %2 : vector<8x256xf32>
    %c0_4 = arith.constant 0 : index
    %c0_5 = arith.constant 0 : index
    %4 = vector.load %arg4[%c0_4, %c0_5] : memref<1x256xf32, #tpu.memory_space<vmem>>, vector<1x256xf32>
    %5 = vector.broadcast %4 : vector<1x256xf32> to vector<8x256xf32>
    %6 = arith.addf %3, %5 : vector<8x256xf32>
    %cst = arith.constant dense<0.000000e+00> : vector<8xf32>
    %7 = vector.multi_reduction <add>, %6, %cst [1] : vector<8x256xf32> to vector<8xf32>
    %8 = vector.shape_cast %7 : vector<8xf32> to vector<8x1xf32>
    %cst_6 = arith.constant 2.560000e+02 : f32
    %9 = vector.broadcast %cst_6 : f32 to vector<8x1xf32>
    %10 = arith.divf %8, %9 : vector<8x1xf32>
    %11 = vector.broadcast %10 : vector<8x1xf32> to vector<8x256xf32>
    %12 = arith.subf %6, %11 : vector<8x256xf32>
    %13 = arith.mulf %12, %12 : vector<8x256xf32>
    %cst_7 = arith.constant dense<0.000000e+00> : vector<8xf32>
    %14 = vector.multi_reduction <add>, %13, %cst_7 [1] : vector<8x256xf32> to vector<8xf32>
    %15 = vector.shape_cast %14 : vector<8xf32> to vector<8x1xf32>
    %cst_8 = arith.constant 2.560000e+02 : f32
    %16 = vector.broadcast %cst_8 : f32 to vector<8x1xf32>
    %17 = arith.divf %15, %16 : vector<8x1xf32>
    %18 = vector.broadcast %10 : vector<8x1xf32> to vector<8x256xf32>
    %19 = arith.subf %6, %18 : vector<8x256xf32>
    %cst_9 = arith.constant 9.99999996E-13 : f32
    %20 = vector.broadcast %cst_9 : f32 to vector<8x1xf32>
    %21 = arith.addf %17, %20 : vector<8x1xf32>
    %22 = math.rsqrt %21 : vector<8x1xf32>
    %23 = vector.broadcast %22 : vector<8x1xf32> to vector<8x256xf32>
    %24 = arith.mulf %19, %23 : vector<8x256xf32>
    %c0_10 = arith.constant 0 : index
    %c0_11 = arith.constant 0 : index
    %25 = vector.load %arg5[%c0_10, %c0_11] : memref<1x256xf32, #tpu.memory_space<vmem>>, vector<1x256xf32>
    %26 = vector.broadcast %25 : vector<1x256xf32> to vector<8x256xf32>
    %27 = arith.mulf %24, %26 : vector<8x256xf32>
    %c0_12 = arith.constant 0 : index
    %c0_13 = arith.constant 0 : index
    %28 = vector.load %arg6[%c0_12, %c0_13] : memref<1x256xf32, #tpu.memory_space<vmem>>, vector<1x256xf32>
    %29 = vector.broadcast %28 : vector<1x256xf32> to vector<8x256xf32>
    %30 = arith.addf %27, %29 : vector<8x256xf32>
    %31 = arith.truncf %30 : vector<8x256xf32> to vector<8x256xbf16>
    %c0_14 = arith.constant 0 : index
    %c0_15 = arith.constant 0 : index
    %c0_16 = arith.constant 0 : index
    %32 = vector.load %arg7[%c0_14, %c0_15, %c0_16] : memref<1x8x256xbf16, #tpu.memory_space<vmem>>, vector<1x8x256xbf16>
    %33 = vector.shape_cast %32 : vector<1x8x256xbf16> to vector<8x256xbf16>
    %34 = vector.shape_cast %31 : vector<8x256xbf16> to vector<1x8x256xbf16>
    tpu.vector_store %arg7[%c0_14, %c0_15, %c0_16], %34 {strides = array<i32>} : memref<1x8x256xbf16, #tpu.memory_space<vmem>>, vector<1x8x256xbf16>,
    return
  }
  func.func @transform_0(%arg0: i32, %arg1: i32) -> (i32, i32, i32) {
    %c0_i32 = arith.constant 0 : i32
    %c0_i32_0 = arith.constant 0 : i32
    return %arg0, %arg1, %c0_i32 : i32, i32, i32
  }
  func.func @transform_1(%arg0: i32, %arg1: i32) -> (i32, i32) {
    %c0_i32 = arith.constant 0 : i32
    %c0_i32_0 = arith.constant 0 : i32
    return %arg1, %c0_i32 : i32, i32
  }
  func.func @transform_2(%arg0: i32, %arg1: i32) -> (i32, i32) {
    %c0_i32 = arith.constant 0 : i32
    %c0_i32_0 = arith.constant 0 : i32
    %c0_i32_1 = arith.constant 0 : i32
    return %c0_i32, %c0_i32_0 : i32, i32
  }
  func.func @transform_3(%arg0: i32, %arg1: i32) -> (i32, i32) {
    %c0_i32 = arith.constant 0 : i32
    %c0_i32_0 = arith.constant 0 : i32
    %c0_i32_1 = arith.constant 0 : i32
    return %c0_i32, %c0_i32_0 : i32, i32
  }
  func.func @transform_4(%arg0: i32, %arg1: i32) -> (i32, i32) {
    %c0_i32 = arith.constant 0 : i32
    %c0_i32_0 = arith.constant 0 : i32
    %c0_i32_1 = arith.constant 0 : i32
    return %c0_i32, %c0_i32_0 : i32, i32
  }
  func.func @transform_5(%arg0: i32, %arg1: i32) -> (i32, i32, i32) {
    %c0_i32 = arith.constant 0 : i32
    %c0_i32_0 = arith.constant 0 : i32
    return %arg0, %arg1, %c0_i32 : i32, i32, i32
  }
}

module attributes {stable_mosaic.version = 11 : i64} {
  func.func @_matmul_kernel(%arg0: i32, %arg1: i32, %arg2: i32, %arg3: memref<16x256xbf16, #tpu.memory_space<vmem>>, %arg4: memref<256x768xbf16, #tpu.memory_space<vmem>>, %arg5: memref<1x768xf32, #tpu.memory_space<vmem>>, %arg6: memref<16x768xbf16, #tpu.memory_space<vmem>>, %arg7: memref<16x768xf32, #tpu.memory_space<vmem>>) attributes {dimension_semantics = [#tpu.dimension_semantics<parallel>, #tpu.dimension_semantics<parallel>, #tpu.dimension_semantics<arbitrary>], iteration_bounds = array<i64: 1, 1, 1>, scalar_prefetch = 0 : i64, scratch_operands = 1 : i64, tpu.core_type = #tpu.core_type<tc>, window_params = [{transform_indices = @transform_0, window_bounds = array<i64: 16, 256>}, {transform_indices = @transform_1, window_bounds = array<i64: 256, 768>}, {transform_indices = @transform_2, window_bounds = array<i64: 1, 768>}, {transform_indices = @transform_3, window_bounds = array<i64: 16, 768>}]} {
    %c0_i32 = arith.constant 0 : i32
    %0 = arith.cmpi eq, %arg2, %c0_i32 : i32
    %1 = arith.extui %0 : i1 to i32
    %c0_i32_0 = arith.constant 0 : i32
    %2 = arith.cmpi ne, %1, %c0_i32_0 : i32
    scf.if %2 {
      %cst_10 = arith.constant 0.000000e+00 : f32
      %12 = vector.broadcast %cst_10 : f32 to vector<16x768xf32>
      %c0_11 = arith.constant 0 : index
      %c0_12 = arith.constant 0 : index
      %13 = vector.load %arg7[%c0_11, %c0_12] : memref<16x768xf32, #tpu.memory_space<vmem>>, vector<16x768xf32>
      tpu.vector_store %arg7[%c0_11, %c0_12], %12 {strides = array<i32>} : memref<16x768xf32, #tpu.memory_space<vmem>>, vector<16x768xf32>,
    } else {
    }
    %c0 = arith.constant 0 : index
    %c0_1 = arith.constant 0 : index
    %3 = vector.load %arg7[%c0, %c0_1] : memref<16x768xf32, #tpu.memory_space<vmem>>, vector<16x768xf32>
    %c0_2 = arith.constant 0 : index
    %c0_3 = arith.constant 0 : index
    %4 = vector.load %arg3[%c0_2, %c0_3] : memref<16x256xbf16, #tpu.memory_space<vmem>>, vector<16x256xbf16>
    %c0_4 = arith.constant 0 : index
    %c0_5 = arith.constant 0 : index
    %5 = vector.load %arg4[%c0_4, %c0_5] : memref<256x768xbf16, #tpu.memory_space<vmem>>, vector<256x768xbf16>
    %cst = arith.constant dense<0.000000e+00> : vector<16x768xf32>
    %6 = tpu.matmul %4, %5, %cst {dimension_numbers = #tpu.dot_dimension_numbers<[1], [0], [0], [1], [0, 0, 1, 1], [], []>} : vector<16x256xbf16>, vector<256x768xbf16>, vector<16x768xf32> -> vector<16x768xf32>
    %7 = arith.addf %3, %6 : vector<16x768xf32>
    %c0_6 = arith.constant 0 : index
    %c0_7 = arith.constant 0 : index
    %8 = vector.load %arg7[%c0_6, %c0_7] : memref<16x768xf32, #tpu.memory_space<vmem>>, vector<16x768xf32>
    tpu.vector_store %arg7[%c0_6, %c0_7], %7 {strides = array<i32>} : memref<16x768xf32, #tpu.memory_space<vmem>>, vector<16x768xf32>,
    %c0_i32_8 = arith.constant 0 : i32
    %9 = arith.cmpi eq, %arg2, %c0_i32_8 : i32
    %10 = arith.extui %9 : i1 to i32
    %c0_i32_9 = arith.constant 0 : i32
    %11 = arith.cmpi ne, %10, %c0_i32_9 : i32
    scf.if %11 {
      %c0_10 = arith.constant 0 : index
      %c0_11 = arith.constant 0 : index
      %12 = vector.load %arg7[%c0_10, %c0_11] : memref<16x768xf32, #tpu.memory_space<vmem>>, vector<16x768xf32>
      %c0_12 = arith.constant 0 : index
      %c0_13 = arith.constant 0 : index
      %13 = vector.load %arg5[%c0_12, %c0_13] : memref<1x768xf32, #tpu.memory_space<vmem>>, vector<1x768xf32>
      %14 = vector.broadcast %13 : vector<1x768xf32> to vector<16x768xf32>
      %15 = arith.addf %12, %14 : vector<16x768xf32>
      %16 = arith.truncf %15 : vector<16x768xf32> to vector<16x768xbf16>
      %c0_14 = arith.constant 0 : index
      %c0_15 = arith.constant 0 : index
      %17 = vector.load %arg6[%c0_14, %c0_15] : memref<16x768xbf16, #tpu.memory_space<vmem>>, vector<16x768xbf16>
      tpu.vector_store %arg6[%c0_14, %c0_15], %16 {strides = array<i32>} : memref<16x768xbf16, #tpu.memory_space<vmem>>, vector<16x768xbf16>,
    } else {
    }
    return
  }
  func.func @transform_0(%arg0: i32, %arg1: i32, %arg2: i32) -> (i32, i32) {
    %c0_i32 = arith.constant 0 : i32
    return %arg0, %arg2 : i32, i32
  }
  func.func @transform_1(%arg0: i32, %arg1: i32, %arg2: i32) -> (i32, i32) {
    %c0_i32 = arith.constant 0 : i32
    return %arg2, %arg1 : i32, i32
  }
  func.func @transform_2(%arg0: i32, %arg1: i32, %arg2: i32) -> (i32, i32) {
    %c0_i32 = arith.constant 0 : i32
    %c0_i32_0 = arith.constant 0 : i32
    return %c0_i32, %arg1 : i32, i32
  }
  func.func @transform_3(%arg0: i32, %arg1: i32, %arg2: i32) -> (i32, i32) {
    %c0_i32 = arith.constant 0 : i32
    return %arg0, %arg1 : i32, i32
  }
}

module attributes {stable_mosaic.version = 11 : i64} {
  func.func @_attn_kernel(%arg0: i32, %arg1: i32, %arg2: i32, %arg3: i32, %arg4: memref<1x8x128xbf16, #tpu.memory_space<vmem>>, %arg5: memref<1x8x128xbf16, #tpu.memory_space<vmem>>, %arg6: memref<1x8x128xbf16, #tpu.memory_space<vmem>>, %arg7: memref<1x1x8xf32, #tpu.memory_space<vmem>>, %arg8: memref<1x8x128xbf16, #tpu.memory_space<vmem>>, %arg9: memref<1x8x1xf32, #tpu.memory_space<vmem>>, %arg10: memref<1x8x1xf32, #tpu.memory_space<vmem>>, %arg11: memref<1x8x128xf32, #tpu.memory_space<vmem>>) attributes {dimension_semantics = [#tpu.dimension_semantics<parallel>, #tpu.dimension_semantics<parallel>, #tpu.dimension_semantics<parallel>, #tpu.dimension_semantics<arbitrary>], iteration_bounds = array<i64: 2, 2, 1, 1>, scalar_prefetch = 0 : i64, scratch_operands = 3 : i64, tpu.core_type = #tpu.core_type<tc>, window_params = [{transform_indices = @transform_0, window_bounds = array<i64: 1, 8, 128>}, {transform_indices = @transform_1, window_bounds = array<i64: 1, 8, 128>}, {transform_indices = @transform_2, window_bounds = array<i64: 1, 8, 128>}, {transform_indices = @transform_3, window_bounds = array<i64: 1, 1, 8>}, {transform_indices = @transform_4, window_bounds = array<i64: 1, 8, 128>}]} {
    %c0_i32 = arith.constant 0 : i32
    %0 = arith.cmpi eq, %arg3, %c0_i32 : i32
    %1 = arith.extui %0 : i1 to i32
    %c0_i32_0 = arith.constant 0 : i32
    %2 = arith.cmpi ne, %1, %c0_i32_0 : i32
    scf.if %2 {
      %cst_36 = arith.constant -1.000000e+30 : f32
      %53 = vector.broadcast %cst_36 : f32 to vector<1x8x1xf32>
      %c0_37 = arith.constant 0 : index
      %c0_38 = arith.constant 0 : index
      %c0_39 = arith.constant 0 : index
      %54 = vector.load %arg9[%c0_37, %c0_38, %c0_39] : memref<1x8x1xf32, #tpu.memory_space<vmem>>, vector<1x8x1xf32>
      tpu.vector_store %arg9[%c0_37, %c0_38, %c0_39], %53 {strides = array<i32>} : memref<1x8x1xf32, #tpu.memory_space<vmem>>, vector<1x8x1xf32>,
      %cst_40 = arith.constant 0.000000e+00 : f32
      %55 = vector.broadcast %cst_40 : f32 to vector<1x8x1xf32>
      %c0_41 = arith.constant 0 : index
      %c0_42 = arith.constant 0 : index
      %c0_43 = arith.constant 0 : index
      %56 = vector.load %arg10[%c0_41, %c0_42, %c0_43] : memref<1x8x1xf32, #tpu.memory_space<vmem>>, vector<1x8x1xf32>
      tpu.vector_store %arg10[%c0_41, %c0_42, %c0_43], %55 {strides = array<i32>} : memref<1x8x1xf32, #tpu.memory_space<vmem>>, vector<1x8x1xf32>,
      %cst_44 = arith.constant 0.000000e+00 : f32
      %57 = vector.broadcast %cst_44 : f32 to vector<1x8x128xf32>
      %c0_45 = arith.constant 0 : index
      %c0_46 = arith.constant 0 : index
      %c0_47 = arith.constant 0 : index
      %58 = vector.load %arg11[%c0_45, %c0_46, %c0_47] : memref<1x8x128xf32, #tpu.memory_space<vmem>>, vector<1x8x128xf32>
      tpu.vector_store %arg11[%c0_45, %c0_46, %c0_47], %57 {strides = array<i32>} : memref<1x8x128xf32, #tpu.memory_space<vmem>>, vector<1x8x128xf32>,
    } else {
    }
    %c0 = arith.constant 0 : index
    %c0_1 = arith.constant 0 : index
    %c0_2 = arith.constant 0 : index
    %3 = vector.load %arg7[%c0, %c0_1, %c0_2] : memref<1x1x8xf32, #tpu.memory_space<vmem>>, vector<1x1x8xf32>
    %4 = vector.shape_cast %3 : vector<1x1x8xf32> to vector<1x8xf32>
    %c0_3 = arith.constant 0 : index
    %c0_4 = arith.constant 0 : index
    %c0_5 = arith.constant 0 : index
    %5 = vector.load %arg4[%c0_3, %c0_4, %c0_5] : memref<1x8x128xbf16, #tpu.memory_space<vmem>>, vector<1x8x128xbf16>
    %6 = vector.shape_cast %5 : vector<1x8x128xbf16> to vector<8x128xbf16>
    %c0_6 = arith.constant 0 : index
    %c0_7 = arith.constant 0 : index
    %c0_8 = arith.constant 0 : index
    %7 = vector.load %arg5[%c0_6, %c0_7, %c0_8] : memref<1x8x128xbf16, #tpu.memory_space<vmem>>, vector<1x8x128xbf16>
    %8 = vector.shape_cast %7 : vector<1x8x128xbf16> to vector<8x128xbf16>
    %c0_9 = arith.constant 0 : index
    %c0_10 = arith.constant 0 : index
    %c0_11 = arith.constant 0 : index
    %9 = vector.load %arg6[%c0_9, %c0_10, %c0_11] : memref<1x8x128xbf16, #tpu.memory_space<vmem>>, vector<1x8x128xbf16>
    %10 = vector.shape_cast %9 : vector<1x8x128xbf16> to vector<8x128xbf16>
    %11 = arith.extf %6 : vector<8x128xbf16> to vector<8x128xf32>
    %cst = arith.constant 0.0883883461 : f32
    %12 = vector.broadcast %cst : f32 to vector<8x128xf32>
    %13 = arith.mulf %11, %12 : vector<8x128xf32>
    %14 = arith.truncf %13 : vector<8x128xf32> to vector<8x128xbf16>
    %cst_12 = arith.constant dense<0.000000e+00> : vector<8x8xf32>
    %15 = tpu.matmul %14, %8, %cst_12 {dimension_numbers = #tpu.dot_dimension_numbers<[1], [1], [0], [0], [0, 0, 1, 0], [], []>} : vector<8x128xbf16>, vector<8x128xbf16>, vector<8x8xf32> -> vector<8x8xf32>
    %16 = vector.broadcast %4 : vector<1x8xf32> to vector<8x8xf32>
    %17 = arith.addf %15, %16 : vector<8x8xf32>
    %c0_13 = arith.constant 0 : index
    %c0_14 = arith.constant 0 : index
    %c0_15 = arith.constant 0 : index
    %18 = vector.load %arg9[%c0_13, %c0_14, %c0_15] : memref<1x8x1xf32, #tpu.memory_space<vmem>>, vector<1x8x1xf32>
    %19 = vector.shape_cast %18 : vector<1x8x1xf32> to vector<8x1xf32>
    %cst_16 = arith.constant dense<0xFF800000> : vector<8xf32>
    %20 = vector.multi_reduction <maximumf>, %17, %cst_16 [1] : vector<8x8xf32> to vector<8xf32>
    %21 = vector.shape_cast %20 : vector<8xf32> to vector<8x1xf32>
    %22 = arith.maximumf %19, %21 : vector<8x1xf32>
    %23 = arith.subf %19, %22 : vector<8x1xf32>
    %24 = math.exp %23 : vector<8x1xf32>
    %25 = vector.broadcast %22 : vector<8x1xf32> to vector<8x8xf32>
    %26 = arith.subf %17, %25 : vector<8x8xf32>
    %27 = math.exp %26 : vector<8x8xf32>
    %c0_17 = arith.constant 0 : index
    %c0_18 = arith.constant 0 : index
    %c0_19 = arith.constant 0 : index
    %28 = vector.load %arg10[%c0_17, %c0_18, %c0_19] : memref<1x8x1xf32, #tpu.memory_space<vmem>>, vector<1x8x1xf32>
    %29 = vector.shape_cast %28 : vector<1x8x1xf32> to vector<8x1xf32>
    %30 = arith.mulf %24, %29 : vector<8x1xf32>
    %cst_20 = arith.constant dense<0.000000e+00> : vector<8xf32>
    %31 = vector.multi_reduction <add>, %27, %cst_20 [1] : vector<8x8xf32> to vector<8xf32>
    %32 = vector.shape_cast %31 : vector<8xf32> to vector<8x1xf32>
    %33 = arith.addf %30, %32 : vector<8x1xf32>
    %c0_21 = arith.constant 0 : index
    %c0_22 = arith.constant 0 : index
    %c0_23 = arith.constant 0 : index
    %34 = vector.load %arg10[%c0_21, %c0_22, %c0_23] : memref<1x8x1xf32, #tpu.memory_space<vmem>>, vector<1x8x1xf32>
    %35 = vector.shape_cast %34 : vector<1x8x1xf32> to vector<8x1xf32>
    %36 = vector.shape_cast %33 : vector<8x1xf32> to vector<1x8x1xf32>
    tpu.vector_store %arg10[%c0_21, %c0_22, %c0_23], %36 {strides = array<i32>} : memref<1x8x1xf32, #tpu.memory_space<vmem>>, vector<1x8x1xf32>,
    %c0_24 = arith.constant 0 : index
    %c0_25 = arith.constant 0 : index
    %c0_26 = arith.constant 0 : index
    %37 = vector.load %arg11[%c0_24, %c0_25, %c0_26] : memref<1x8x128xf32, #tpu.memory_space<vmem>>, vector<1x8x128xf32>
    %38 = vector.shape_cast %37 : vector<1x8x128xf32> to vector<8x128xf32>
    %39 = vector.broadcast %24 : vector<8x1xf32> to vector<8x128xf32>
    %40 = arith.mulf %39, %38 : vector<8x128xf32>
    %41 = arith.truncf %27 : vector<8x8xf32> to vector<8x8xbf16>
    %cst_27 = arith.constant dense<0.000000e+00> : vector<8x128xf32>
    %42 = tpu.matmul %41, %10, %cst_27 {dimension_numbers = #tpu.dot_dimension_numbers<[1], [0], [0], [1], [0, 0, 1, 1], [], []>} : vector<8x8xbf16>, vector<8x128xbf16>, vector<8x128xf32> -> vector<8x128xf32>
    %43 = arith.addf %40, %42 : vector<8x128xf32>
    %c0_28 = arith.constant 0 : index
    %c0_29 = arith.constant 0 : index
    %c0_30 = arith.constant 0 : index
    %44 = vector.load %arg11[%c0_28, %c0_29, %c0_30] : memref<1x8x128xf32, #tpu.memory_space<vmem>>, vector<1x8x128xf32>
    %45 = vector.shape_cast %44 : vector<1x8x128xf32> to vector<8x128xf32>
    %46 = vector.shape_cast %43 : vector<8x128xf32> to vector<1x8x128xf32>
    tpu.vector_store %arg11[%c0_28, %c0_29, %c0_30], %46 {strides = array<i32>} : memref<1x8x128xf32, #tpu.memory_space<vmem>>, vector<1x8x128xf32>,
    %c0_31 = arith.constant 0 : index
    %c0_32 = arith.constant 0 : index
    %c0_33 = arith.constant 0 : index
    %47 = vector.load %arg9[%c0_31, %c0_32, %c0_33] : memref<1x8x1xf32, #tpu.memory_space<vmem>>, vector<1x8x1xf32>
    %48 = vector.shape_cast %47 : vector<1x8x1xf32> to vector<8x1xf32>
    %49 = vector.shape_cast %22 : vector<8x1xf32> to vector<1x8x1xf32>
    tpu.vector_store %arg9[%c0_31, %c0_32, %c0_33], %49 {strides = array<i32>} : memref<1x8x1xf32, #tpu.memory_space<vmem>>, vector<1x8x1xf32>,
    %c0_i32_34 = arith.constant 0 : i32
    %50 = arith.cmpi eq, %arg3, %c0_i32_34 : i32
    %51 = arith.extui %50 : i1 to i32
    %c0_i32_35 = arith.constant 0 : i32
    %52 = arith.cmpi ne, %51, %c0_i32_35 : i32
    scf.if %52 {
      %c0_36 = arith.constant 0 : index
      %c0_37 = arith.constant 0 : index
      %c0_38 = arith.constant 0 : index
      %53 = vector.load %arg11[%c0_36, %c0_37, %c0_38] : memref<1x8x128xf32, #tpu.memory_space<vmem>>, vector<1x8x128xf32>
      %54 = vector.shape_cast %53 : vector<1x8x128xf32> to vector<8x128xf32>
      %c0_39 = arith.constant 0 : index
      %c0_40 = arith.constant 0 : index
      %c0_41 = arith.constant 0 : index
      %55 = vector.load %arg10[%c0_39, %c0_40, %c0_41] : memref<1x8x1xf32, #tpu.memory_space<vmem>>, vector<1x8x1xf32>
      %56 = vector.shape_cast %55 : vector<1x8x1xf32> to vector<8x1xf32>
      %57 = tpu.reciprocal %56 {approx = true} : vector<8x1xf32> -> vector<8x1xf32>
      %58 = vector.broadcast %57 : vector<8x1xf32> to vector<8x128xf32>
      %59 = arith.mulf %54, %58 : vector<8x128xf32>
      %60 = arith.truncf %59 : vector<8x128xf32> to vector<8x128xbf16>
      %c0_42 = arith.constant 0 : index
      %c0_43 = arith.constant 0 : index
      %c0_44 = arith.constant 0 : index
      %61 = vector.load %arg8[%c0_42, %c0_43, %c0_44] : memref<1x8x128xbf16, #tpu.memory_space<vmem>>, vector<1x8x128xbf16>
      %62 = vector.shape_cast %61 : vector<1x8x128xbf16> to vector<8x128xbf16>
      %63 = vector.shape_cast %60 : vector<8x128xbf16> to vector<1x8x128xbf16>
      tpu.vector_store %arg8[%c0_42, %c0_43, %c0_44], %63 {strides = array<i32>} : memref<1x8x128xbf16, #tpu.memory_space<vmem>>, vector<1x8x128xbf16>,
    } else {
    }
    return
  }
  func.func @transform_0(%arg0: i32, %arg1: i32, %arg2: i32, %arg3: i32) -> (i32, i32, i32) {
    %c0_i32 = arith.constant 0 : i32
    return %arg0, %arg2, %arg1 : i32, i32, i32
  }
  func.func @transform_1(%arg0: i32, %arg1: i32, %arg2: i32, %arg3: i32) -> (i32, i32, i32) {
    %c2_i32 = arith.constant 2 : i32
    %0 = arith.addi %arg1, %c2_i32 : i32
    %c0_i32 = arith.constant 0 : i32
    return %arg0, %arg3, %0 : i32, i32, i32
  }
  func.func @transform_2(%arg0: i32, %arg1: i32, %arg2: i32, %arg3: i32) -> (i32, i32, i32) {
    %c4_i32 = arith.constant 4 : i32
    %0 = arith.addi %arg1, %c4_i32 : i32
    %c0_i32 = arith.constant 0 : i32
    return %arg0, %arg3, %0 : i32, i32, i32
  }
  func.func @transform_3(%arg0: i32, %arg1: i32, %arg2: i32, %arg3: i32) -> (i32, i32, i32) {
    %c0_i32 = arith.constant 0 : i32
    %c0_i32_0 = arith.constant 0 : i32
    return %arg0, %c0_i32, %arg3 : i32, i32, i32
  }
  func.func @transform_4(%arg0: i32, %arg1: i32, %arg2: i32, %arg3: i32) -> (i32, i32, i32) {
    %c0_i32 = arith.constant 0 : i32
    return %arg0, %arg2, %arg1 : i32, i32, i32
  }
}

module attributes {stable_mosaic.version = 11 : i64} {
  func.func @_matmul_add_ln_kernel(%arg0: i32, %arg1: i32, %arg2: memref<16x256xbf16, #tpu.memory_space<vmem>>, %arg3: memref<256x256xbf16, #tpu.memory_space<vmem>>, %arg4: memref<1x256xf32, #tpu.memory_space<vmem>>, %arg5: memref<16x256xbf16, #tpu.memory_space<vmem>>, %arg6: memref<1x256xf32, #tpu.memory_space<vmem>>, %arg7: memref<1x256xf32, #tpu.memory_space<vmem>>, %arg8: memref<16x256xbf16, #tpu.memory_space<vmem>>, %arg9: memref<16x256xf32, #tpu.memory_space<vmem>>) attributes {dimension_semantics = [#tpu.dimension_semantics<parallel>, #tpu.dimension_semantics<arbitrary>], iteration_bounds = array<i64: 1, 1>, scalar_prefetch = 0 : i64, scratch_operands = 1 : i64, tpu.core_type = #tpu.core_type<tc>, window_params = [{transform_indices = @transform_0, window_bounds = array<i64: 16, 256>}, {transform_indices = @transform_1, window_bounds = array<i64: 256, 256>}, {pipeline_mode = #tpu.pipeline_mode<synchronous>, transform_indices = @transform_2, window_bounds = array<i64: 1, 256>}, {transform_indices = @transform_3, window_bounds = array<i64: 16, 256>}, {pipeline_mode = #tpu.pipeline_mode<synchronous>, transform_indices = @transform_4, window_bounds = array<i64: 1, 256>}, {pipeline_mode = #tpu.pipeline_mode<synchronous>, transform_indices = @transform_5, window_bounds = array<i64: 1, 256>}, {transform_indices = @transform_6, window_bounds = array<i64: 16, 256>}]} {
    %c0_i32 = arith.constant 0 : i32
    %0 = arith.cmpi eq, %arg1, %c0_i32 : i32
    %1 = arith.extui %0 : i1 to i32
    %c0_i32_0 = arith.constant 0 : i32
    %2 = arith.cmpi ne, %1, %c0_i32_0 : i32
    scf.if %2 {
      %cst_10 = arith.constant 0.000000e+00 : f32
      %12 = vector.broadcast %cst_10 : f32 to vector<16x256xf32>
      %c0_11 = arith.constant 0 : index
      %c0_12 = arith.constant 0 : index
      %13 = vector.load %arg9[%c0_11, %c0_12] : memref<16x256xf32, #tpu.memory_space<vmem>>, vector<16x256xf32>
      tpu.vector_store %arg9[%c0_11, %c0_12], %12 {strides = array<i32>} : memref<16x256xf32, #tpu.memory_space<vmem>>, vector<16x256xf32>,
    } else {
    }
    %c0 = arith.constant 0 : index
    %c0_1 = arith.constant 0 : index
    %3 = vector.load %arg9[%c0, %c0_1] : memref<16x256xf32, #tpu.memory_space<vmem>>, vector<16x256xf32>
    %c0_2 = arith.constant 0 : index
    %c0_3 = arith.constant 0 : index
    %4 = vector.load %arg2[%c0_2, %c0_3] : memref<16x256xbf16, #tpu.memory_space<vmem>>, vector<16x256xbf16>
    %c0_4 = arith.constant 0 : index
    %c0_5 = arith.constant 0 : index
    %5 = vector.load %arg3[%c0_4, %c0_5] : memref<256x256xbf16, #tpu.memory_space<vmem>>, vector<256x256xbf16>
    %cst = arith.constant dense<0.000000e+00> : vector<16x256xf32>
    %6 = tpu.matmul %4, %5, %cst {dimension_numbers = #tpu.dot_dimension_numbers<[1], [0], [0], [1], [0, 0, 1, 1], [], []>} : vector<16x256xbf16>, vector<256x256xbf16>, vector<16x256xf32> -> vector<16x256xf32>
    %7 = arith.addf %3, %6 : vector<16x256xf32>
    %c0_6 = arith.constant 0 : index
    %c0_7 = arith.constant 0 : index
    %8 = vector.load %arg9[%c0_6, %c0_7] : memref<16x256xf32, #tpu.memory_space<vmem>>, vector<16x256xf32>
    tpu.vector_store %arg9[%c0_6, %c0_7], %7 {strides = array<i32>} : memref<16x256xf32, #tpu.memory_space<vmem>>, vector<16x256xf32>,
    %c0_i32_8 = arith.constant 0 : i32
    %9 = arith.cmpi eq, %arg1, %c0_i32_8 : i32
    %10 = arith.extui %9 : i1 to i32
    %c0_i32_9 = arith.constant 0 : i32
    %11 = arith.cmpi ne, %10, %c0_i32_9 : i32
    scf.if %11 {
      %c0_10 = arith.constant 0 : index
      %c0_11 = arith.constant 0 : index
      %12 = vector.load %arg9[%c0_10, %c0_11] : memref<16x256xf32, #tpu.memory_space<vmem>>, vector<16x256xf32>
      %c0_12 = arith.constant 0 : index
      %c0_13 = arith.constant 0 : index
      %13 = vector.load %arg4[%c0_12, %c0_13] : memref<1x256xf32, #tpu.memory_space<vmem>>, vector<1x256xf32>
      %14 = vector.broadcast %13 : vector<1x256xf32> to vector<16x256xf32>
      %15 = arith.addf %12, %14 : vector<16x256xf32>
      %c0_14 = arith.constant 0 : index
      %c0_15 = arith.constant 0 : index
      %16 = vector.load %arg5[%c0_14, %c0_15] : memref<16x256xbf16, #tpu.memory_space<vmem>>, vector<16x256xbf16>
      %17 = arith.extf %16 : vector<16x256xbf16> to vector<16x256xf32>
      %18 = arith.addf %15, %17 : vector<16x256xf32>
      %cst_16 = arith.constant dense<0.000000e+00> : vector<16xf32>
      %19 = vector.multi_reduction <add>, %18, %cst_16 [1] : vector<16x256xf32> to vector<16xf32>
      %20 = vector.shape_cast %19 : vector<16xf32> to vector<16x1xf32>
      %cst_17 = arith.constant 2.560000e+02 : f32
      %21 = vector.broadcast %cst_17 : f32 to vector<16x1xf32>
      %22 = arith.divf %20, %21 : vector<16x1xf32>
      %23 = vector.broadcast %22 : vector<16x1xf32> to vector<16x256xf32>
      %24 = arith.subf %18, %23 : vector<16x256xf32>
      %25 = arith.mulf %24, %24 : vector<16x256xf32>
      %cst_18 = arith.constant dense<0.000000e+00> : vector<16xf32>
      %26 = vector.multi_reduction <add>, %25, %cst_18 [1] : vector<16x256xf32> to vector<16xf32>
      %27 = vector.shape_cast %26 : vector<16xf32> to vector<16x1xf32>
      %cst_19 = arith.constant 2.560000e+02 : f32
      %28 = vector.broadcast %cst_19 : f32 to vector<16x1xf32>
      %29 = arith.divf %27, %28 : vector<16x1xf32>
      %30 = vector.broadcast %22 : vector<16x1xf32> to vector<16x256xf32>
      %31 = arith.subf %18, %30 : vector<16x256xf32>
      %cst_20 = arith.constant 9.99999996E-13 : f32
      %32 = vector.broadcast %cst_20 : f32 to vector<16x1xf32>
      %33 = arith.addf %29, %32 : vector<16x1xf32>
      %34 = math.rsqrt %33 : vector<16x1xf32>
      %35 = vector.broadcast %34 : vector<16x1xf32> to vector<16x256xf32>
      %36 = arith.mulf %31, %35 : vector<16x256xf32>
      %c0_21 = arith.constant 0 : index
      %c0_22 = arith.constant 0 : index
      %37 = vector.load %arg6[%c0_21, %c0_22] : memref<1x256xf32, #tpu.memory_space<vmem>>, vector<1x256xf32>
      %38 = vector.broadcast %37 : vector<1x256xf32> to vector<16x256xf32>
      %39 = arith.mulf %36, %38 : vector<16x256xf32>
      %c0_23 = arith.constant 0 : index
      %c0_24 = arith.constant 0 : index
      %40 = vector.load %arg7[%c0_23, %c0_24] : memref<1x256xf32, #tpu.memory_space<vmem>>, vector<1x256xf32>
      %41 = vector.broadcast %40 : vector<1x256xf32> to vector<16x256xf32>
      %42 = arith.addf %39, %41 : vector<16x256xf32>
      %43 = arith.truncf %42 : vector<16x256xf32> to vector<16x256xbf16>
      %c0_25 = arith.constant 0 : index
      %c0_26 = arith.constant 0 : index
      %44 = vector.load %arg8[%c0_25, %c0_26] : memref<16x256xbf16, #tpu.memory_space<vmem>>, vector<16x256xbf16>
      tpu.vector_store %arg8[%c0_25, %c0_26], %43 {strides = array<i32>} : memref<16x256xbf16, #tpu.memory_space<vmem>>, vector<16x256xbf16>,
    } else {
    }
    return
  }
  func.func @transform_0(%arg0: i32, %arg1: i32) -> (i32, i32) {
    %c0_i32 = arith.constant 0 : i32
    return %arg0, %arg1 : i32, i32
  }
  func.func @transform_1(%arg0: i32, %arg1: i32) -> (i32, i32) {
    %c0_i32 = arith.constant 0 : i32
    %c0_i32_0 = arith.constant 0 : i32
    return %arg1, %c0_i32 : i32, i32
  }
  func.func @transform_2(%arg0: i32, %arg1: i32) -> (i32, i32) {
    %c0_i32 = arith.constant 0 : i32
    %c0_i32_0 = arith.constant 0 : i32
    %c0_i32_1 = arith.constant 0 : i32
    return %c0_i32, %c0_i32_0 : i32, i32
  }
  func.func @transform_3(%arg0: i32, %arg1: i32) -> (i32, i32) {
    %c0_i32 = arith.constant 0 : i32
    %c0_i32_0 = arith.constant 0 : i32
    return %arg0, %c0_i32 : i32, i32
  }
  func.func @transform_4(%arg0: i32, %arg1: i32) -> (i32, i32) {
    %c0_i32 = arith.constant 0 : i32
    %c0_i32_0 = arith.constant 0 : i32
    %c0_i32_1 = arith.constant 0 : i32
    return %c0_i32, %c0_i32_0 : i32, i32
  }
  func.func @transform_5(%arg0: i32, %arg1: i32) -> (i32, i32) {
    %c0_i32 = arith.constant 0 : i32
    %c0_i32_0 = arith.constant 0 : i32
    %c0_i32_1 = arith.constant 0 : i32
    return %c0_i32, %c0_i32_0 : i32, i32
  }
  func.func @transform_6(%arg0: i32, %arg1: i32) -> (i32, i32) {
    %c0_i32 = arith.constant 0 : i32
    %c0_i32_0 = arith.constant 0 : i32
    return %arg0, %c0_i32 : i32, i32
  }
}

module attributes {stable_mosaic.version = 11 : i64} {
  func.func @_matmul_kernel(%arg0: i32, %arg1: i32, %arg2: i32, %arg3: memref<16x256xbf16, #tpu.memory_space<vmem>>, %arg4: memref<256x512xbf16, #tpu.memory_space<vmem>>, %arg5: memref<1x512xf32, #tpu.memory_space<vmem>>, %arg6: memref<16x512xbf16, #tpu.memory_space<vmem>>, %arg7: memref<16x512xf32, #tpu.memory_space<vmem>>) attributes {dimension_semantics = [#tpu.dimension_semantics<parallel>, #tpu.dimension_semantics<parallel>, #tpu.dimension_semantics<arbitrary>], iteration_bounds = array<i64: 1, 1, 1>, scalar_prefetch = 0 : i64, scratch_operands = 1 : i64, tpu.core_type = #tpu.core_type<tc>, window_params = [{transform_indices = @transform_0, window_bounds = array<i64: 16, 256>}, {transform_indices = @transform_1, window_bounds = array<i64: 256, 512>}, {transform_indices = @transform_2, window_bounds = array<i64: 1, 512>}, {transform_indices = @transform_3, window_bounds = array<i64: 16, 512>}]} {
    %c0_i32 = arith.constant 0 : i32
    %0 = arith.cmpi eq, %arg2, %c0_i32 : i32
    %1 = arith.extui %0 : i1 to i32
    %c0_i32_0 = arith.constant 0 : i32
    %2 = arith.cmpi ne, %1, %c0_i32_0 : i32
    scf.if %2 {
      %cst_10 = arith.constant 0.000000e+00 : f32
      %12 = vector.broadcast %cst_10 : f32 to vector<16x512xf32>
      %c0_11 = arith.constant 0 : index
      %c0_12 = arith.constant 0 : index
      %13 = vector.load %arg7[%c0_11, %c0_12] : memref<16x512xf32, #tpu.memory_space<vmem>>, vector<16x512xf32>
      tpu.vector_store %arg7[%c0_11, %c0_12], %12 {strides = array<i32>} : memref<16x512xf32, #tpu.memory_space<vmem>>, vector<16x512xf32>,
    } else {
    }
    %c0 = arith.constant 0 : index
    %c0_1 = arith.constant 0 : index
    %3 = vector.load %arg7[%c0, %c0_1] : memref<16x512xf32, #tpu.memory_space<vmem>>, vector<16x512xf32>
    %c0_2 = arith.constant 0 : index
    %c0_3 = arith.constant 0 : index
    %4 = vector.load %arg3[%c0_2, %c0_3] : memref<16x256xbf16, #tpu.memory_space<vmem>>, vector<16x256xbf16>
    %c0_4 = arith.constant 0 : index
    %c0_5 = arith.constant 0 : index
    %5 = vector.load %arg4[%c0_4, %c0_5] : memref<256x512xbf16, #tpu.memory_space<vmem>>, vector<256x512xbf16>
    %cst = arith.constant dense<0.000000e+00> : vector<16x512xf32>
    %6 = tpu.matmul %4, %5, %cst {dimension_numbers = #tpu.dot_dimension_numbers<[1], [0], [0], [1], [0, 0, 1, 1], [], []>} : vector<16x256xbf16>, vector<256x512xbf16>, vector<16x512xf32> -> vector<16x512xf32>
    %7 = arith.addf %3, %6 : vector<16x512xf32>
    %c0_6 = arith.constant 0 : index
    %c0_7 = arith.constant 0 : index
    %8 = vector.load %arg7[%c0_6, %c0_7] : memref<16x512xf32, #tpu.memory_space<vmem>>, vector<16x512xf32>
    tpu.vector_store %arg7[%c0_6, %c0_7], %7 {strides = array<i32>} : memref<16x512xf32, #tpu.memory_space<vmem>>, vector<16x512xf32>,
    %c0_i32_8 = arith.constant 0 : i32
    %9 = arith.cmpi eq, %arg2, %c0_i32_8 : i32
    %10 = arith.extui %9 : i1 to i32
    %c0_i32_9 = arith.constant 0 : i32
    %11 = arith.cmpi ne, %10, %c0_i32_9 : i32
    scf.if %11 {
      %c0_10 = arith.constant 0 : index
      %c0_11 = arith.constant 0 : index
      %12 = vector.load %arg7[%c0_10, %c0_11] : memref<16x512xf32, #tpu.memory_space<vmem>>, vector<16x512xf32>
      %c0_12 = arith.constant 0 : index
      %c0_13 = arith.constant 0 : index
      %13 = vector.load %arg5[%c0_12, %c0_13] : memref<1x512xf32, #tpu.memory_space<vmem>>, vector<1x512xf32>
      %14 = vector.broadcast %13 : vector<1x512xf32> to vector<16x512xf32>
      %15 = arith.addf %12, %14 : vector<16x512xf32>
      %cst_14 = arith.constant 5.000000e-01 : f32
      %16 = vector.broadcast %cst_14 : f32 to vector<16x512xf32>
      %17 = arith.mulf %16, %15 : vector<16x512xf32>
      %cst_15 = arith.constant 0.707106769 : f32
      %18 = vector.broadcast %cst_15 : f32 to vector<16x512xf32>
      %19 = arith.mulf %15, %18 : vector<16x512xf32>
      %20 = math.absf %19 : vector<16x512xf32>
      %cst_16 = arith.constant 0.327591091 : f32
      %21 = vector.broadcast %cst_16 : f32 to vector<16x512xf32>
      %22 = arith.mulf %21, %20 : vector<16x512xf32>
      %cst_17 = arith.constant 1.000000e+00 : f32
      %23 = vector.broadcast %cst_17 : f32 to vector<16x512xf32>
      %24 = arith.addf %23, %22 : vector<16x512xf32>
      %cst_18 = arith.constant 1.000000e+00 : f32
      %25 = vector.broadcast %cst_18 : f32 to vector<16x512xf32>
      %26 = arith.divf %25, %24 : vector<16x512xf32>
      %cst_19 = arith.constant 1.06140542 : f32
      %27 = vector.broadcast %cst_19 : f32 to vector<16x512xf32>
      %28 = arith.mulf %27, %26 : vector<16x512xf32>
      %cst_20 = arith.constant 1.45315206 : f32
      %29 = vector.broadcast %cst_20 : f32 to vector<16x512xf32>
      %30 = arith.subf %28, %29 : vector<16x512xf32>
      %31 = arith.mulf %30, %26 : vector<16x512xf32>
      %cst_21 = arith.constant 1.42141378 : f32
      %32 = vector.broadcast %cst_21 : f32 to vector<16x512xf32>
      %33 = arith.addf %31, %32 : vector<16x512xf32>
      %34 = arith.mulf %33, %26 : vector<16x512xf32>
      %cst_22 = arith.constant 0.284496725 : f32
      %35 = vector.broadcast %cst_22 : f32 to vector<16x512xf32>
      %36 = arith.subf %34, %35 : vector<16x512xf32>
      %37 = arith.mulf %36, %26 : vector<16x512xf32>
      %cst_23 = arith.constant 0.254829586 : f32
      %38 = vector.broadcast %cst_23 : f32 to vector<16x512xf32>
      %39 = arith.addf %37, %38 : vector<16x512xf32>
      %40 = arith.mulf %39, %26 : vector<16x512xf32>
      %cst_24 = arith.constant 0.000000e+00 : f32
      %41 = vector.broadcast %cst_24 : f32 to vector<16x512xf32>
      %42 = arith.subf %41, %20 : vector<16x512xf32>
      %43 = arith.mulf %42, %20 : vector<16x512xf32>
      %44 = math.exp %43 : vector<16x512xf32>
      %45 = arith.mulf %40, %44 : vector<16x512xf32>
      %cst_25 = arith.constant 1.000000e+00 : f32
      %46 = vector.broadcast %cst_25 : f32 to vector<16x512xf32>
      %47 = arith.subf %46, %45 : vector<16x512xf32>
      %cst_26 = arith.constant 0.000000e+00 : f32
      %48 = vector.broadcast %cst_26 : f32 to vector<16x512xf32>
      %49 = arith.cmpf oge, %19, %48 : vector<16x512xf32>
      %cst_27 = arith.constant 0.000000e+00 : f32
      %50 = vector.broadcast %cst_27 : f32 to vector<16x512xf32>
      %51 = arith.subf %50, %47 : vector<16x512xf32>
      %52 = arith.select %49, %47, %51 : vector<16x512xi1>, vector<16x512xf32>
      %cst_28 = arith.constant 1.000000e+00 : f32
      %53 = vector.broadcast %cst_28 : f32 to vector<16x512xf32>
      %54 = arith.addf %53, %52 : vector<16x512xf32>
      %55 = arith.mulf %17, %54 : vector<16x512xf32>
      %56 = arith.truncf %55 : vector<16x512xf32> to vector<16x512xbf16>
      %c0_29 = arith.constant 0 : index
      %c0_30 = arith.constant 0 : index
      %57 = vector.load %arg6[%c0_29, %c0_30] : memref<16x512xbf16, #tpu.memory_space<vmem>>, vector<16x512xbf16>
      tpu.vector_store %arg6[%c0_29, %c0_30], %56 {strides = array<i32>} : memref<16x512xbf16, #tpu.memory_space<vmem>>, vector<16x512xbf16>,
    } else {
    }
    return
  }
  func.func @transform_0(%arg0: i32, %arg1: i32, %arg2: i32) -> (i32, i32) {
    %c0_i32 = arith.constant 0 : i32
    return %arg0, %arg2 : i32, i32
  }
  func.func @transform_1(%arg0: i32, %arg1: i32, %arg2: i32) -> (i32, i32) {
    %c0_i32 = arith.constant 0 : i32
    return %arg2, %arg1 : i32, i32
  }
  func.func @transform_2(%arg0: i32, %arg1: i32, %arg2: i32) -> (i32, i32) {
    %c0_i32 = arith.constant 0 : i32
    %c0_i32_0 = arith.constant 0 : i32
    return %c0_i32, %arg1 : i32, i32
  }
  func.func @transform_3(%arg0: i32, %arg1: i32, %arg2: i32) -> (i32, i32) {
    %c0_i32 = arith.constant 0 : i32
    return %arg0, %arg1 : i32, i32
  }
}

module attributes {stable_mosaic.version = 11 : i64} {
  func.func @_matmul_add_ln_kernel(%arg0: i32, %arg1: i32, %arg2: memref<16x512xbf16, #tpu.memory_space<vmem>>, %arg3: memref<512x256xbf16, #tpu.memory_space<vmem>>, %arg4: memref<1x256xf32, #tpu.memory_space<vmem>>, %arg5: memref<16x256xbf16, #tpu.memory_space<vmem>>, %arg6: memref<1x256xf32, #tpu.memory_space<vmem>>, %arg7: memref<1x256xf32, #tpu.memory_space<vmem>>, %arg8: memref<16x256xbf16, #tpu.memory_space<vmem>>, %arg9: memref<16x256xf32, #tpu.memory_space<vmem>>) attributes {dimension_semantics = [#tpu.dimension_semantics<parallel>, #tpu.dimension_semantics<arbitrary>], iteration_bounds = array<i64: 1, 1>, scalar_prefetch = 0 : i64, scratch_operands = 1 : i64, tpu.core_type = #tpu.core_type<tc>, window_params = [{transform_indices = @transform_0, window_bounds = array<i64: 16, 512>}, {transform_indices = @transform_1, window_bounds = array<i64: 512, 256>}, {pipeline_mode = #tpu.pipeline_mode<synchronous>, transform_indices = @transform_2, window_bounds = array<i64: 1, 256>}, {transform_indices = @transform_3, window_bounds = array<i64: 16, 256>}, {pipeline_mode = #tpu.pipeline_mode<synchronous>, transform_indices = @transform_4, window_bounds = array<i64: 1, 256>}, {pipeline_mode = #tpu.pipeline_mode<synchronous>, transform_indices = @transform_5, window_bounds = array<i64: 1, 256>}, {transform_indices = @transform_6, window_bounds = array<i64: 16, 256>}]} {
    %c0_i32 = arith.constant 0 : i32
    %0 = arith.cmpi eq, %arg1, %c0_i32 : i32
    %1 = arith.extui %0 : i1 to i32
    %c0_i32_0 = arith.constant 0 : i32
    %2 = arith.cmpi ne, %1, %c0_i32_0 : i32
    scf.if %2 {
      %cst_10 = arith.constant 0.000000e+00 : f32
      %12 = vector.broadcast %cst_10 : f32 to vector<16x256xf32>
      %c0_11 = arith.constant 0 : index
      %c0_12 = arith.constant 0 : index
      %13 = vector.load %arg9[%c0_11, %c0_12] : memref<16x256xf32, #tpu.memory_space<vmem>>, vector<16x256xf32>
      tpu.vector_store %arg9[%c0_11, %c0_12], %12 {strides = array<i32>} : memref<16x256xf32, #tpu.memory_space<vmem>>, vector<16x256xf32>,
    } else {
    }
    %c0 = arith.constant 0 : index
    %c0_1 = arith.constant 0 : index
    %3 = vector.load %arg9[%c0, %c0_1] : memref<16x256xf32, #tpu.memory_space<vmem>>, vector<16x256xf32>
    %c0_2 = arith.constant 0 : index
    %c0_3 = arith.constant 0 : index
    %4 = vector.load %arg2[%c0_2, %c0_3] : memref<16x512xbf16, #tpu.memory_space<vmem>>, vector<16x512xbf16>
    %c0_4 = arith.constant 0 : index
    %c0_5 = arith.constant 0 : index
    %5 = vector.load %arg3[%c0_4, %c0_5] : memref<512x256xbf16, #tpu.memory_space<vmem>>, vector<512x256xbf16>
    %cst = arith.constant dense<0.000000e+00> : vector<16x256xf32>
    %6 = tpu.matmul %4, %5, %cst {dimension_numbers = #tpu.dot_dimension_numbers<[1], [0], [0], [1], [0, 0, 1, 1], [], []>} : vector<16x512xbf16>, vector<512x256xbf16>, vector<16x256xf32> -> vector<16x256xf32>
    %7 = arith.addf %3, %6 : vector<16x256xf32>
    %c0_6 = arith.constant 0 : index
    %c0_7 = arith.constant 0 : index
    %8 = vector.load %arg9[%c0_6, %c0_7] : memref<16x256xf32, #tpu.memory_space<vmem>>, vector<16x256xf32>
    tpu.vector_store %arg9[%c0_6, %c0_7], %7 {strides = array<i32>} : memref<16x256xf32, #tpu.memory_space<vmem>>, vector<16x256xf32>,
    %c0_i32_8 = arith.constant 0 : i32
    %9 = arith.cmpi eq, %arg1, %c0_i32_8 : i32
    %10 = arith.extui %9 : i1 to i32
    %c0_i32_9 = arith.constant 0 : i32
    %11 = arith.cmpi ne, %10, %c0_i32_9 : i32
    scf.if %11 {
      %c0_10 = arith.constant 0 : index
      %c0_11 = arith.constant 0 : index
      %12 = vector.load %arg9[%c0_10, %c0_11] : memref<16x256xf32, #tpu.memory_space<vmem>>, vector<16x256xf32>
      %c0_12 = arith.constant 0 : index
      %c0_13 = arith.constant 0 : index
      %13 = vector.load %arg4[%c0_12, %c0_13] : memref<1x256xf32, #tpu.memory_space<vmem>>, vector<1x256xf32>
      %14 = vector.broadcast %13 : vector<1x256xf32> to vector<16x256xf32>
      %15 = arith.addf %12, %14 : vector<16x256xf32>
      %c0_14 = arith.constant 0 : index
      %c0_15 = arith.constant 0 : index
      %16 = vector.load %arg5[%c0_14, %c0_15] : memref<16x256xbf16, #tpu.memory_space<vmem>>, vector<16x256xbf16>
      %17 = arith.extf %16 : vector<16x256xbf16> to vector<16x256xf32>
      %18 = arith.addf %15, %17 : vector<16x256xf32>
      %cst_16 = arith.constant dense<0.000000e+00> : vector<16xf32>
      %19 = vector.multi_reduction <add>, %18, %cst_16 [1] : vector<16x256xf32> to vector<16xf32>
      %20 = vector.shape_cast %19 : vector<16xf32> to vector<16x1xf32>
      %cst_17 = arith.constant 2.560000e+02 : f32
      %21 = vector.broadcast %cst_17 : f32 to vector<16x1xf32>
      %22 = arith.divf %20, %21 : vector<16x1xf32>
      %23 = vector.broadcast %22 : vector<16x1xf32> to vector<16x256xf32>
      %24 = arith.subf %18, %23 : vector<16x256xf32>
      %25 = arith.mulf %24, %24 : vector<16x256xf32>
      %cst_18 = arith.constant dense<0.000000e+00> : vector<16xf32>
      %26 = vector.multi_reduction <add>, %25, %cst_18 [1] : vector<16x256xf32> to vector<16xf32>
      %27 = vector.shape_cast %26 : vector<16xf32> to vector<16x1xf32>
      %cst_19 = arith.constant 2.560000e+02 : f32
      %28 = vector.broadcast %cst_19 : f32 to vector<16x1xf32>
      %29 = arith.divf %27, %28 : vector<16x1xf32>
      %30 = vector.broadcast %22 : vector<16x1xf32> to vector<16x256xf32>
      %31 = arith.subf %18, %30 : vector<16x256xf32>
      %cst_20 = arith.constant 9.99999996E-13 : f32
      %32 = vector.broadcast %cst_20 : f32 to vector<16x1xf32>
      %33 = arith.addf %29, %32 : vector<16x1xf32>
      %34 = math.rsqrt %33 : vector<16x1xf32>
      %35 = vector.broadcast %34 : vector<16x1xf32> to vector<16x256xf32>
      %36 = arith.mulf %31, %35 : vector<16x256xf32>
      %c0_21 = arith.constant 0 : index
      %c0_22 = arith.constant 0 : index
      %37 = vector.load %arg6[%c0_21, %c0_22] : memref<1x256xf32, #tpu.memory_space<vmem>>, vector<1x256xf32>
      %38 = vector.broadcast %37 : vector<1x256xf32> to vector<16x256xf32>
      %39 = arith.mulf %36, %38 : vector<16x256xf32>
      %c0_23 = arith.constant 0 : index
      %c0_24 = arith.constant 0 : index
      %40 = vector.load %arg7[%c0_23, %c0_24] : memref<1x256xf32, #tpu.memory_space<vmem>>, vector<1x256xf32>
      %41 = vector.broadcast %40 : vector<1x256xf32> to vector<16x256xf32>
      %42 = arith.addf %39, %41 : vector<16x256xf32>
      %43 = arith.truncf %42 : vector<16x256xf32> to vector<16x256xbf16>
      %c0_25 = arith.constant 0 : index
      %c0_26 = arith.constant 0 : index
      %44 = vector.load %arg8[%c0_25, %c0_26] : memref<16x256xbf16, #tpu.memory_space<vmem>>, vector<16x256xbf16>
      tpu.vector_store %arg8[%c0_25, %c0_26], %43 {strides = array<i32>} : memref<16x256xbf16, #tpu.memory_space<vmem>>, vector<16x256xbf16>,
    } else {
    }
    return
  }
  func.func @transform_0(%arg0: i32, %arg1: i32) -> (i32, i32) {
    %c0_i32 = arith.constant 0 : i32
    return %arg0, %arg1 : i32, i32
  }
  func.func @transform_1(%arg0: i32, %arg1: i32) -> (i32, i32) {
    %c0_i32 = arith.constant 0 : i32
    %c0_i32_0 = arith.constant 0 : i32
    return %arg1, %c0_i32 : i32, i32
  }
  func.func @transform_2(%arg0: i32, %arg1: i32) -> (i32, i32) {
    %c0_i32 = arith.constant 0 : i32
    %c0_i32_0 = arith.constant 0 : i32
    %c0_i32_1 = arith.constant 0 : i32
    return %c0_i32, %c0_i32_0 : i32, i32
  }
  func.func @transform_3(%arg0: i32, %arg1: i32) -> (i32, i32) {
    %c0_i32 = arith.constant 0 : i32
    %c0_i32_0 = arith.constant 0 : i32
    return %arg0, %c0_i32 : i32, i32
  }
  func.func @transform_4(%arg0: i32, %arg1: i32) -> (i32, i32) {
    %c0_i32 = arith.constant 0 : i32
    %c0_i32_0 = arith.constant 0 : i32
    %c0_i32_1 = arith.constant 0 : i32
    return %c0_i32, %c0_i32_0 : i32, i32
  }
  func.func @transform_5(%arg0: i32, %arg1: i32) -> (i32, i32) {
    %c0_i32 = arith.constant 0 : i32
    %c0_i32_0 = arith.constant 0 : i32
    %c0_i32_1 = arith.constant 0 : i32
    return %c0_i32, %c0_i32_0 : i32, i32
  }
  func.func @transform_6(%arg0: i32, %arg1: i32) -> (i32, i32) {
    %c0_i32 = arith.constant 0 : i32
    %c0_i32_0 = arith.constant 0 : i32
    return %arg0, %c0_i32 : i32, i32
  }
}

module attributes {stable_mosaic.version = 11 : i64} {
  func.func @_matmul_kernel(%arg0: i32, %arg1: i32, %arg2: i32, %arg3: memref<16x256xbf16, #tpu.memory_space<vmem>>, %arg4: memref<256x768xbf16, #tpu.memory_space<vmem>>, %arg5: memref<1x768xf32, #tpu.memory_space<vmem>>, %arg6: memref<16x768xbf16, #tpu.memory_space<vmem>>, %arg7: memref<16x768xf32, #tpu.memory_space<vmem>>) attributes {dimension_semantics = [#tpu.dimension_semantics<parallel>, #tpu.dimension_semantics<parallel>, #tpu.dimension_semantics<arbitrary>], iteration_bounds = array<i64: 1, 1, 1>, scalar_prefetch = 0 : i64, scratch_operands = 1 : i64, tpu.core_type = #tpu.core_type<tc>, window_params = [{transform_indices = @transform_0, window_bounds = array<i64: 16, 256>}, {transform_indices = @transform_1, window_bounds = array<i64: 256, 768>}, {transform_indices = @transform_2, window_bounds = array<i64: 1, 768>}, {transform_indices = @transform_3, window_bounds = array<i64: 16, 768>}]} {
    %c0_i32 = arith.constant 0 : i32
    %0 = arith.cmpi eq, %arg2, %c0_i32 : i32
    %1 = arith.extui %0 : i1 to i32
    %c0_i32_0 = arith.constant 0 : i32
    %2 = arith.cmpi ne, %1, %c0_i32_0 : i32
    scf.if %2 {
      %cst_10 = arith.constant 0.000000e+00 : f32
      %12 = vector.broadcast %cst_10 : f32 to vector<16x768xf32>
      %c0_11 = arith.constant 0 : index
      %c0_12 = arith.constant 0 : index
      %13 = vector.load %arg7[%c0_11, %c0_12] : memref<16x768xf32, #tpu.memory_space<vmem>>, vector<16x768xf32>
      tpu.vector_store %arg7[%c0_11, %c0_12], %12 {strides = array<i32>} : memref<16x768xf32, #tpu.memory_space<vmem>>, vector<16x768xf32>,
    } else {
    }
    %c0 = arith.constant 0 : index
    %c0_1 = arith.constant 0 : index
    %3 = vector.load %arg7[%c0, %c0_1] : memref<16x768xf32, #tpu.memory_space<vmem>>, vector<16x768xf32>
    %c0_2 = arith.constant 0 : index
    %c0_3 = arith.constant 0 : index
    %4 = vector.load %arg3[%c0_2, %c0_3] : memref<16x256xbf16, #tpu.memory_space<vmem>>, vector<16x256xbf16>
    %c0_4 = arith.constant 0 : index
    %c0_5 = arith.constant 0 : index
    %5 = vector.load %arg4[%c0_4, %c0_5] : memref<256x768xbf16, #tpu.memory_space<vmem>>, vector<256x768xbf16>
    %cst = arith.constant dense<0.000000e+00> : vector<16x768xf32>
    %6 = tpu.matmul %4, %5, %cst {dimension_numbers = #tpu.dot_dimension_numbers<[1], [0], [0], [1], [0, 0, 1, 1], [], []>} : vector<16x256xbf16>, vector<256x768xbf16>, vector<16x768xf32> -> vector<16x768xf32>
    %7 = arith.addf %3, %6 : vector<16x768xf32>
    %c0_6 = arith.constant 0 : index
    %c0_7 = arith.constant 0 : index
    %8 = vector.load %arg7[%c0_6, %c0_7] : memref<16x768xf32, #tpu.memory_space<vmem>>, vector<16x768xf32>
    tpu.vector_store %arg7[%c0_6, %c0_7], %7 {strides = array<i32>} : memref<16x768xf32, #tpu.memory_space<vmem>>, vector<16x768xf32>,
    %c0_i32_8 = arith.constant 0 : i32
    %9 = arith.cmpi eq, %arg2, %c0_i32_8 : i32
    %10 = arith.extui %9 : i1 to i32
    %c0_i32_9 = arith.constant 0 : i32
    %11 = arith.cmpi ne, %10, %c0_i32_9 : i32
    scf.if %11 {
      %c0_10 = arith.constant 0 : index
      %c0_11 = arith.constant 0 : index
      %12 = vector.load %arg7[%c0_10, %c0_11] : memref<16x768xf32, #tpu.memory_space<vmem>>, vector<16x768xf32>
      %c0_12 = arith.constant 0 : index
      %c0_13 = arith.constant 0 : index
      %13 = vector.load %arg5[%c0_12, %c0_13] : memref<1x768xf32, #tpu.memory_space<vmem>>, vector<1x768xf32>
      %14 = vector.broadcast %13 : vector<1x768xf32> to vector<16x768xf32>
      %15 = arith.addf %12, %14 : vector<16x768xf32>
      %16 = arith.truncf %15 : vector<16x768xf32> to vector<16x768xbf16>
      %c0_14 = arith.constant 0 : index
      %c0_15 = arith.constant 0 : index
      %17 = vector.load %arg6[%c0_14, %c0_15] : memref<16x768xbf16, #tpu.memory_space<vmem>>, vector<16x768xbf16>
      tpu.vector_store %arg6[%c0_14, %c0_15], %16 {strides = array<i32>} : memref<16x768xbf16, #tpu.memory_space<vmem>>, vector<16x768xbf16>,
    } else {
    }
    return
  }
  func.func @transform_0(%arg0: i32, %arg1: i32, %arg2: i32) -> (i32, i32) {
    %c0_i32 = arith.constant 0 : i32
    return %arg0, %arg2 : i32, i32
  }
  func.func @transform_1(%arg0: i32, %arg1: i32, %arg2: i32) -> (i32, i32) {
    %c0_i32 = arith.constant 0 : i32
    return %arg2, %arg1 : i32, i32
  }
  func.func @transform_2(%arg0: i32, %arg1: i32, %arg2: i32) -> (i32, i32) {
    %c0_i32 = arith.constant 0 : i32
    %c0_i32_0 = arith.constant 0 : i32
    return %c0_i32, %arg1 : i32, i32
  }
  func.func @transform_3(%arg0: i32, %arg1: i32, %arg2: i32) -> (i32, i32) {
    %c0_i32 = arith.constant 0 : i32
    return %arg0, %arg1 : i32, i32
  }
}

module attributes {stable_mosaic.version = 11 : i64} {
  func.func @_pooler_adapter_kernel(%arg0: memref<2x256xbf16, #tpu.memory_space<vmem>>, %arg1: memref<256x256xbf16, #tpu.memory_space<vmem>>, %arg2: memref<1x256xf32, #tpu.memory_space<vmem>>, %arg3: memref<256x512xbf16, #tpu.memory_space<vmem>>, %arg4: memref<1x512xf32, #tpu.memory_space<vmem>>, %arg5: memref<2x512xf32, #tpu.memory_space<vmem>>) attributes {dimension_semantics = [], scalar_prefetch = 0 : i64, scratch_operands = 0 : i64, tpu.core_type = #tpu.core_type<tc>} {
    %c0 = arith.constant 0 : index
    %c0_0 = arith.constant 0 : index
    %0 = vector.load %arg0[%c0, %c0_0] : memref<2x256xbf16, #tpu.memory_space<vmem>>, vector<2x256xbf16>
    %c0_1 = arith.constant 0 : index
    %c0_2 = arith.constant 0 : index
    %1 = vector.load %arg1[%c0_1, %c0_2] : memref<256x256xbf16, #tpu.memory_space<vmem>>, vector<256x256xbf16>
    %cst = arith.constant dense<0.000000e+00> : vector<2x256xf32>
    %2 = tpu.matmul %0, %1, %cst {dimension_numbers = #tpu.dot_dimension_numbers<[1], [0], [0], [1], [0, 0, 1, 1], [], []>} : vector<2x256xbf16>, vector<256x256xbf16>, vector<2x256xf32> -> vector<2x256xf32>
    %c0_3 = arith.constant 0 : index
    %c0_4 = arith.constant 0 : index
    %3 = vector.load %arg2[%c0_3, %c0_4] : memref<1x256xf32, #tpu.memory_space<vmem>>, vector<1x256xf32>
    %4 = vector.broadcast %3 : vector<1x256xf32> to vector<2x256xf32>
    %5 = arith.addf %2, %4 : vector<2x256xf32>
    %6 = math.tanh %5 : vector<2x256xf32>
    %7 = arith.truncf %6 : vector<2x256xf32> to vector<2x256xbf16>
    %c0_5 = arith.constant 0 : index
    %c0_6 = arith.constant 0 : index
    %8 = vector.load %arg3[%c0_5, %c0_6] : memref<256x512xbf16, #tpu.memory_space<vmem>>, vector<256x512xbf16>
    %cst_7 = arith.constant dense<0.000000e+00> : vector<2x512xf32>
    %9 = tpu.matmul %7, %8, %cst_7 {dimension_numbers = #tpu.dot_dimension_numbers<[1], [0], [0], [1], [0, 0, 1, 1], [], []>} : vector<2x256xbf16>, vector<256x512xbf16>, vector<2x512xf32> -> vector<2x512xf32>
    %c0_8 = arith.constant 0 : index
    %c0_9 = arith.constant 0 : index
    %10 = vector.load %arg4[%c0_8, %c0_9] : memref<1x512xf32, #tpu.memory_space<vmem>>, vector<1x512xf32>
    %11 = vector.broadcast %10 : vector<1x512xf32> to vector<2x512xf32>
    %12 = arith.addf %9, %11 : vector<2x512xf32>
    %c0_10 = arith.constant 0 : index
    %c0_11 = arith.constant 0 : index
    %13 = vector.load %arg5[%c0_10, %c0_11] : memref<2x512xf32, #tpu.memory_space<vmem>>, vector<2x512xf32>
    tpu.vector_store %arg5[%c0_10, %c0_11], %12 {strides = array<i32>} : memref<2x512xf32, #tpu.memory_space<vmem>>, vector<2x512xf32>,
    return
  }
}

</mosaic_0001>

<bundles_post_ra>
// kernel: instruction_bert_encoder_forward.12
= control target key start
LH: loop header
LB: loop body
LE: loop exit
PB: predicated region body
PF: predicated region fallthrough
CT: control target
= control target key end

     0   :  { %s559_s18 = smov 0   ;;  %s561_s19 = smov 0   ;;  %s611_s0 = inlined_call_operand.vmem [shape: f32[2,8,256], index: 0, kind: input, shape index: {}]   ;;  %s612_s1 = inlined_call_operand.vmem [shape: f32[8,256], index: 1, kind: input, shape index: {}]   ;;  %s613_s2 = inlined_call_operand.vmem [shape: f32[1,256], index: 2, kind: input, shape index: {}]   ;;  %s614_s3 = inlined_call_operand.vmem [shape: f32[1,256], index: 3, kind: input, shape index: {}]   ;;  %s615_s4 = inlined_call_operand.vmem [shape: f32[1,256], index: 4, kind: input, shape index: {}]   ;;  %s616_s5 = inlined_call_operand.vmem [shape: bf16[2,8,256], index: 5, kind: output, shape index: {}]  }
   0x1   :  { %s563_s20 = smov 0  }
   0x2 LB: > { %s27_s21 = sadd.s32 1, %s523_s19  ;;  %p468_p0 = scmp.ge.s32.totalorder %s527_s20, 1  ;;  %s527_s20 = sphi %s563_s20, %s15_s20   ;;  %s523_s19 = sphi %s561_s19, %s618_s19   ;;  %s519_s18 = sphi %s559_s18, %s617_s18  }
   0x3   : > { %p29_p1 = scmp.ge.s32.totalorder %s27_s21, 2  ;;  %p217_p2 = scmp.lt.s32.totalorder %s527_s20, 3 }
   0x5   : > { %s620_s21 = smov (%p29_p1, %s27_s21), 0  ;;  %p218_p3 = pnand %p468_p0, %p217_p2 }
   0x6   : > { %p258_p4 = scmp.lt.s32.totalorder (!%p218_p3), %s519_s18, 1  ;;  %v289_v0 = vlaneseq (!%p218_p3)  ;;  %v287_v2 = vld [vmem:[%s613_s2] sm:$0x3] (!%p218_p3)  ;;  %v284_v4 = vld [vmem:[%s612_s1 + $0x8] sm:$0xff] (!%p218_p3) }
   0x7   : > { %221 = sbr.rel (%p218_p3) target bundleno = 340 (0x154), region = 40  ;;  %v283_v3 = vld [vmem:[%s612_s1] sm:$0xff] (!%p218_p3) }
   0x8   : > { %v290_v1 = vshrl.u32 (!%p218_p3), %v289_v0, 7  ;;  %v318_v26 = vld [vmem:[%s614_s3] sm:$0x3] (!%p218_p3) }
   0x9   : > { %v332_v27 = vld [vmem:[%s615_s4] sm:$0x3] (!%p218_p3) }
   0xa   : > { %v291_v5 = vsub.s32 (!%p218_p3), 0, %v290_v1  ;;  %v295_v6 = vsub.s32 (!%p218_p3), 1, %v290_v1 }
   0xc   : > { %v292_v9 = vrot.slane (!%p218_p3), %v287_v2, %v291_v5  ;;  %v296_v10 = vrot.slane (!%p218_p3), %v287_v2, %v295_v6  ;;  %v323_v28 = vrot.slane (!%p218_p3), %v318_v26, %v291_v5  ;;  %v327_v29 = vrot.slane (!%p218_p3), %v318_v26, %v295_v6 }
   0xd   : > { %v337_v31 = vrot.slane (!%p218_p3), %v332_v27, %v291_v5  ;;  %v341_v32 = vrot.slane (!%p218_p3), %v332_v27, %v295_v6 }
   0xe   : > { %s622_s18 = smov (!%p258_p4, %s519_s18), 1 }
   0xf   : > { %s476_s24 = sshll.u32 %s622_s18, 4  ;;  %s477_s11 = sshll.u32 %s622_s18, 3 }
  0x10   : > { %s266_s6 = scalar_lea.vmem %s611_s0, %s476_s24  ;;  %s280_s14 = scalar_lea.vmem %s616_s5, %s477_s11 }
  0x11   : > { %v281_v7 = vld [vmem:[%s266_s6] sm:$0xff]  ;;  %v282_v8 = vld [vmem:[%s266_s6 + $0x8] sm:$0xff] }
  0x12   : > { %v285_v11 = vadd.f32 %v283_v3, %v281_v7  ;;  %v286_v12 = vadd.f32 %v284_v4, %v282_v8 }
  0x14   : > { %v299_v13 = vadd.f32 %v292_v9, %v285_v11  ;;  %v300_v14 = vadd.f32 %v296_v10, %v286_v12 }
  0x16   : > { %v301_v15 = vadd.f32 %v300_v14, %v299_v13 }
  0x18   : > { %302 = vadd.xlane.f32.xlu0 %v301_v15 }
  0xa5   : > { %v303_v16 = vpop.xlane.xlu0 %302 }
  0xa6   : > { %v305_v17 = vmul.f32 0.00390625, %v303_v16 }
  0xa8   : > { %v306_v18 = vsub.f32 %v299_v13, %v305_v17  ;;  %v307_v19 = vsub.f32 %v300_v14, %v305_v17 }
  0xaa   : > { %v308_v20 = vmul.f32 %v306_v18, %v306_v18  ;;  %v309_v21 = vmul.f32 %v307_v19, %v307_v19 }
  0xac   : > { %v310_v22 = vadd.f32 %v309_v21, %v308_v20 }
  0xae   : > { %311 = vadd.xlane.f32.xlu0 %v310_v22 }
 0x13b   : > { %v312_v23 = vpop.xlane.xlu0 %311 }
 0x13c   : > { %v313_v24 = vmul.f32 0.00390625, %v312_v23 }
 0x13e   : > { %v314_v25 = vadd.f32 1e-12, %v313_v24 }
 0x140   : > { %503 = vrsqrt.f32 %v314_v25 }
 0x14a   : > { %v504_v30 = vpop.eup %503 }
 0x14b   : > { %v316_v33 = vmul.f32 %v504_v30, %v306_v18  ;;  %v317_v34 = vmul.f32 %v504_v30, %v307_v19 }
 0x14d   : > { %v330_v35 = vmul.f32 %v323_v28, %v316_v33  ;;  %v331_v36 = vmul.f32 %v327_v29, %v317_v34 }
 0x14f   : > { %v344_v37 = vadd.f32 %v337_v31, %v330_v35  ;;  %v345_v38 = vadd.f32 %v341_v32, %v331_v36 }
 0x151   : > { %v478_v39 = vpack.c.bf16 %v345_v38, %v344_v37 }
 0x153   : > { %354 = vst [vmem:[%s280_s14] sm:$0xff] %v478_v39 }
 0x154 PF: > { %s15_s20 = sadd.s32 1, %s527_s20   ;;  %s617_s18 = smov %s523_s19 }
 0x155   : > { %p12_p5 = scmp.ge.s32.totalorder %s15_s20, 4   ;;  %s618_s19 = smov %s620_s21 }
 0x157   :  { %14 = sbr.rel (!%p12_p5) target bundleno = 2 (0x2), region = 73 }

// kernel: instruction_bert_encoder_forward.14
= control target key start
LH: loop header
LB: loop body
LE: loop exit
PB: predicated region body
PF: predicated region fallthrough
CT: control target
= control target key end

     0   :  { %s881_s15 = smov 0   ;;  %s883_s16 = smov 0   ;;  %s966_s0 = inlined_call_operand.vmem [shape: bf16[2,8,768], index: 0, kind: input, shape index: {}, may-alias: {0,1,2}]   ;;  %s967_s1 = inlined_call_operand.vmem [shape: bf16[2,8,768], index: 1, kind: input, shape index: {}, may-alias: {0,1,2}]   ;;  %s968_s2 = inlined_call_operand.vmem [shape: bf16[2,8,768], index: 2, kind: input, shape index: {}, may-alias: {0,1,2}]   ;;  %s969_s3 = inlined_call_operand.vmem [shape: f32[2,1,8], index: 3, kind: input, shape index: {}]   ;;  %s970_s4 = inlined_call_operand.vmem [shape: bf16[2,8,256], index: 4, kind: output, shape index: {}]  }
   0x1   :  { %s885_s17 = smov 0   ;;  %s887_s18 = smov 0  }
   0x2   :  { %s889_s19 = smov 0  }
   0x3 LB: > { %s36_s20 = sadd.s32 1, %s842_s17  ;;  %s40_s21 = sadd.s32 1, %s846_s18  ;;  %s850_s19 = sphi %s889_s19, %s14_s19   ;;  %s846_s18 = sphi %s887_s18, %s974_s18   ;;  %s842_s17 = sphi %s885_s17, %s973_s17   ;;  %s838_s16 = sphi %s883_s16, %s972_s16   ;;  %s834_s15 = sphi %s881_s15, %s971_s15  }
   0x4   : > { %p38_p0 = scmp.ge.s32.totalorder %s36_s20, 2  ;;  %p733_p1 = scmp.ge.s32.totalorder %s850_s19, 1 }
   0x5   : > { %p266_p2 = scmp.lt.s32.totalorder %s850_s19, 5 }
   0x6   : > { %s976_s20 = smov (%p38_p0, %s36_s20), 0  ;;  %s978_s21 = smov (!%p38_p0, %s40_s21), %s846_s18 }
   0x7   : > { %p267_p3 = pnand %p733_p1, %p266_p2  ;;  %p42_p4 = scmp.ge.s32.totalorder %s978_s21, 2 }
   0x8   : > { %p338_p5 = scmp.lt.s32.totalorder (!%p267_p3), %s838_s16, 1  ;;  %s350_s22 = sadd.s32 (!%p267_p3), 2, %s834_s15  ;;  %v852_v0 = vmov (!%p267_p3), 0.0   ;;  %vm853_vm0 = vmmov (!%p267_p3), 0   ;;  %vm401_vm1 = vcmask (!%p267_p3), 7168   ;;  %vm459_vm2 = vcmask (!%p267_p3), 64512  }
   0x9   : > { %s980_s21 = smov (%p42_p4, %s978_s21), 0  ;;  %270 = sbr.rel (%p267_p3) target bundleno = 829 (0x33d), region = 36 }
   0xa   : > { %747 = vmatprep.subr.bf16.mxu0 (!%p267_p3), %v852_v0  ;;  %p355_p6 = scmp.lt.s32.totalorder (!%p267_p3), %s350_s22, 5  ;;  %749 = vmatprep.mubr.msk.bf16.mxu0 (!%p267_p3), %vm853_vm0, %v852_v0  ;;  %p342_p7 = scmp.lt.s32.totalorder (!%p267_p3), %s834_s15, 5  ;;  %v854_v6 = vmov (!%p267_p3), -1e+30   ;;  %403 = vst.msk [vmem:[#allocation3] sm:$0xff] (!%p267_p3), %vm401_vm1, %v852_v0  ;;  %v855_v14 = vmov (!%p267_p3), 0  }
   0xb   : > { %753 = vmatprep.subr.bf16.mxu1 (!%p267_p3), %v852_v0  ;;  %755 = vmatprep.mubr.msk.bf16.mxu1 (!%p267_p3), %vm853_vm0, %v852_v0  ;;  %402 = vst.msk [vmem:[#allocation2] sm:$0xff] (!%p267_p3), %vm401_vm1, %v854_v6  ;;  %s364_s12 = sadd.s32 (!%p267_p3), 4, %s834_s15  ;;  %vm494_vm3 = vcmask (!%p267_p3), 1043456   ;;  %p388_p9 = scmp.lt.s32.totalorder (!%p267_p3), %s834_s15, 1 }
   0xc   : > { %804 = vset.pattern.permute.xlu0 (!%p267_p3), %v855_v14  ;;  %805 = vset.pattern.permute.xlu1 (!%p267_p3), %v855_v14  ;;  %p369_p8 = scmp.lt.s32.totalorder (!%p267_p3), %s364_s12, 5 }
  0x10   : > { %s982_s16 = smov (!%p338_p5, %s838_s16), 1  ;;  %s984_s22 = smov (!%p355_p6, %s350_s22), 5 }
  0x11   : > { %s918_s23 = smul.u32 6, %s982_s16  ;;  %s383_s11 = scalar_lea.vmem %s969_s3, %s982_s16  ;;  %v475_v29 = vld [vmem:[#allocation3] sm:$0xff] }
  0x12   : > { %s343_s24 = scalar_select %p342_p7, %s834_s15, 5  ;;  %v739_v7 = vld [vmem:[%s383_s11] ss:$0 sm:$0xff] }
  0x13   : > { %s360_s25 = sadd.s32 %s918_s23, %s984_s22  ;;  %v458_v15 = vld [vmem:[#allocation2] sm:$0xff]  ;;  %s986_s12 = smov (!%p369_p8, %s364_s12), 5 }
  0x14   : > { %s735_s26 = sshll.u32 %s360_s25, 2  ;;  %s347_s27 = sadd.s32 %s918_s23, %s343_s24 }
  0x15   : > { %s362_s30 = scalar_lea.vmem %s967_s1, %s735_s26  ;;  %s734_s5 = sshll.u32 %s347_s27, 2 }
  0x16   : > { %v407_v1 = vld [vmem:[%s362_s30] sm:$0xf]  ;;  %s349_s8 = scalar_lea.vmem %s966_s0, %s734_s5  ;;  %s374_s13 = sadd.s32 %s918_s23, %s986_s12 }
  0x17   : > { %748 = vmatpush3.bf16.xpose.msra.mxu0 %v407_v1  ;;  %v406_v2 = vld [vmem:[%s349_s8] sm:$0xf]  ;;  %s736_s14 = sshll.u32 %s374_s13, 2  ;;  %s988_s15 = smov (!%p388_p9, %s834_s15), 1 }
  0x18   : > { %v409_v3 = vunpack.c.l.bf16 %v406_v2  ;;  %s376_s25 = scalar_lea.vmem %s968_s2, %s736_s14  ;;  %s737_s23 = sshll.u32 %s982_s16, 1 }
  0x19   : > { %v408_v19 = vld [vmem:[%s376_s25] sm:$0xf]  ;;  %s393_s26 = sadd.s32 %s737_s23, %s988_s15 }
  0x1a   : > { %v410_v4 = vmul.f32 0.088388346, %v409_v3  ;;  %v496_v20 = vsel %vm494_vm3, %v408_v19, 0  ;;  %s738_s27 = sshll.u32 %s393_s26, 2 }
  0x1b   : > { %754 = vmatpush3.bf16.msra.mxu1 %v496_v20  ;;  %s395_s30 = scalar_lea.vmem %s970_s4, %s738_s27 }
  0x1c   : > { %v411_v5 = vpack.c.bf16 %v410_v4, %v410_v4 }
  0x1e   : > { %750 = vmatmul.mubr.bf16.vlgmr.msra.gmra.mrb[0].mxu0 %v411_v5 }
  0xf1   : > { %v452_v8 = vpop.f32.mrb[0].mxu0 }
  0xf2   : > { %v453_v9 = vadd.f32 %v739_v7, %v452_v8  ;;  %v751_v10 = vpop.f32.mrb[1].mxu0 }
  0xf3   : > { %v455_v11 = vpop.f32.mrb[2].mxu0 }
  0xf4   : > { %v752_v12 = vpop.f32.mrb[3].mxu0  ;;  %v460_v13 = vsel %vm459_vm2, %v453_v9, -inf }
  0xf5   : > { %461 = vmax.xlane.f32.xlu0 %v460_v13 }
 0x182   : > { %v462_v16 = vpop.xlane.xlu0 %461 }
 0x183   : > { %v463_v17 = vmax.f32 %v458_v15, %v462_v16 }
 0x185   : > { %v464_v18 = vsub.f32 %v458_v15, %v463_v17  ;;  %540 = vst.msk [vmem:[#allocation2] sm:$0xff] %vm401_vm1, %v463_v17  ;;  %469 = vperm.xlu0 %804, %v463_v17  }
 0x187   : > { %v465_v27 = vmul.f32 1.442695, %v464_v18 }
 0x204   : > { %v470_v21 = vpop.permute.xlu0 %469 }
 0x205   : > { %v472_v22 = vsub.f32 %v453_v9, %v470_v21 }
 0x207   : > { %v473_v23 = vmul.f32 1.442695, %v472_v22 }
 0x209   : > { %806 = vpow2.f32 %v473_v23 }
 0x20a   : > { %808 = vpow2.f32 %v465_v27 }
 0x213   : > { %v807_v24 = vpop.eup %806 }
 0x214   : > { %v477_v25 = vsel %vm459_vm2, %v807_v24, 0.0  ;;  %v490_v26 = vpack.c.bf16 %v807_v24, %v807_v24  ;;  %v809_v28 = vpop.eup %808 }
 0x215   : > { %478 = vadd.xlane.f32.xlu1 %v477_v25  ;;  %v476_v30 = vmul.f32 %v809_v28, %v475_v29 }
 0x216   : > { %756 = vmatmul.mubr.msk.bf16.vlgmr.msra.gmra.mrb[0].mxu1 %vm459_vm2, %v490_v26 }
 0x226   : > { %486 = vperm.xlu1 %805, %v809_v28  }
 0x2a2   : > { %v479_v31 = vpop.xlane.xlu1 %478 }
 0x2a3   : > { %v480_v32 = vadd.f32 %v479_v31, %v476_v30 }
 0x2a5   : > { %482 = vst.msk [vmem:[#allocation3] sm:$0xff] %vm401_vm1, %v480_v32 }
 0x2a6   : > { %v487_v39 = vpop.permute.xlu1 %486 }
 0x2a7   : > { %v489_v40 = vmul.f32 0.0, %v487_v39 }
 0x2ac   : > { %v545_v33 = vld [vmem:[#allocation3] sm:$0xff] }
 0x2ad   : > { %810 = vrcp.f32 %v545_v33 }
 0x2b7   : > { %v811_v34 = vpop.eup %810 }
 0x2b8   : > { %549 = vperm.xlu1 %805, %v811_v34  }
 0x2e9   : > { %v532_v35 = vpop.f32.mrb[0].mxu1 }
 0x2ea   : > { %v757_v36 = vpop.f32.mrb[1].mxu1  ;;  %v538_v41 = vadd.f32 %v532_v35, %v489_v40 }
 0x2eb   : > { %v535_v37 = vpop.f32.mrb[2].mxu1 }
 0x2ec   : > { %v758_v38 = vpop.f32.mrb[3].mxu1 }
 0x337   : > { %v550_v42 = vpop.permute.xlu1 %549 }
 0x338   : > { %v552_v43 = vmul.f32 %v550_v42, %v538_v41 }
 0x33a   : > { %v553_v44 = vpack.c.bf16 %v552_v43, %v552_v43 }
 0x33c   : > { %554 = vst [vmem:[%s395_s30] sm:$0xf] %v553_v44 }
 0x33d PF: > { %s14_s19 = sadd.s32 1, %s850_s19   ;;  %s971_s15 = smov %s842_s17 }
 0x33e   : > { %p11_p10 = scmp.ge.s32.totalorder %s14_s19, 6   ;;  %s972_s16 = smov %s846_s18 }
 0x33f   : > { %s973_s17 = smov %s976_s20  ;;  %s974_s18 = smov %s980_s21 }
 0x340   :  { %13 = sbr.rel (!%p11_p10) target bundleno = 3 (0x3), region = 83 }

// kernel: instruction_bert_encoder_forward.15
= control target key start
LH: loop header
LB: loop body
LE: loop exit
PB: predicated region body
PF: predicated region fallthrough
CT: control target
= control target key end

     0   :  { %v299_v34 = vlaneseq  ;;  %s657_s1 = inlined_call_operand.vmem [shape: bf16[256,256], index: 1, kind: input, shape index: {}]   ;;  %s658_s0 = inlined_call_operand.vmem [shape: bf16[16,256], index: 0, kind: input, shape index: {}]   ;;  %s659_s2 = inlined_call_operand.vmem [shape: f32[1,256], index: 2, kind: input, shape index: {}]   ;;  %s660_s3 = inlined_call_operand.vmem [shape: bf16[16,256], index: 3, kind: input, shape index: {}]   ;;  %s661_s4 = inlined_call_operand.vmem [shape: f32[1,256], index: 4, kind: input, shape index: {}]   ;;  %s662_s5 = inlined_call_operand.vmem [shape: f32[1,256], index: 5, kind: input, shape index: {}]   ;;  %s663_s6 = inlined_call_operand.vmem [shape: bf16[16,256], index: 6, kind: output, shape index: {}]  }
   0x1   :  { %v444_v0 = vld [vmem:[%s657_s1 + $0x4] ss:$8 sps:$4 sm:$0xff]   ;;  %v446_v1 = vld [vmem:[%s657_s1] ss:$8 sps:$4 sm:$0xff]   ;;  %v447_v2 = vld [vmem:[%s657_s1 + $0x14] ss:$8 sps:$4 sm:$0xff]  }
   0x2   :  { %239 = vmatprep.subr.bf16.mxu0 %v444_v0  ;;  %v449_v3 = vld [vmem:[%s657_s1 + $0x10] ss:$8 sps:$4 sm:$0xff]   ;;  %v450_v4 = vld [vmem:[%s657_s1 + $0x24] ss:$8 sps:$4 sm:$0xff]   ;;  %v452_v5 = vld [vmem:[%s657_s1 + $0x20] ss:$8 sps:$4 sm:$0xff]  }
   0x3   :  { %240 = vmatpush1.bf16.msra.mxu0 %v446_v1  ;;  %v453_v6 = vld [vmem:[%s657_s1 + $0x34] ss:$8 sps:$4 sm:$0xff]   ;;  %v455_v7 = vld [vmem:[%s657_s1 + $0x30] ss:$8 sps:$4 sm:$0xff]   ;;  %v456_v8 = vld [vmem:[%s657_s1 + $0x44] ss:$8 sps:$4 sm:$0xff]  }
   0x4   :  { %241 = vmatprep.subr.bf16.mxu0 %v447_v2  ;;  %v458_v9 = vld [vmem:[%s657_s1 + $0x40] ss:$8 sps:$4 sm:$0xff]   ;;  %v459_v10 = vld [vmem:[%s657_s1 + $0x54] ss:$8 sps:$4 sm:$0xff]   ;;  %v461_v11 = vld [vmem:[%s657_s1 + $0x50] ss:$8 sps:$4 sm:$0xff]  }
   0x5   :  { %v462_v12 = vld [vmem:[%s657_s1 + $0x64] ss:$8 sps:$4 sm:$0xff]   ;;  %v464_v14 = vld [vmem:[%s657_s1 + $0x60] ss:$8 sps:$4 sm:$0xff]   ;;  %v465_v15 = vld [vmem:[%s657_s1 + $0x74] ss:$8 sps:$4 sm:$0xff]  }
   0x6   :  { %v494_v13 = vld [vmem:[%s658_s0 + $0x4] ss:$8 sps:$4 sm:$0xff]   ;;  %v467_v16 = vld [vmem:[%s657_s1 + $0x70] ss:$8 sps:$4 sm:$0xff]   ;;  %v470_v18 = vld [vmem:[%s657_s1 + $0x80] ss:$8 sps:$4 sm:$0xff]  }
   0x7   :  { %242 = vmatpush1.bf16.msra.mxu0 %v449_v3  ;;  %271 = vmatprep.mubr.bf16.mxu0 %v494_v13  ;;  %v468_v17 = vld [vmem:[%s657_s1 + $0x84] ss:$8 sps:$4 sm:$0xff]   ;;  %v471_v19 = vld [vmem:[%s657_s1 + $0x94] ss:$8 sps:$4 sm:$0xff]   ;;  %v473_v20 = vld [vmem:[%s657_s1 + $0x90] ss:$8 sps:$4 sm:$0xff]  }
   0x8   :  { %243 = vmatprep.subr.bf16.mxu0 %v450_v4  ;;  %v474_v21 = vld [vmem:[%s657_s1 + $0xa4] ss:$8 sps:$4 sm:$0xff]   ;;  %v476_v22 = vld [vmem:[%s657_s1 + $0xa0] ss:$8 sps:$4 sm:$0xff]   ;;  %v477_v23 = vld [vmem:[%s657_s1 + $0xb4] ss:$8 sps:$4 sm:$0xff]  }
   0x9   :  { %v479_v24 = vld [vmem:[%s657_s1 + $0xb0] ss:$8 sps:$4 sm:$0xff]   ;;  %v480_v25 = vld [vmem:[%s657_s1 + $0xc4] ss:$8 sps:$4 sm:$0xff]   ;;  %v482_v26 = vld [vmem:[%s657_s1 + $0xc0] ss:$8 sps:$4 sm:$0xff]  }
   0xa   :  { %v483_v27 = vld [vmem:[%s657_s1 + $0xd4] ss:$8 sps:$4 sm:$0xff]   ;;  %v485_v28 = vld [vmem:[%s657_s1 + $0xd0] ss:$8 sps:$4 sm:$0xff]   ;;  %v486_v29 = vld [vmem:[%s657_s1 + $0xe4] ss:$8 sps:$4 sm:$0xff]  }
   0xb   :  { %244 = vmatpush1.bf16.msra.mxu0 %v452_v5  ;;  %v488_v30 = vld [vmem:[%s657_s1 + $0xe0] ss:$8 sps:$4 sm:$0xff]   ;;  %v489_v31 = vld [vmem:[%s657_s1 + $0xf4] ss:$8 sps:$4 sm:$0xff]   ;;  %v491_v32 = vld [vmem:[%s657_s1 + $0xf0] ss:$8 sps:$4 sm:$0xff]  }
   0xc   :  { %245 = vmatprep.subr.bf16.mxu0 %v453_v6  ;;  %v492_v33 = vld [vmem:[%s658_s0] ss:$8 sps:$4 sm:$0xff]   ;;  %v300_v35 = vshrl.u32 %v299_v34, 7 }
   0xd   :  { %v297_v37 = vld [vmem:[%s659_s2] sm:$0x3]  ;;  %v314_v42 = vld [vmem:[%s660_s3 + $0x8] sm:$0xff] }
   0xe   :  { %v301_v36 = vsub.s32 0, %v300_v35  ;;  %v305_v38 = vsub.s32 1, %v300_v35  ;;  %v313_v39 = vld [vmem:[%s660_s3] sm:$0xff]  ;;  %v317_v50 = vunpack.c.l.bf16 %v314_v42  ;;  %v318_v51 = vunpack.c.h.bf16 %v314_v42 }
   0xf   :  { %246 = vmatpush1.bf16.msra.mxu0 %v455_v7  ;;  %v315_v43 = vunpack.c.l.bf16 %v313_v39  ;;  %v316_v45 = vunpack.c.h.bf16 %v313_v39 }
  0x10   :  { %247 = vmatprep.subr.bf16.mxu0 %v456_v8  ;;  %v302_v40 = vrot.slane %v297_v37, %v301_v36  ;;  %v306_v41 = vrot.slane %v297_v37, %v305_v38 }
  0x13   :  { %248 = vmatpush1.bf16.msra.mxu0 %v458_v9 }
  0x14   :  { %249 = vmatprep.subr.bf16.mxu0 %v459_v10 }
  0x17   :  { %250 = vmatpush1.bf16.msra.mxu0 %v461_v11 }
  0x18   :  { %251 = vmatprep.subr.bf16.mxu0 %v462_v12 }
  0x1b   :  { %252 = vmatpush1.bf16.msra.mxu0 %v464_v14 }
  0x1c   :  { %253 = vmatprep.subr.bf16.mxu0 %v465_v15 }
  0x1f   :  { %254 = vmatpush1.bf16.msra.mxu0 %v467_v16 }
  0x20   :  { %255 = vmatprep.subr.bf16.mxu0 %v468_v17  ;;  %v356_v17 = vld [vmem:[%s661_s4] sm:$0x3] }
  0x23   :  { %256 = vmatpush1.bf16.msra.mxu0 %v470_v18  ;;  %v372_v18 = vld [vmem:[%s662_s5] sm:$0x3] }
  0x24   :  { %257 = vmatprep.subr.bf16.mxu0 %v471_v19  ;;  %v361_v19 = vrot.slane %v356_v17, %v301_v36 }
  0x27   :  { %258 = vmatpush1.bf16.msra.mxu0 %v473_v20  ;;  %v365_v20 = vrot.slane %v356_v17, %v305_v38 }
  0x28   :  { %259 = vmatprep.subr.bf16.mxu0 %v474_v21 }
  0x2b   :  { %260 = vmatpush1.bf16.msra.mxu0 %v476_v22  ;;  %v377_v22 = vrot.slane %v372_v18, %v301_v36 }
  0x2c   :  { %261 = vmatprep.subr.bf16.mxu0 %v477_v23  ;;  %v381_v23 = vrot.slane %v372_v18, %v305_v38 }
  0x2f   :  { %262 = vmatpush1.bf16.msra.mxu0 %v479_v24 }
  0x30   :  { %263 = vmatprep.subr.bf16.mxu0 %v480_v25 }
  0x33   :  { %264 = vmatpush1.bf16.msra.mxu0 %v482_v26 }
  0x34   :  { %265 = vmatprep.subr.bf16.mxu0 %v483_v27 }
  0x37   :  { %266 = vmatpush1.bf16.msra.mxu0 %v485_v28 }
  0x38   :  { %267 = vmatprep.subr.bf16.mxu0 %v486_v29 }
  0x3b   :  { %268 = vmatpush1.bf16.msra.mxu0 %v488_v30 }
  0x3c   :  { %269 = vmatprep.subr.bf16.mxu0 %v489_v31 }
  0x3f   :  { %270 = vmatpush1.bf16.msra.mxu0 %v491_v32 }
  0x42   :  { %272 = vmatmul.mubr.bf16.vlgmr.msra.gmra.mrb[0].mxu0 %v492_v33 }
 0x115   :  { %v273_v44 = vpop.f32.mrb[0].mxu0 }
 0x116   :  { %v309_v46 = vadd.f32 %v302_v40, %v273_v44  ;;  %v275_v47 = vpop.f32.mrb[1].mxu0 }
 0x117   :  { %v310_v48 = vadd.f32 %v306_v41, %v275_v47  ;;  %v277_v49 = vpop.f32.mrb[2].mxu0 }
 0x118   :  { %v311_v52 = vadd.f32 %v302_v40, %v277_v49  ;;  %v279_v53 = vpop.f32.mrb[3].mxu0  ;;  %v319_v54 = vadd.f32 %v315_v43, %v309_v46 }
 0x119   :  { %v312_v55 = vadd.f32 %v306_v41, %v279_v53  ;;  %v320_v56 = vadd.f32 %v316_v45, %v310_v48 }
 0x11a   :  { %v321_v57 = vadd.f32 %v317_v50, %v311_v52 }
 0x11b   :  { %v322_v58 = vadd.f32 %v318_v51, %v312_v55  ;;  %v323_v59 = vadd.f32 %v320_v56, %v319_v54 }
 0x11d   :  { %324 = vadd.xlane.f32.xlu0 %v323_v59  ;;  %v326_v60 = vadd.f32 %v322_v58, %v321_v57 }
 0x121   :  { %327 = vadd.xlane.f32.xlu0 %v326_v60 }
 0x1aa   :  { %v325_v61 = vpop.xlane.xlu0 %324 }
 0x1ab   :  { %v330_v62 = vmul.f32 0.00390625, %v325_v61 }
 0x1ad   :  { %v332_v63 = vsub.f32 %v319_v54, %v330_v62  ;;  %v333_v0 = vsub.f32 %v320_v56, %v330_v62 }
 0x1ae   :  { %v328_v1 = vpop.xlane.xlu0 %327 }
 0x1af   :  { %v331_v2 = vmul.f32 0.00390625, %v328_v1  ;;  %v336_v3 = vmul.f32 %v332_v63, %v332_v63  ;;  %v337_v4 = vmul.f32 %v333_v0, %v333_v0 }
 0x1b1   :  { %v334_v5 = vsub.f32 %v321_v57, %v331_v2  ;;  %v335_v6 = vsub.f32 %v322_v58, %v331_v2  ;;  %v340_v7 = vadd.f32 %v337_v4, %v336_v3 }
 0x1b3   :  { %341 = vadd.xlane.f32.xlu1 %v340_v7  ;;  %v338_v8 = vmul.f32 %v334_v5, %v334_v5  ;;  %v339_v9 = vmul.f32 %v335_v6, %v335_v6 }
 0x1b5   :  { %v343_v10 = vadd.f32 %v339_v9, %v338_v8 }
 0x1b7   :  { %344 = vadd.xlane.f32.xlu1 %v343_v10 }
 0x240   :  { %v342_v11 = vpop.xlane.xlu1 %341 }
 0x241   :  { %v346_v12 = vmul.f32 0.00390625, %v342_v11 }
 0x243   :  { %v348_v13 = vadd.f32 1e-12, %v346_v12 }
 0x244   :  { %v345_v14 = vpop.xlane.xlu1 %344 }
 0x245   :  { %495 = vrsqrt.f32 %v348_v13  ;;  %v347_v15 = vmul.f32 0.00390625, %v345_v14 }
 0x247   :  { %v349_v16 = vadd.f32 1e-12, %v347_v15 }
 0x249   :  { %497 = vrsqrt.f32 %v349_v16 }
 0x24f   :  { %v496_v21 = vpop.eup %495 }
 0x250   :  { %v352_v24 = vmul.f32 %v496_v21, %v332_v63  ;;  %v353_v25 = vmul.f32 %v496_v21, %v333_v0 }
 0x252   :  { %v368_v26 = vmul.f32 %v361_v19, %v352_v24  ;;  %v369_v27 = vmul.f32 %v365_v20, %v353_v25 }
 0x253   :  { %v498_v28 = vpop.eup %497 }
 0x254   :  { %v384_v29 = vadd.f32 %v377_v22, %v368_v26  ;;  %v385_v30 = vadd.f32 %v381_v23, %v369_v27  ;;  %v354_v31 = vmul.f32 %v498_v28, %v334_v5  ;;  %v355_v32 = vmul.f32 %v498_v28, %v335_v6 }
 0x256   :  { %v442_v33 = vpack.c.bf16 %v385_v30, %v384_v29  ;;  %v370_v34 = vmul.f32 %v361_v19, %v354_v31  ;;  %v371_v35 = vmul.f32 %v365_v20, %v355_v32 }
 0x258   :  { %400 = vst [vmem:[%s663_s6] sm:$0xff] %v442_v33  ;;  %v386_v37 = vadd.f32 %v377_v22, %v370_v34  ;;  %v387_v39 = vadd.f32 %v381_v23, %v371_v35 }
 0x25a   :  { %v443_v36 = vpack.c.bf16 %v387_v39, %v386_v37 }
 0x25c   :  { %401 = vst [vmem:[%s663_s6 + $0x8] sm:$0xff] %v443_v36 }

// kernel: instruction_bert_encoder_forward.13
= control target key start
LH: loop header
LB: loop body
LE: loop exit
PB: predicated region body
PF: predicated region fallthrough
CT: control target
= control target key end

     0   :  { %8 = vsyncpa [#allocation4], 0  ;;  %s1187_s12 = smov [#allocation3]   ;;  %s1259_s0 = inlined_call_operand.vmem [shape: bf16[16,256], index: 0, kind: input, shape index: {}]   ;;  %s1260_s1 = inlined_call_operand.hbm [shape: bf16[256,768], index: 1, kind: input, shape index: {}]   ;;  %s1261_s2 = inlined_call_operand.vmem [shape: f32[1,768], index: 2, kind: input, shape index: {}]   ;;  %s1262_s3 = inlined_call_operand.vmem [shape: bf16[16,768], index: 3, kind: output, shape index: {}]  }
   0x1   :  { %s16_s13 = sshll.u32 %s1187_s12, 4  ;;  %s1163_s16 = scalar_lea.hbm %s1260_s1, 12288  ;;  %s17_s13 = int_to_ptr.vmem [resolvable:$true] %s16_s13 }
   0x2   :  { %p1164_p0 = scmp.ne.s32.totalorder %s1260_s1, %s1163_s16  ;;  %p1167_p1 = scmp.lt.u32.totalorder %s1163_s16, %s1260_s1 }
   0x4   :  { %p1169_p2 = pnand %p1167_p1, %p1164_p0 }
   0x6   :  { %1172 = shalt.err (!%p1169_p2)
}
   0x7   :  { %s1173_s21 = scalar_lea.vmem %s17_s13, 12288  ;;  %p1178_p4 = scmp.lt.s32.totalorder %s17_s13, %s17_s13 }
   0x8   :  { %p1174_p3 = scmp.ne.s32.totalorder %s17_s13, %s1173_s21  ;;  %p1179_p5 = scmp.lt.s32.totalorder %s1173_s21, %s1173_s21 }
   0xa   :  { %p1180_p6 = por %p1179_p5, %p1178_p4 }
   0xc   :  { %p1181_p7 = pnand %p1180_p6, %p1174_p3 }
   0xe   :  { %1184 = shalt.err (!%p1181_p7)
}
   0xf   :  { %s1188_s22 = smov 384   ;;  %s1189_s23 = smov 24  }
  0x10   :  { %22 = dma.hbm_to_vmem [thread:$0]  %s1260_s1, 12288, %s17_s13, [#allocation4], %s1188_s22, %s1188_s22, %s1189_s23  }
  0x11   :  { %1185 = dma.done.wait [#allocation4], 12288  }
  0x12   :  { %1186 = vsyncadd [#allocation4], 4294955008  ;;  %v1016_v0 = vld [vmem:[#allocation3 + $0x4] ss:$24 sps:$4 sm:$0xff]   ;;  %v1018_v1 = vld [vmem:[#allocation3] ss:$24 sps:$4 sm:$0xff]  }
  0x13   :  { %644 = vmatprep.subr.bf16.mxu0 %v1016_v0  ;;  %v1019_v2 = vld [vmem:[#allocation3 + $0x34] ss:$24 sps:$4 sm:$0xff]   ;;  %v1021_v3 = vld [vmem:[#allocation3 + $0x30] ss:$24 sps:$4 sm:$0xff]   ;;  %v1022_v4 = vld [vmem:[#allocation3 + $0x64] ss:$24 sps:$4 sm:$0xff]  }
  0x14   :  { %645 = vmatpush1.bf16.msra.mxu0 %v1018_v1  ;;  %v1024_v5 = vld [vmem:[#allocation3 + $0x60] ss:$24 sps:$4 sm:$0xff]   ;;  %v1025_v6 = vld [vmem:[#allocation3 + $0x94] ss:$24 sps:$4 sm:$0xff]   ;;  %v1027_v7 = vld [vmem:[#allocation3 + $0x90] ss:$24 sps:$4 sm:$0xff]  }
  0x15   :  { %646 = vmatprep.subr.bf16.mxu0 %v1019_v2  ;;  %v1028_v8 = vld [vmem:[#allocation3 + $0xc4] ss:$24 sps:$4 sm:$0xff]   ;;  %v1030_v9 = vld [vmem:[#allocation3 + $0xc0] ss:$24 sps:$4 sm:$0xff]   ;;  %v1031_v10 = vld [vmem:[#allocation3 + $0xf4] ss:$24 sps:$4 sm:$0xff]  }
  0x16   :  { %v1033_v11 = vld [vmem:[#allocation3 + $0xf0] ss:$24 sps:$4 sm:$0xff]   ;;  %v1034_v12 = vld [vmem:[#allocation3 + $0x124] ss:$24 sps:$4 sm:$0xff]   ;;  %v1036_v15 = vld [vmem:[#allocation3 + $0x120] ss:$24 sps:$4 sm:$0xff]  }
  0x17   :  { %v1064_v13 = vld [vmem:[#allocation3 + $0xc] ss:$24 sps:$4 sm:$0xff]   ;;  %v1066_v14 = vld [vmem:[#allocation3 + $0x8] ss:$24 sps:$4 sm:$0xff]   ;;  %v1073_v18 = vld [vmem:[#allocation3 + $0x3c] ss:$24 sps:$4 sm:$0xff]  }
  0x18   :  { %647 = vmatpush1.bf16.msra.mxu0 %v1021_v3  ;;  %v1225_v16 = vld [vmem:[%s1259_s0 + $0x4] ss:$8 sps:$4 sm:$0xff]   ;;  %687 = vmatprep.subr.bf16.mxu1 %v1064_v13  ;;  %v1075_v19 = vld [vmem:[#allocation3 + $0x38] ss:$24 sps:$4 sm:$0xff]   ;;  %v1081_v23 = vld [vmem:[#allocation3 + $0x68] ss:$24 sps:$4 sm:$0xff]  }
  0x19   :  { %648 = vmatprep.subr.bf16.mxu0 %v1022_v4  ;;  %v1037_v17 = vld [vmem:[#allocation3 + $0x154] ss:$24 sps:$4 sm:$0xff]   ;;  %688 = vmatpush1.bf16.msra.mxu1 %v1066_v14  ;;  %v1039_v20 = vld [vmem:[#allocation3 + $0x150] ss:$24 sps:$4 sm:$0xff]   ;;  %v1040_v21 = vld [vmem:[#allocation3 + $0x184] ss:$24 sps:$4 sm:$0xff]  }
  0x1a   :  { %676 = vmatprep.mubr.bf16.mxu0 %v1225_v16  ;;  %719 = vmatprep.mubr.bf16.mxu1 %v1225_v16  ;;  %v1079_v22 = vld [vmem:[#allocation3 + $0x6c] ss:$24 sps:$4 sm:$0xff]   ;;  %v1042_v24 = vld [vmem:[#allocation3 + $0x180] ss:$24 sps:$4 sm:$0xff]   ;;  %v1085_v25 = vld [vmem:[#allocation3 + $0x9c] ss:$24 sps:$4 sm:$0xff]  }
  0x1b   :  { %689 = vmatprep.subr.bf16.mxu1 %v1073_v18  ;;  %v1043_v26 = vld [vmem:[#allocation3 + $0x1b4] ss:$24 sps:$4 sm:$0xff]   ;;  %v1087_v27 = vld [vmem:[#allocation3 + $0x98] ss:$24 sps:$4 sm:$0xff]   ;;  %v1046_v30 = vld [vmem:[#allocation3 + $0x1e4] ss:$24 sps:$4 sm:$0xff]  }
  0x1c   :  { %649 = vmatpush1.bf16.msra.mxu0 %v1024_v5  ;;  %v1091_v28 = vld [vmem:[#allocation3 + $0xcc] ss:$24 sps:$4 sm:$0xff]   ;;  %v1045_v29 = vld [vmem:[#allocation3 + $0x1b0] ss:$24 sps:$4 sm:$0xff]   ;;  %v1097_v32 = vld [vmem:[#allocation3 + $0xfc] ss:$24 sps:$4 sm:$0xff]  }
  0x1d   :  { %650 = vmatprep.subr.bf16.mxu0 %v1025_v6  ;;  %690 = vmatpush1.bf16.msra.mxu1 %v1075_v19  ;;  %v1093_v31 = vld [vmem:[#allocation3 + $0xc8] ss:$24 sps:$4 sm:$0xff]   ;;  %v1049_v34 = vld [vmem:[#allocation3 + $0x214] ss:$24 sps:$4 sm:$0xff]   ;;  %v1099_v35 = vld [vmem:[#allocation3 + $0xf8] ss:$24 sps:$4 sm:$0xff]  }
  0x1e   :  { %691 = vmatprep.subr.bf16.mxu1 %v1079_v22  ;;  %v1048_v33 = vld [vmem:[#allocation3 + $0x1e0] ss:$24 sps:$4 sm:$0xff]   ;;  %v1103_v36 = vld [vmem:[#allocation3 + $0x12c] ss:$24 sps:$4 sm:$0xff]   ;;  %v1051_v37 = vld [vmem:[#allocation3 + $0x210] ss:$24 sps:$4 sm:$0xff]  }
  0x1f   :  { %v1052_v38 = vld [vmem:[#allocation3 + $0x244] ss:$24 sps:$4 sm:$0xff]   ;;  %v1105_v39 = vld [vmem:[#allocation3 + $0x128] ss:$24 sps:$4 sm:$0xff]   ;;  %v1055_v42 = vld [vmem:[#allocation3 + $0x274] ss:$24 sps:$4 sm:$0xff]  }
  0x20   :  { %651 = vmatpush1.bf16.msra.mxu0 %v1027_v7  ;;  %v1109_v40 = vld [vmem:[#allocation3 + $0x15c] ss:$24 sps:$4 sm:$0xff]   ;;  %v1054_v41 = vld [vmem:[#allocation3 + $0x240] ss:$24 sps:$4 sm:$0xff]   ;;  %v1115_v44 = vld [vmem:[#allocation3 + $0x18c] ss:$24 sps:$4 sm:$0xff]  }
  0x21   :  { %652 = vmatprep.subr.bf16.mxu0 %v1028_v8  ;;  %692 = vmatpush1.bf16.msra.mxu1 %v1081_v23  ;;  %v1111_v43 = vld [vmem:[#allocation3 + $0x158] ss:$24 sps:$4 sm:$0xff]   ;;  %v1058_v46 = vld [vmem:[#allocation3 + $0x2a4] ss:$24 sps:$4 sm:$0xff]   ;;  %v1117_v47 = vld [vmem:[#allocation3 + $0x188] ss:$24 sps:$4 sm:$0xff]  }
  0x22   :  { %693 = vmatprep.subr.bf16.mxu1 %v1085_v25  ;;  %v1057_v45 = vld [vmem:[#allocation3 + $0x270] ss:$24 sps:$4 sm:$0xff]   ;;  %v1121_v48 = vld [vmem:[#allocation3 + $0x1bc] ss:$24 sps:$4 sm:$0xff]   ;;  %v1060_v49 = vld [vmem:[#allocation3 + $0x2a0] ss:$24 sps:$4 sm:$0xff]  }
  0x23   :  { %v1061_v50 = vld [vmem:[#allocation3 + $0x2d4] ss:$24 sps:$4 sm:$0xff]   ;;  %v1123_v51 = vld [vmem:[#allocation3 + $0x1b8] ss:$24 sps:$4 sm:$0xff]   ;;  %v1129_v55 = vld [vmem:[#allocation3 + $0x1e8] ss:$24 sps:$4 sm:$0xff]  }
  0x24   :  { %653 = vmatpush1.bf16.msra.mxu0 %v1030_v9  ;;  %v1127_v52 = vld [vmem:[#allocation3 + $0x1ec] ss:$24 sps:$4 sm:$0xff]   ;;  %v1063_v53 = vld [vmem:[#allocation3 + $0x2d0] ss:$24 sps:$4 sm:$0xff]   ;;  %v1133_v57 = vld [vmem:[#allocation3 + $0x21c] ss:$24 sps:$4 sm:$0xff]  }
  0x25   :  { %654 = vmatprep.subr.bf16.mxu0 %v1031_v10  ;;  %694 = vmatpush1.bf16.msra.mxu1 %v1087_v27  ;;  %v1072_v54 = vld [vmem:[#allocation3 + $0x14] ss:$24 sps:$4 sm:$0xff]   ;;  %v1232_v56 = vld [vmem:[%s1259_s0] ss:$8 sps:$4 sm:$0xff]   ;;  %v1078_v59 = vld [vmem:[#allocation3 + $0x44] ss:$24 sps:$4 sm:$0xff]  }
  0x26   :  { %695 = vmatprep.subr.bf16.mxu1 %v1091_v28  ;;  %v1070_v58 = vld [vmem:[#allocation3 + $0x10] ss:$24 sps:$4 sm:$0xff]   ;;  %v1139_v61 = vld [vmem:[#allocation3 + $0x24c] ss:$24 sps:$4 sm:$0xff]   ;;  %v1076_v62 = vld [vmem:[#allocation3 + $0x40] ss:$24 sps:$4 sm:$0xff]  }
  0x27   :  { %v1135_v60 = vld [vmem:[#allocation3 + $0x218] ss:$24 sps:$4 sm:$0xff]   ;;  %v1084_v63 = vld [vmem:[#allocation3 + $0x74] ss:$24 sps:$4 sm:$0xff]   ;;  %v1141_v0 = vld [vmem:[#allocation3 + $0x248] ss:$24 sps:$4 sm:$0xff]  }
  0x28   :  { %655 = vmatpush1.bf16.msra.mxu0 %v1033_v11  ;;  %v1145_v1 = vld [vmem:[#allocation3 + $0x27c] ss:$24 sps:$4 sm:$0xff]   ;;  %v1082_v2 = vld [vmem:[#allocation3 + $0x70] ss:$24 sps:$4 sm:$0xff]   ;;  %v1151_v5 = vld [vmem:[#allocation3 + $0x2ac] ss:$24 sps:$4 sm:$0xff]  }
  0x29   :  { %656 = vmatprep.subr.bf16.mxu0 %v1034_v12  ;;  %696 = vmatpush1.bf16.msra.mxu1 %v1093_v31  ;;  %v1090_v3 = vld [vmem:[#allocation3 + $0xa4] ss:$24 sps:$4 sm:$0xff]   ;;  %v1147_v4 = vld [vmem:[#allocation3 + $0x278] ss:$24 sps:$4 sm:$0xff]   ;;  %v1096_v7 = vld [vmem:[#allocation3 + $0xd4] ss:$24 sps:$4 sm:$0xff]  }
  0x2a   :  { %697 = vmatprep.subr.bf16.mxu1 %v1097_v32  ;;  %v1088_v6 = vld [vmem:[#allocation3 + $0xa0] ss:$24 sps:$4 sm:$0xff]   ;;  %v1157_v9 = vld [vmem:[#allocation3 + $0x2dc] ss:$24 sps:$4 sm:$0xff]   ;;  %v1094_v10 = vld [vmem:[#allocation3 + $0xd0] ss:$24 sps:$4 sm:$0xff]  }
  0x2b   :  { %v1153_v8 = vld [vmem:[#allocation3 + $0x2a8] ss:$24 sps:$4 sm:$0xff]   ;;  %v1102_v11 = vld [vmem:[#allocation3 + $0x104] ss:$24 sps:$4 sm:$0xff]   ;;  %v1159_v12 = vld [vmem:[#allocation3 + $0x2d8] ss:$24 sps:$4 sm:$0xff]  }
  0x2c   :  { %657 = vmatpush1.bf16.msra.mxu0 %v1036_v15  ;;  %v1100_v13 = vld [vmem:[#allocation3 + $0x100] ss:$24 sps:$4 sm:$0xff]   ;;  %v1108_v14 = vld [vmem:[#allocation3 + $0x134] ss:$24 sps:$4 sm:$0xff]   ;;  %v1106_v15 = vld [vmem:[#allocation3 + $0x130] ss:$24 sps:$4 sm:$0xff]  }
  0x2d   :  { %658 = vmatprep.subr.bf16.mxu0 %v1037_v17  ;;  %698 = vmatpush1.bf16.msra.mxu1 %v1099_v35  ;;  %v1112_v17 = vld [vmem:[#allocation3 + $0x160] ss:$24 sps:$4 sm:$0xff]   ;;  %v1120_v18 = vld [vmem:[#allocation3 + $0x194] ss:$24 sps:$4 sm:$0xff]   ;;  %v1118_v19 = vld [vmem:[#allocation3 + $0x190] ss:$24 sps:$4 sm:$0xff]  }
  0x2e   :  { %699 = vmatprep.subr.bf16.mxu1 %v1103_v36  ;;  %v1132_v22 = vld [vmem:[#allocation3 + $0x1f4] ss:$24 sps:$4 sm:$0xff]   ;;  %v1130_v23 = vld [vmem:[#allocation3 + $0x1f0] ss:$24 sps:$4 sm:$0xff]   ;;  %v1136_v25 = vld [vmem:[#allocation3 + $0x220] ss:$24 sps:$4 sm:$0xff]  }
  0x2f   :  { %v1142_v27 = vld [vmem:[#allocation3 + $0x250] ss:$24 sps:$4 sm:$0xff]   ;;  %v1150_v28 = vld [vmem:[#allocation3 + $0x284] ss:$24 sps:$4 sm:$0xff]  }
  0x30   :  { %659 = vmatpush1.bf16.msra.mxu0 %v1039_v20  ;;  %v1126_v20 = vld [vmem:[#allocation3 + $0x1c4] ss:$24 sps:$4 sm:$0xff]   ;;  %v1154_v31 = vld [vmem:[#allocation3 + $0x2b0] ss:$24 sps:$4 sm:$0xff]  }
  0x31   :  { %660 = vmatprep.subr.bf16.mxu0 %v1040_v21  ;;  %700 = vmatpush1.bf16.msra.mxu1 %v1105_v39  ;;  %v1124_v21 = vld [vmem:[#allocation3 + $0x1c0] ss:$24 sps:$4 sm:$0xff]   ;;  %v1162_v32 = vld [vmem:[#allocation3 + $0x2e4] ss:$24 sps:$4 sm:$0xff]  }
  0x32   :  { %701 = vmatprep.subr.bf16.mxu1 %v1109_v40 }
  0x34   :  { %661 = vmatpush1.bf16.msra.mxu0 %v1042_v24  ;;  %v1138_v24 = vld [vmem:[#allocation3 + $0x224] ss:$24 sps:$4 sm:$0xff]  }
  0x35   :  { %662 = vmatprep.subr.bf16.mxu0 %v1043_v26  ;;  %702 = vmatpush1.bf16.msra.mxu1 %v1111_v43  ;;  %v1144_v26 = vld [vmem:[#allocation3 + $0x254] ss:$24 sps:$4 sm:$0xff]  }
  0x36   :  { %703 = vmatprep.subr.bf16.mxu1 %v1115_v44 }
  0x38   :  { %663 = vmatpush1.bf16.msra.mxu0 %v1045_v29  ;;  %v1148_v29 = vld [vmem:[#allocation3 + $0x280] ss:$24 sps:$4 sm:$0xff]  }
  0x39   :  { %664 = vmatprep.subr.bf16.mxu0 %v1046_v30  ;;  %704 = vmatpush1.bf16.msra.mxu1 %v1117_v47  ;;  %v1156_v30 = vld [vmem:[#allocation3 + $0x2b4] ss:$24 sps:$4 sm:$0xff]  }
  0x3a   :  { %705 = vmatprep.subr.bf16.mxu1 %v1121_v48 }
  0x3c   :  { %665 = vmatpush1.bf16.msra.mxu0 %v1048_v33  ;;  %v1160_v33 = vld [vmem:[#allocation3 + $0x2e0] ss:$24 sps:$4 sm:$0xff]  }
  0x3d   :  { %666 = vmatprep.subr.bf16.mxu0 %v1049_v34  ;;  %706 = vmatpush1.bf16.msra.mxu1 %v1123_v51  ;;  %v814_v34 = vlaneseq }
  0x3e   :  { %707 = vmatprep.subr.bf16.mxu1 %v1127_v52 }
  0x3f   :  { %v815_v35 = vshrl.u32 %v814_v34, 7 }
  0x40   :  { %667 = vmatpush1.bf16.msra.mxu0 %v1051_v37  ;;  %v812_v37 = vld [vmem:[%s1261_s2] sm:$0x3f] }
  0x41   :  { %668 = vmatprep.subr.bf16.mxu0 %v1052_v38  ;;  %708 = vmatpush1.bf16.msra.mxu1 %v1129_v55  ;;  %v832_v36 = vsub.s32 4, %v815_v35  ;;  %v836_v38 = vsub.s32 5, %v815_v35  ;;  %v824_v55 = vsub.s32 2, %v815_v35 }
  0x42   :  { %709 = vmatprep.subr.bf16.mxu1 %v1133_v57 }
  0x43   :  { %v833_v39 = vrot.slane %v812_v37, %v832_v36  ;;  %v837_v40 = vrot.slane %v812_v37, %v836_v38  ;;  %v825_v57 = vrot.slane %v812_v37, %v824_v55 }
  0x44   :  { %669 = vmatpush1.bf16.msra.mxu0 %v1054_v41  ;;  %v816_v41 = vsub.s32 0, %v815_v35 }
  0x45   :  { %670 = vmatprep.subr.bf16.mxu0 %v1055_v42  ;;  %710 = vmatpush1.bf16.msra.mxu1 %v1135_v60  ;;  %v820_v42 = vsub.s32 1, %v815_v35 }
  0x46   :  { %711 = vmatprep.subr.bf16.mxu1 %v1139_v61  ;;  %v817_v43 = vrot.slane %v812_v37, %v816_v41 }
  0x47   :  { %v821_v44 = vrot.slane %v812_v37, %v820_v42 }
  0x48   :  { %671 = vmatpush1.bf16.msra.mxu0 %v1057_v45 }
  0x49   :  { %672 = vmatprep.subr.bf16.mxu0 %v1058_v46  ;;  %712 = vmatpush1.bf16.msra.mxu1 %v1141_v0 }
  0x4a   :  { %713 = vmatprep.subr.bf16.mxu1 %v1145_v1 }
  0x4c   :  { %673 = vmatpush1.bf16.msra.mxu0 %v1060_v49 }
  0x4d   :  { %674 = vmatprep.subr.bf16.mxu0 %v1061_v50  ;;  %714 = vmatpush1.bf16.msra.mxu1 %v1147_v4 }
  0x4e   :  { %715 = vmatprep.subr.bf16.mxu1 %v1151_v5 }
  0x50   :  { %675 = vmatpush1.bf16.msra.mxu0 %v1063_v53 }
  0x51   :  { %730 = vmatprep.subr.bf16.mxu0 %v1072_v54  ;;  %716 = vmatpush1.bf16.msra.mxu1 %v1153_v8 }
  0x52   :  { %717 = vmatprep.subr.bf16.mxu1 %v1157_v9 }
  0x53   :  { %677 = vmatmul.mubr.bf16.vlgmr.msra.gmra.mrb[0].mxu0 %v1232_v56 }
  0x54   :  { %731 = vmatpush1.bf16.msra.mxu0 %v1070_v58  ;;  %762 = vmatprep.mubr.bf16.mxu0 %v1225_v16  ;;  %v1114_v16 = vld [vmem:[#allocation3 + $0x164] ss:$24 sps:$4 sm:$0xff]  }
  0x55   :  { %732 = vmatprep.subr.bf16.mxu0 %v1078_v59  ;;  %718 = vmatpush1.bf16.msra.mxu1 %v1159_v12 }
  0x58   :  { %733 = vmatpush1.bf16.msra.mxu0 %v1076_v62  ;;  %720 = vmatmul.mubr.bf16.vlgmr.msra.gmra.mrb[0].mxu1 %v1232_v56 }
  0x59   :  { %734 = vmatprep.subr.bf16.mxu0 %v1084_v63 }
  0x5c   :  { %735 = vmatpush1.bf16.msra.mxu0 %v1082_v2 }
  0x5d   :  { %736 = vmatprep.subr.bf16.mxu0 %v1090_v3 }
  0x60   :  { %737 = vmatpush1.bf16.msra.mxu0 %v1088_v6 }
  0x61   :  { %738 = vmatprep.subr.bf16.mxu0 %v1096_v7 }
  0x64   :  { %739 = vmatpush1.bf16.msra.mxu0 %v1094_v10 }
  0x65   :  { %740 = vmatprep.subr.bf16.mxu0 %v1102_v11 }
  0x68   :  { %741 = vmatpush1.bf16.msra.mxu0 %v1100_v13 }
  0x69   :  { %742 = vmatprep.subr.bf16.mxu0 %v1108_v14 }
  0x6c   :  { %743 = vmatpush1.bf16.msra.mxu0 %v1106_v15 }
  0x6d   :  { %744 = vmatprep.subr.bf16.mxu0 %v1114_v16 }
  0x70   :  { %745 = vmatpush1.bf16.msra.mxu0 %v1112_v17 }
  0x71   :  { %746 = vmatprep.subr.bf16.mxu0 %v1120_v18 }
  0x74   :  { %747 = vmatpush1.bf16.msra.mxu0 %v1118_v19 }
  0x75   :  { %748 = vmatprep.subr.bf16.mxu0 %v1126_v20 }
  0x78   :  { %749 = vmatpush1.bf16.msra.mxu0 %v1124_v21 }
  0x79   :  { %750 = vmatprep.subr.bf16.mxu0 %v1132_v22 }
  0x7c   :  { %751 = vmatpush1.bf16.msra.mxu0 %v1130_v23 }
  0x7d   :  { %752 = vmatprep.subr.bf16.mxu0 %v1138_v24 }
  0x80   :  { %753 = vmatpush1.bf16.msra.mxu0 %v1136_v25 }
  0x81   :  { %754 = vmatprep.subr.bf16.mxu0 %v1144_v26 }
  0x84   :  { %755 = vmatpush1.bf16.msra.mxu0 %v1142_v27 }
  0x85   :  { %756 = vmatprep.subr.bf16.mxu0 %v1150_v28 }
  0x88   :  { %757 = vmatpush1.bf16.msra.mxu0 %v1148_v29 }
  0x89   :  { %758 = vmatprep.subr.bf16.mxu0 %v1156_v30 }
  0x8c   :  { %759 = vmatpush1.bf16.msra.mxu0 %v1154_v31 }
  0x8d   :  { %760 = vmatprep.subr.bf16.mxu0 %v1162_v32 }
  0x90   :  { %761 = vmatpush1.bf16.msra.mxu0 %v1160_v33 }
  0x93   :  { %763 = vmatmul.mubr.bf16.vlgmr.msra.gmra.mrb[4].mxu0 %v1232_v56  ;;  %v828_v56 = vsub.s32 3, %v815_v35 }
  0x95   :  { %v829_v58 = vrot.slane %v812_v37, %v828_v56 }
 0x126   :  { %v678_v45 = vpop.f32.mrb[0].mxu0 }
 0x127   :  { %v844_v46 = vadd.f32 %v817_v43, %v678_v45  ;;  %v680_v47 = vpop.f32.mrb[1].mxu0 }
 0x128   :  { %v845_v48 = vadd.f32 %v821_v44, %v680_v47  ;;  %v682_v49 = vpop.f32.mrb[2].mxu0 }
 0x129   :  { %v850_v50 = vadd.f32 %v817_v43, %v682_v49  ;;  %v684_v51 = vpop.f32.mrb[3].mxu0 }
 0x12a   :  { %v1007_v52 = vpack.c.bf16 %v845_v48, %v844_v46  ;;  %v851_v53 = vadd.f32 %v821_v44, %v684_v51 }
 0x12b   :  { %v721_v59 = vpop.f32.mrb[0].mxu1 }
 0x12c   :  { %892 = vst [vmem:[%s1262_s3] sm:$0xff] %v1007_v52  ;;  %v1010_v54 = vpack.c.bf16 %v851_v53, %v850_v50  ;;  %v846_v60 = vadd.f32 %v825_v57, %v721_v59  ;;  %v723_v61 = vpop.f32.mrb[1].mxu1 }
 0x12d   :  { %v847_v62 = vadd.f32 %v829_v58, %v723_v61  ;;  %v725_v63 = vpop.f32.mrb[2].mxu1 }
 0x12e   :  { %895 = vst [vmem:[%s1262_s3 + $0x18] sm:$0xff] %v1010_v54  ;;  %v852_v0 = vadd.f32 %v825_v57, %v725_v63  ;;  %v727_v1 = vpop.f32.mrb[3].mxu1 }
 0x12f   :  { %v1008_v2 = vpack.c.bf16 %v847_v62, %v846_v60  ;;  %v853_v3 = vadd.f32 %v829_v58, %v727_v1 }
 0x131   :  { %893 = vst [vmem:[%s1262_s3 + $0x8] sm:$0xff] %v1008_v2  ;;  %v1011_v4 = vpack.c.bf16 %v853_v3, %v852_v0 }
 0x133   :  { %896 = vst [vmem:[%s1262_s3 + $0x20] sm:$0xff] %v1011_v4 }
 0x166   :  { %v764_v5 = vpop.f32.mrb[4].mxu0 }
 0x167   :  { %v848_v6 = vadd.f32 %v833_v39, %v764_v5  ;;  %v766_v7 = vpop.f32.mrb[5].mxu0 }
 0x168   :  { %v849_v8 = vadd.f32 %v837_v40, %v766_v7  ;;  %v768_v9 = vpop.f32.mrb[6].mxu0 }
 0x169   :  { %v854_v10 = vadd.f32 %v833_v39, %v768_v9  ;;  %v770_v11 = vpop.f32.mrb[7].mxu0 }
 0x16a   :  { %v1009_v12 = vpack.c.bf16 %v849_v8, %v848_v6  ;;  %v855_v13 = vadd.f32 %v837_v40, %v770_v11 }
 0x16c   :  { %894 = vst [vmem:[%s1262_s3 + $0x10] sm:$0xff] %v1009_v12  ;;  %v1012_v14 = vpack.c.bf16 %v855_v13, %v854_v10 }
 0x16e   :  { %897 = vst [vmem:[%s1262_s3 + $0x28] sm:$0xff] %v1012_v14 }
 0x16f   :  { %902 = vsyncpa [#allocation4], 1 }

// kernel: instruction_bert_encoder_forward.16
= control target key start
LH: loop header
LB: loop body
LE: loop exit
PB: predicated region body
PF: predicated region fallthrough
CT: control target
= control target key end

     0   :  { %s1412_s1 = inlined_call_operand.vmem [shape: bf16[256,512], index: 1, kind: input, shape index: {}]   ;;  %s1413_s0 = inlined_call_operand.vmem [shape: bf16[16,256], index: 0, kind: input, shape index: {}]   ;;  %s1414_s2 = inlined_call_operand.vmem [shape: f32[1,512], index: 2, kind: input, shape index: {}]   ;;  %s1415_s3 = inlined_call_operand.vmem [shape: bf16[16,512], index: 3, kind: output, shape index: {}]  }
   0x1   :  { %v911_v0 = vld [vmem:[%s1412_s1 + $0x4] ss:$16 sps:$4 sm:$0xff]   ;;  %v913_v1 = vld [vmem:[%s1412_s1 + $0xc] ss:$16 sps:$4 sm:$0xff]   ;;  %v915_v2 = vld [vmem:[%s1412_s1] ss:$16 sps:$4 sm:$0xff]  }
   0x2   :  { %430 = vmatprep.subr.bf16.mxu0 %v911_v0  ;;  %v916_v3 = vld [vmem:[%s1412_s1 + $0x8] ss:$16 sps:$4 sm:$0xff]   ;;  %473 = vmatprep.subr.bf16.mxu1 %v913_v1  ;;  %v917_v4 = vld [vmem:[%s1412_s1 + $0x24] ss:$16 sps:$4 sm:$0xff]   ;;  %v919_v5 = vld [vmem:[%s1412_s1 + $0x2c] ss:$16 sps:$4 sm:$0xff]  }
   0x3   :  { %431 = vmatpush1.bf16.msra.mxu0 %v915_v2  ;;  %474 = vmatpush1.bf16.msra.mxu1 %v916_v3  ;;  %v921_v6 = vld [vmem:[%s1412_s1 + $0x20] ss:$16 sps:$4 sm:$0xff]   ;;  %v922_v7 = vld [vmem:[%s1412_s1 + $0x28] ss:$16 sps:$4 sm:$0xff]   ;;  %v923_v8 = vld [vmem:[%s1412_s1 + $0x44] ss:$16 sps:$4 sm:$0xff]   ;;  %v545_v2 = vlaneseq }
   0x4   :  { %432 = vmatprep.subr.bf16.mxu0 %v917_v4  ;;  %475 = vmatprep.subr.bf16.mxu1 %v919_v5  ;;  %v925_v9 = vld [vmem:[%s1412_s1 + $0x4c] ss:$16 sps:$4 sm:$0xff]   ;;  %v927_v10 = vld [vmem:[%s1412_s1 + $0x40] ss:$16 sps:$4 sm:$0xff]   ;;  %v928_v11 = vld [vmem:[%s1412_s1 + $0x48] ss:$16 sps:$4 sm:$0xff]  }
   0x5   :  { %v929_v12 = vld [vmem:[%s1412_s1 + $0x64] ss:$16 sps:$4 sm:$0xff]   ;;  %v931_v13 = vld [vmem:[%s1412_s1 + $0x6c] ss:$16 sps:$4 sm:$0xff]   ;;  %v933_v14 = vld [vmem:[%s1412_s1 + $0x60] ss:$16 sps:$4 sm:$0xff]  }
   0x6   :  { %v934_v15 = vld [vmem:[%s1412_s1 + $0x68] ss:$16 sps:$4 sm:$0xff]   ;;  %v935_v16 = vld [vmem:[%s1412_s1 + $0x84] ss:$16 sps:$4 sm:$0xff]   ;;  %v937_v17 = vld [vmem:[%s1412_s1 + $0x8c] ss:$16 sps:$4 sm:$0xff]  }
   0x7   :  { %433 = vmatpush1.bf16.msra.mxu0 %v921_v6  ;;  %476 = vmatpush1.bf16.msra.mxu1 %v922_v7  ;;  %v939_v18 = vld [vmem:[%s1412_s1 + $0x80] ss:$16 sps:$4 sm:$0xff]   ;;  %v940_v19 = vld [vmem:[%s1412_s1 + $0x88] ss:$16 sps:$4 sm:$0xff]   ;;  %v941_v20 = vld [vmem:[%s1412_s1 + $0xa4] ss:$16 sps:$4 sm:$0xff]  }
   0x8   :  { %434 = vmatprep.subr.bf16.mxu0 %v923_v8  ;;  %477 = vmatprep.subr.bf16.mxu1 %v925_v9  ;;  %v943_v21 = vld [vmem:[%s1412_s1 + $0xac] ss:$16 sps:$4 sm:$0xff]   ;;  %v945_v22 = vld [vmem:[%s1412_s1 + $0xa0] ss:$16 sps:$4 sm:$0xff]   ;;  %v946_v23 = vld [vmem:[%s1412_s1 + $0xa8] ss:$16 sps:$4 sm:$0xff]  }
   0x9   :  { %v947_v24 = vld [vmem:[%s1412_s1 + $0xc4] ss:$16 sps:$4 sm:$0xff]   ;;  %v949_v25 = vld [vmem:[%s1412_s1 + $0xcc] ss:$16 sps:$4 sm:$0xff]   ;;  %v951_v26 = vld [vmem:[%s1412_s1 + $0xc0] ss:$16 sps:$4 sm:$0xff]  }
   0xa   :  { %v952_v27 = vld [vmem:[%s1412_s1 + $0xc8] ss:$16 sps:$4 sm:$0xff]   ;;  %v953_v28 = vld [vmem:[%s1412_s1 + $0xe4] ss:$16 sps:$4 sm:$0xff]   ;;  %v955_v29 = vld [vmem:[%s1412_s1 + $0xec] ss:$16 sps:$4 sm:$0xff]  }
   0xb   :  { %435 = vmatpush1.bf16.msra.mxu0 %v927_v10  ;;  %478 = vmatpush1.bf16.msra.mxu1 %v928_v11  ;;  %v957_v30 = vld [vmem:[%s1412_s1 + $0xe0] ss:$16 sps:$4 sm:$0xff]   ;;  %v958_v31 = vld [vmem:[%s1412_s1 + $0xe8] ss:$16 sps:$4 sm:$0xff]   ;;  %v959_v32 = vld [vmem:[%s1412_s1 + $0x104] ss:$16 sps:$4 sm:$0xff]  }
   0xc   :  { %436 = vmatprep.subr.bf16.mxu0 %v929_v12  ;;  %479 = vmatprep.subr.bf16.mxu1 %v931_v13  ;;  %v961_v33 = vld [vmem:[%s1412_s1 + $0x10c] ss:$16 sps:$4 sm:$0xff]   ;;  %v963_v34 = vld [vmem:[%s1412_s1 + $0x100] ss:$16 sps:$4 sm:$0xff]   ;;  %v964_v35 = vld [vmem:[%s1412_s1 + $0x108] ss:$16 sps:$4 sm:$0xff]  }
   0xd   :  { %v965_v36 = vld [vmem:[%s1412_s1 + $0x124] ss:$16 sps:$4 sm:$0xff]   ;;  %v967_v37 = vld [vmem:[%s1412_s1 + $0x12c] ss:$16 sps:$4 sm:$0xff]   ;;  %v969_v38 = vld [vmem:[%s1412_s1 + $0x120] ss:$16 sps:$4 sm:$0xff]  }
   0xe   :  { %v970_v39 = vld [vmem:[%s1412_s1 + $0x128] ss:$16 sps:$4 sm:$0xff]   ;;  %v971_v40 = vld [vmem:[%s1412_s1 + $0x144] ss:$16 sps:$4 sm:$0xff]   ;;  %v973_v41 = vld [vmem:[%s1412_s1 + $0x14c] ss:$16 sps:$4 sm:$0xff]  }
   0xf   :  { %437 = vmatpush1.bf16.msra.mxu0 %v933_v14  ;;  %480 = vmatpush1.bf16.msra.mxu1 %v934_v15  ;;  %v975_v42 = vld [vmem:[%s1412_s1 + $0x140] ss:$16 sps:$4 sm:$0xff]   ;;  %v976_v43 = vld [vmem:[%s1412_s1 + $0x148] ss:$16 sps:$4 sm:$0xff]   ;;  %v977_v44 = vld [vmem:[%s1412_s1 + $0x164] ss:$16 sps:$4 sm:$0xff]  }
  0x10   :  { %438 = vmatprep.subr.bf16.mxu0 %v935_v16  ;;  %481 = vmatprep.subr.bf16.mxu1 %v937_v17  ;;  %v979_v45 = vld [vmem:[%s1412_s1 + $0x16c] ss:$16 sps:$4 sm:$0xff]   ;;  %v981_v47 = vld [vmem:[%s1412_s1 + $0x160] ss:$16 sps:$4 sm:$0xff]   ;;  %v982_v48 = vld [vmem:[%s1412_s1 + $0x168] ss:$16 sps:$4 sm:$0xff]  }
  0x11   :  { %v1009_v46 = vld [vmem:[%s1413_s0 + $0x4] ss:$8 sps:$4 sm:$0xff]   ;;  %v987_v51 = vld [vmem:[%s1412_s1 + $0x180] ss:$16 sps:$4 sm:$0xff]   ;;  %v988_v52 = vld [vmem:[%s1412_s1 + $0x188] ss:$16 sps:$4 sm:$0xff]  }
  0x12   :  { %v983_v49 = vld [vmem:[%s1412_s1 + $0x184] ss:$16 sps:$4 sm:$0xff]   ;;  %v985_v50 = vld [vmem:[%s1412_s1 + $0x18c] ss:$16 sps:$4 sm:$0xff]   ;;  %462 = vmatprep.mubr.bf16.mxu0 %v1009_v46  ;;  %505 = vmatprep.mubr.bf16.mxu1 %v1009_v46  ;;  %v993_v55 = vld [vmem:[%s1412_s1 + $0x1a0] ss:$16 sps:$4 sm:$0xff]  }
  0x13   :  { %439 = vmatpush1.bf16.msra.mxu0 %v939_v18  ;;  %482 = vmatpush1.bf16.msra.mxu1 %v940_v19  ;;  %v989_v53 = vld [vmem:[%s1412_s1 + $0x1a4] ss:$16 sps:$4 sm:$0xff]   ;;  %v991_v54 = vld [vmem:[%s1412_s1 + $0x1ac] ss:$16 sps:$4 sm:$0xff]   ;;  %v994_v56 = vld [vmem:[%s1412_s1 + $0x1a8] ss:$16 sps:$4 sm:$0xff]  }
  0x14   :  { %440 = vmatprep.subr.bf16.mxu0 %v941_v20  ;;  %483 = vmatprep.subr.bf16.mxu1 %v943_v21  ;;  %v995_v57 = vld [vmem:[%s1412_s1 + $0x1c4] ss:$16 sps:$4 sm:$0xff]   ;;  %v997_v58 = vld [vmem:[%s1412_s1 + $0x1cc] ss:$16 sps:$4 sm:$0xff]   ;;  %v999_v59 = vld [vmem:[%s1412_s1 + $0x1c0] ss:$16 sps:$4 sm:$0xff]  }
  0x15   :  { %v1000_v60 = vld [vmem:[%s1412_s1 + $0x1c8] ss:$16 sps:$4 sm:$0xff]   ;;  %v1001_v61 = vld [vmem:[%s1412_s1 + $0x1e4] ss:$16 sps:$4 sm:$0xff]   ;;  %v1003_v62 = vld [vmem:[%s1412_s1 + $0x1ec] ss:$16 sps:$4 sm:$0xff]  }
  0x16   :  { %v1005_v63 = vld [vmem:[%s1412_s1 + $0x1e0] ss:$16 sps:$4 sm:$0xff]   ;;  %v1006_v0 = vld [vmem:[%s1412_s1 + $0x1e8] ss:$16 sps:$4 sm:$0xff]   ;;  %v546_v3 = vshrl.u32 %v545_v2, 7 }
  0x17   :  { %441 = vmatpush1.bf16.msra.mxu0 %v945_v22  ;;  %484 = vmatpush1.bf16.msra.mxu1 %v946_v23  ;;  %v1007_v1 = vld [vmem:[%s1413_s0] ss:$8 sps:$4 sm:$0xff]  }
  0x18   :  { %442 = vmatprep.subr.bf16.mxu0 %v947_v24  ;;  %485 = vmatprep.subr.bf16.mxu1 %v949_v25  ;;  %v547_v4 = vsub.s32 0, %v546_v3  ;;  %v555_v5 = vsub.s32 2, %v546_v3  ;;  %v543_v6 = vld [vmem:[%s1414_s2] sm:$0xf]  ;;  %v551_v7 = vsub.s32 1, %v546_v3  ;;  %v559_v8 = vsub.s32 3, %v546_v3 }
  0x1a   :  { %v548_v9 = vrot.slane %v543_v6, %v547_v4  ;;  %v556_v10 = vrot.slane %v543_v6, %v555_v5  ;;  %v552_v11 = vrot.slane %v543_v6, %v551_v7  ;;  %v560_v12 = vrot.slane %v543_v6, %v559_v8 }
  0x1b   :  { %443 = vmatpush1.bf16.msra.mxu0 %v951_v26  ;;  %486 = vmatpush1.bf16.msra.mxu1 %v952_v27 }
  0x1c   :  { %444 = vmatprep.subr.bf16.mxu0 %v953_v28  ;;  %487 = vmatprep.subr.bf16.mxu1 %v955_v29 }
  0x1f   :  { %445 = vmatpush1.bf16.msra.mxu0 %v957_v30  ;;  %488 = vmatpush1.bf16.msra.mxu1 %v958_v31 }
  0x20   :  { %446 = vmatprep.subr.bf16.mxu0 %v959_v32  ;;  %489 = vmatprep.subr.bf16.mxu1 %v961_v33 }
  0x23   :  { %447 = vmatpush1.bf16.msra.mxu0 %v963_v34  ;;  %490 = vmatpush1.bf16.msra.mxu1 %v964_v35 }
  0x24   :  { %448 = vmatprep.subr.bf16.mxu0 %v965_v36  ;;  %491 = vmatprep.subr.bf16.mxu1 %v967_v37 }
  0x27   :  { %449 = vmatpush1.bf16.msra.mxu0 %v969_v38  ;;  %492 = vmatpush1.bf16.msra.mxu1 %v970_v39 }
  0x28   :  { %450 = vmatprep.subr.bf16.mxu0 %v971_v40  ;;  %493 = vmatprep.subr.bf16.mxu1 %v973_v41 }
  0x2b   :  { %451 = vmatpush1.bf16.msra.mxu0 %v975_v42  ;;  %494 = vmatpush1.bf16.msra.mxu1 %v976_v43 }
  0x2c   :  { %452 = vmatprep.subr.bf16.mxu0 %v977_v44  ;;  %495 = vmatprep.subr.bf16.mxu1 %v979_v45 }
  0x2f   :  { %453 = vmatpush1.bf16.msra.mxu0 %v981_v47  ;;  %496 = vmatpush1.bf16.msra.mxu1 %v982_v48 }
  0x30   :  { %454 = vmatprep.subr.bf16.mxu0 %v983_v49  ;;  %497 = vmatprep.subr.bf16.mxu1 %v985_v50 }
  0x33   :  { %455 = vmatpush1.bf16.msra.mxu0 %v987_v51  ;;  %498 = vmatpush1.bf16.msra.mxu1 %v988_v52 }
  0x34   :  { %456 = vmatprep.subr.bf16.mxu0 %v989_v53  ;;  %499 = vmatprep.subr.bf16.mxu1 %v991_v54 }
  0x37   :  { %457 = vmatpush1.bf16.msra.mxu0 %v993_v55  ;;  %500 = vmatpush1.bf16.msra.mxu1 %v994_v56 }
  0x38   :  { %458 = vmatprep.subr.bf16.mxu0 %v995_v57  ;;  %501 = vmatprep.subr.bf16.mxu1 %v997_v58 }
  0x3b   :  { %459 = vmatpush1.bf16.msra.mxu0 %v999_v59  ;;  %502 = vmatpush1.bf16.msra.mxu1 %v1000_v60 }
  0x3c   :  { %460 = vmatprep.subr.bf16.mxu0 %v1001_v61  ;;  %503 = vmatprep.subr.bf16.mxu1 %v1003_v62 }
  0x3f   :  { %461 = vmatpush1.bf16.msra.mxu0 %v1005_v63  ;;  %504 = vmatpush1.bf16.msra.mxu1 %v1006_v0 }
  0x42   :  { %463 = vmatmul.mubr.bf16.vlgmr.msra.gmra.mrb[0].mxu0 %v1007_v1  ;;  %506 = vmatmul.mubr.bf16.vlgmr.msra.gmra.mrb[0].mxu1 %v1007_v1 }
 0x115   :  { %v464_v13 = vpop.f32.mrb[0].mxu0  ;;  %v507_v14 = vpop.f32.mrb[0].mxu1 }
 0x116   :  { %v1263_v15 = vadd.f32 %v548_v9, %v464_v13  ;;  %v1265_v16 = vadd.f32 %v556_v10, %v507_v14  ;;  %v466_v17 = vpop.f32.mrb[1].mxu0  ;;  %v509_v18 = vpop.f32.mrb[1].mxu1 }
 0x117   :  { %v1267_v19 = vadd.f32 %v552_v11, %v466_v17  ;;  %v1269_v20 = vadd.f32 %v560_v12, %v509_v18  ;;  %v468_v21 = vpop.f32.mrb[2].mxu0  ;;  %v511_v22 = vpop.f32.mrb[2].mxu1 }
 0x118   :  { %v1272_v23 = vmul.f32 0.70710677, %v1263_v15  ;;  %v1275_v24 = vmul.f32 0.70710677, %v1265_v16  ;;  %v470_v37 = vpop.f32.mrb[3].mxu0  ;;  %v513_v38 = vpop.f32.mrb[3].mxu1  ;;  %v1287_v40 = vadd.f32 %v548_v9, %v468_v21  ;;  %v1289_v41 = vadd.f32 %v556_v10, %v511_v22 }
 0x119   :  { %v1278_v25 = vmul.f32 0.70710677, %v1267_v19  ;;  %v1281_v26 = vmul.f32 0.70710677, %v1269_v20  ;;  %v1294_v45 = vadd.f32 %v552_v11, %v470_v37  ;;  %v1300_v49 = vadd.f32 %v560_v12, %v513_v38 }
 0x11a   :  { %v589_v27 = vand.u32 2147483647, %v1272_v23  ;;  %v591_v28 = vand.u32 2147483647, %v1275_v24  ;;  %v1292_v44 = vmul.f32 0.70710677, %v1287_v40 }
 0x11b   :  { %v590_v29 = vand.u32 2147483647, %v1278_v25  ;;  %v592_v30 = vand.u32 2147483647, %v1281_v26  ;;  %v1297_v47 = vmul.f32 0.70710677, %v1289_v41 }
 0x11c   :  { %v597_v31 = vmul.f32 0.3275911, %v589_v27  ;;  %v599_v32 = vmul.f32 0.3275911, %v591_v28  ;;  %v701_v42 = vsub.f32 0.0, %v589_v27  ;;  %v703_v46 = vsub.f32 0.0, %v591_v28 }
 0x11d   :  { %v598_v33 = vmul.f32 0.3275911, %v590_v29  ;;  %v600_v36 = vmul.f32 0.3275911, %v592_v30  ;;  %v593_v48 = vand.u32 2147483647, %v1292_v44 }
 0x11e   :  { %v605_v34 = vadd.f32 1.0, %v597_v31  ;;  %v607_v35 = vadd.f32 1.0, %v599_v32  ;;  %v702_v50 = vsub.f32 0.0, %v590_v29  ;;  %v704_v51 = vsub.f32 0.0, %v592_v30 }
 0x11f   :  { %v606_v39 = vadd.f32 1.0, %v598_v33  ;;  %v608_v43 = vadd.f32 1.0, %v600_v36  ;;  %v595_v52 = vand.u32 2147483647, %v1297_v47  ;;  %v1304_v53 = vmul.f32 0.70710677, %v1294_v45 }
 0x120   :  { %1010 = vrcp.f32 %v605_v34  ;;  %v709_v54 = vmul.f32 %v701_v42, %v589_v27  ;;  %v601_v55 = vmul.f32 0.3275911, %v593_v48  ;;  %v711_v56 = vmul.f32 %v703_v46, %v591_v28 }
 0x121   :  { %1012 = vrcp.f32 %v607_v35  ;;  %v603_v57 = vmul.f32 0.3275911, %v595_v52  ;;  %v594_v58 = vand.u32 2147483647, %v1304_v53  ;;  %v705_v60 = vsub.f32 0.0, %v593_v48 }
 0x122   :  { %1014 = vrcp.f32 %v606_v39  ;;  %v609_v59 = vadd.f32 1.0, %v601_v55  ;;  %v1308_v61 = vmul.f32 0.70710677, %v1300_v49  ;;  %v710_v62 = vmul.f32 %v702_v50, %v590_v29 }
 0x123   :  { %1016 = vrcp.f32 %v608_v43  ;;  %v712_v63 = vmul.f32 %v704_v51, %v592_v30  ;;  %v611_v0 = vadd.f32 1.0, %v603_v57  ;;  %v602_v1 = vmul.f32 0.3275911, %v594_v58 }
 0x124   :  { %v717_v3 = vmul.f32 1.442695, %v709_v54  ;;  %1018 = vrcp.f32 %v609_v59  ;;  %v707_v4 = vsub.f32 0.0, %v595_v52  ;;  %v596_v5 = vand.u32 2147483647, %v1308_v61 }
 0x125   :  { %v721_v8 = vmul.f32 1.442695, %v711_v56  ;;  %1020 = vrcp.f32 %v611_v0  ;;  %v610_v9 = vadd.f32 1.0, %v602_v1  ;;  %v713_v11 = vmul.f32 %v705_v60, %v593_v48 }
 0x126   :  { %v706_v12 = vsub.f32 0.0, %v594_v58  ;;  %v604_v13 = vmul.f32 0.3275911, %v596_v5  ;;  %v1318_v14 = vmul.f32 0.5, %v1263_v15  ;;  %v719_v18 = vmul.f32 1.442695, %v710_v62 }
 0x127   :  { %v715_v27 = vmul.f32 %v707_v4, %v595_v52  ;;  %1022 = vrcp.f32 %v610_v9  ;;  %v723_v31 = vmul.f32 1.442695, %v712_v63  ;;  %v725_v15 = vmul.f32 1.442695, %v713_v11 }
 0x128   :  { %v612_v28 = vadd.f32 1.0, %v604_v13  ;;  %1024 = vpow2.f32 %v717_v3  ;;  %v714_v34 = vmul.f32 %v706_v12, %v594_v58  ;;  %v708_v42 = vsub.f32 0.0, %v596_v5 }
 0x129   :  { %1026 = vpow2.f32 %v721_v8  ;;  %v729_v39 = vmul.f32 1.442695, %v715_v27  ;;  %v1333_v51 = vmul.f32 0.5, %v1265_v16  ;;  %v1347_v8 = vmul.f32 0.5, %v1267_v19 }
 0x12a   :  { %v1310_v2 = vpop.eup %1010  ;;  %1028 = vrcp.f32 %v612_v28  ;;  %v727_v54 = vmul.f32 1.442695, %v714_v34  ;;  %v716_v63 = vmul.f32 %v708_v42, %v596_v5  ;;  %vm749_vm0 = vcmp.ge.f32.partialorder %v1272_v23, 0.0 }
 0x12b   :  { %v1313_v6 = vpop.eup %1012  ;;  %v629_v7 = vmul.f32 1.0614054, %v1310_v2  ;;  %1030 = vpow2.f32 %v719_v18  ;;  %vm751_vm1 = vcmp.ge.f32.partialorder %v1275_v24, 0.0  ;;  %vm750_vm2 = vcmp.ge.f32.partialorder %v1278_v25, 0.0 }
 0x12c   :  { %v631_v10 = vmul.f32 1.0614054, %v1313_v6  ;;  %v1320_v21 = vpop.eup %1014  ;;  %1032 = vpow2.f32 %v723_v31  ;;  %v731_v28 = vmul.f32 1.442695, %v716_v63  ;;  %vm752_vm3 = vcmp.ge.f32.partialorder %v1281_v26, 0.0 }
 0x12d   :  { %v887_v17 = vadd.f32 -1.4531521, %v629_v7  ;;  %v630_v30 = vmul.f32 1.0614054, %v1320_v21  ;;  %v1324_v32 = vpop.eup %1016  ;;  %1034 = vpow2.f32 %v725_v15  ;;  %vm753_vm4 = vcmp.ge.f32.partialorder %v1292_v44, 0.0 }
 0x12e   :  { %v889_v22 = vadd.f32 -1.4531521, %v631_v10  ;;  %v632_v37 = vmul.f32 1.0614054, %v1324_v32  ;;  %v1330_v50 = vpop.eup %1018  ;;  %1036 = vpow2.f32 %v729_v39  ;;  %vm755_vm5 = vcmp.ge.f32.partialorder %v1297_v47, 0.0 }
 0x12f   :  { %v645_v29 = vmul.f32 %v1310_v2, %v887_v17  ;;  %v888_v36 = vadd.f32 -1.4531521, %v630_v30  ;;  %v1336_v55 = vpop.eup %1020  ;;  %v633_v59 = vmul.f32 1.0614054, %v1330_v50  ;;  %1038 = vpow2.f32 %v727_v54 }
 0x130   :  { %v647_v33 = vmul.f32 %v1313_v6, %v889_v22  ;;  %v890_v48 = vadd.f32 -1.4531521, %v632_v37  ;;  %v635_v62 = vmul.f32 1.0614054, %v1336_v55  ;;  %1040 = vpow2.f32 %v731_v28 }
 0x131   :  { %v653_v35 = vadd.f32 1.4214138, %v645_v29  ;;  %v646_v46 = vmul.f32 %v1320_v21, %v888_v36  ;;  %v891_v3 = vadd.f32 -1.4531521, %v633_v59  ;;  %v1343_v4 = vpop.eup %1022  ;;  %vm754_vm6 = vcmp.ge.f32.partialorder %v1304_v53, 0.0 }
 0x132   :  { %v655_v38 = vadd.f32 1.4214138, %v647_v33  ;;  %v648_v58 = vmul.f32 %v1324_v32, %v890_v48  ;;  %v893_v9 = vadd.f32 -1.4531521, %v635_v62  ;;  %v1025_v10 = vpop.eup %1024  ;;  %v634_v27 = vmul.f32 1.0614054, %v1343_v4 }
 0x133   :  { %v661_v43 = vmul.f32 %v1310_v2, %v653_v35  ;;  %v654_v57 = vadd.f32 1.4214138, %v646_v46  ;;  %v649_v13 = vmul.f32 %v1330_v50, %v891_v3  ;;  %v1027_v17 = vpop.eup %1026  ;;  %vm756_vm7 = vcmp.ge.f32.partialorder %v1308_v61, 0.0 }
 0x134   :  { %v663_v52 = vmul.f32 %v1313_v6, %v655_v38  ;;  %v656_v1 = vadd.f32 1.4214138, %v648_v58  ;;  %v651_v22 = vmul.f32 %v1336_v55, %v893_v9  ;;  %v1354_v19 = vpop.eup %1028  ;;  %v892_v36 = vadd.f32 -1.4531521, %v634_v27 }
 0x135   :  { %v895_v56 = vadd.f32 -0.28449672, %v661_v43  ;;  %v662_v0 = vmul.f32 %v1320_v21, %v654_v57  ;;  %v657_v33 = vadd.f32 1.4214138, %v649_v13  ;;  %v1031_v15 = vpop.eup %1030  ;;  %v636_v37 = vmul.f32 1.0614054, %v1354_v19 }
 0x136   :  { %v897_v60 = vadd.f32 -0.28449672, %v663_v52  ;;  %v664_v5 = vmul.f32 %v1324_v32, %v656_v1  ;;  %v659_v35 = vadd.f32 1.4214138, %v651_v22  ;;  %v1033_v38 = vpop.eup %1032  ;;  %v650_v54 = vmul.f32 %v1343_v4, %v892_v36 }
 0x137   :  { %v677_v16 = vmul.f32 %v1310_v2, %v895_v56  ;;  %v896_v12 = vadd.f32 -0.28449672, %v662_v0  ;;  %v1035_v46 = vpop.eup %1034 }
 0x138   :  { %v679_v7 = vmul.f32 %v1313_v6, %v897_v60  ;;  %v898_v31 = vadd.f32 -0.28449672, %v664_v5  ;;  %v667_v52 = vmul.f32 %v1336_v55, %v659_v35  ;;  %v1037_v60 = vpop.eup %1036 }
 0x139   :  { %v685_v11 = vadd.f32 0.2548296, %v677_v16  ;;  %v678_v30 = vmul.f32 %v1320_v21, %v896_v12  ;;  %v658_v16 = vadd.f32 1.4214138, %v650_v54 }
 0x13a   :  { %v687_v18 = vadd.f32 0.2548296, %v679_v7  ;;  %v680_v43 = vmul.f32 %v1324_v32, %v898_v31  ;;  %v901_v63 = vadd.f32 -0.28449672, %v667_v52 }
 0x13b   :  { %v693_v29 = vmul.f32 %v1310_v2, %v685_v11  ;;  %v686_v42 = vadd.f32 0.2548296, %v678_v30  ;;  %v665_v2 = vmul.f32 %v1330_v50, %v657_v33  ;;  %v666_v12 = vmul.f32 %v1343_v4, %v658_v16 }
 0x13c   :  { %v695_v34 = vmul.f32 %v1313_v6, %v687_v18  ;;  %v894_v6 = vadd.f32 -1.4531521, %v636_v37  ;;  %v688_v58 = vadd.f32 0.2548296, %v680_v43  ;;  %v577_v16 = vmul.f32 0.5, %v1287_v40 }
 0x13d   :  { %v733_v39 = vmul.f32 %v1025_v10, %v693_v29  ;;  %v694_v57 = vmul.f32 %v1320_v21, %v686_v42  ;;  %v899_v59 = vadd.f32 -0.28449672, %v665_v2  ;;  %v1039_v10 = vpop.eup %1038  ;;  %v683_v21 = vmul.f32 %v1336_v55, %v901_v63 }
 0x13e   :  { %v735_v48 = vmul.f32 %v1027_v17, %v695_v34  ;;  %v652_v0 = vmul.f32 %v1354_v19, %v894_v6  ;;  %v696_v7 = vmul.f32 %v1324_v32, %v688_v58  ;;  %v900_v30 = vadd.f32 -0.28449672, %v666_v12  ;;  %v1041_v63 = vpop.eup %1040 }
 0x13f   :  { %v741_v56 = vsub.f32 1.0, %v733_v39  ;;  %v734_v3 = vmul.f32 %v1031_v15, %v694_v57  ;;  %v681_v9 = vmul.f32 %v1330_v50, %v899_v59  ;;  %v691_v32 = vadd.f32 0.2548296, %v683_v21 }
 0x140   :  { %v743_v62 = vsub.f32 1.0, %v735_v48  ;;  %v660_v5 = vadd.f32 1.4214138, %v652_v0  ;;  %v736_v18 = vmul.f32 %v1033_v38, %v696_v7  ;;  %v682_v36 = vmul.f32 %v1343_v4, %v900_v30 }
 0x141   :  { %v757_v1 = vsub.f32 0.0, %v741_v56  ;;  %v742_v17 = vsub.f32 1.0, %v734_v3  ;;  %v689_v22 = vadd.f32 0.2548296, %v681_v9  ;;  %v699_v35 = vmul.f32 %v1336_v55, %v691_v32 }
 0x142   :  { %v759_v11 = vsub.f32 0.0, %v743_v62  ;;  %v744_v15 = vsub.f32 1.0, %v736_v18  ;;  %v668_v23 = vmul.f32 %v1354_v19, %v660_v5  ;;  %v690_v2 = vadd.f32 0.2548296, %v682_v36 }
 0x143   :  { %v765_v13 = vsel %vm749_vm0, %v741_v56, %v757_v1  ;;  %v758_v33 = vsub.f32 0.0, %v742_v17  ;;  %v697_v34 = vmul.f32 %v1330_v50, %v689_v22  ;;  %v739_v43 = vmul.f32 %v1037_v60, %v699_v35 }
 0x144   :  { %v773_v27 = vadd.f32 1.0, %v765_v13  ;;  %v767_v29 = vsel %vm751_vm1, %v743_v62, %v759_v11  ;;  %v760_v38 = vsub.f32 0.0, %v744_v15  ;;  %v902_v48 = vadd.f32 -0.28449672, %v668_v23 }
 0x145   :  { %v775_v31 = vadd.f32 1.0, %v767_v29  ;;  %v766_v24 = vsel %vm750_vm2, %v742_v17, %v758_v33  ;;  %v737_v39 = vmul.f32 %v1035_v46, %v697_v34  ;;  %v576_v55 = vmul.f32 0.5, %v1269_v20 }
 0x146   :  { %v781_v37 = vmul.f32 %v773_v27, %v1318_v14  ;;  %v774_v42 = vadd.f32 1.0, %v766_v24  ;;  %v768_v52 = vsel %vm752_vm3, %v744_v15, %v760_v38  ;;  %v747_v6 = vsub.f32 1.0, %v739_v43 }
 0x147   :  { %v783_v50 = vmul.f32 %v775_v31, %v1333_v51  ;;  %v745_v54 = vsub.f32 1.0, %v737_v39  ;;  %v776_v14 = vadd.f32 1.0, %v768_v52  ;;  %v698_v25 = vmul.f32 %v1343_v4, %v690_v2 }
 0x148   :  { %v782_v28 = vmul.f32 %v774_v42, %v1347_v8  ;;  %v684_v46 = vmul.f32 %v1354_v19, %v902_v48  ;;  %v763_v20 = vsub.f32 0.0, %v747_v6  ;;  %v578_v9 = vmul.f32 0.5, %v1294_v45 }
 0x149   :  { %v761_v56 = vsub.f32 0.0, %v745_v54  ;;  %v784_v58 = vmul.f32 %v776_v14, %v576_v55  ;;  %v738_v51 = vmul.f32 %v1039_v10, %v698_v25  ;;  %v579_v5 = vmul.f32 0.5, %v1289_v41 }
 0x14a   :  { %v907_v57 = vpack.c.bf16 %v782_v28, %v781_v37  ;;  %v692_v60 = vadd.f32 0.2548296, %v684_v46  ;;  %v771_v0 = vsel %vm755_vm5, %v747_v6, %v763_v20  ;;  %v580_v17 = vmul.f32 0.5, %v1300_v49 }
 0x14b   :  { %v769_v59 = vsel %vm753_vm4, %v745_v54, %v761_v56  ;;  %v908_v26 = vpack.c.bf16 %v784_v58, %v783_v50  ;;  %v746_v8 = vsub.f32 1.0, %v738_v51  ;;  %v779_v11 = vadd.f32 1.0, %v771_v0 }
 0x14c   :  { %813 = vst [vmem:[%s1415_s3] sm:$0xff] %v907_v57  ;;  %v777_v62 = vadd.f32 1.0, %v769_v59  ;;  %v700_v4 = vmul.f32 %v1354_v19, %v692_v60 }
 0x14d   :  { %814 = vst [vmem:[%s1415_s3 + $0x8] sm:$0xff] %v908_v26  ;;  %v762_v44 = vsub.f32 0.0, %v746_v8  ;;  %v787_v40 = vmul.f32 %v779_v11, %v579_v5 }
 0x14e   :  { %v740_v1 = vmul.f32 %v1041_v63, %v700_v4  ;;  %v785_v7 = vmul.f32 %v777_v62, %v577_v16 }
 0x14f   :  { %v770_v3 = vsel %vm754_vm6, %v746_v8, %v762_v44 }
 0x150   :  { %v778_v10 = vadd.f32 1.0, %v770_v3  ;;  %v748_v19 = vsub.f32 1.0, %v740_v1 }
 0x152   :  { %v786_v21 = vmul.f32 %v778_v10, %v578_v9  ;;  %v764_v12 = vsub.f32 0.0, %v748_v19 }
 0x154   :  { %v909_v47 = vpack.c.bf16 %v786_v21, %v785_v7  ;;  %v772_v13 = vsel %vm756_vm7, %v748_v19, %v764_v12 }
 0x155   :  { %v780_v53 = vadd.f32 1.0, %v772_v13 }
 0x156   :  { %815 = vst [vmem:[%s1415_s3 + $0x10] sm:$0xff] %v909_v47 }
 0x157   :  { %v788_v45 = vmul.f32 %v780_v53, %v580_v17 }
 0x159   :  { %v910_v18 = vpack.c.bf16 %v788_v45, %v787_v40 }
 0x15b   :  { %816 = vst [vmem:[%s1415_s3 + $0x18] sm:$0xff] %v910_v18 }

// kernel: instruction_bert_encoder_forward.17
= control target key start
LH: loop header
LB: loop body
LE: loop exit
PB: predicated region body
PF: predicated region fallthrough
CT: control target
= control target key end

     0   :  { %s1105_s1 = inlined_call_operand.vmem [shape: bf16[512,256], index: 1, kind: input, shape index: {}]   ;;  %s1106_s0 = inlined_call_operand.vmem [shape: bf16[16,512], index: 0, kind: input, shape index: {}]   ;;  %s1107_s2 = inlined_call_operand.vmem [shape: f32[1,256], index: 2, kind: input, shape index: {}]   ;;  %s1108_s3 = inlined_call_operand.vmem [shape: bf16[16,256], index: 3, kind: input, shape index: {}]   ;;  %s1109_s4 = inlined_call_operand.vmem [shape: f32[1,256], index: 4, kind: input, shape index: {}]   ;;  %s1110_s5 = inlined_call_operand.vmem [shape: f32[1,256], index: 5, kind: input, shape index: {}]   ;;  %s1111_s6 = inlined_call_operand.vmem [shape: bf16[16,256], index: 6, kind: output, shape index: {}]  }
   0x1   :  { %v729_v0 = vld [vmem:[%s1105_s1 + $0x4] ss:$8 sps:$4 sm:$0xff]   ;;  %v733_v2 = vld [vmem:[%s1105_s1] ss:$8 sps:$4 sm:$0xff]   ;;  %v735_v4 = vld [vmem:[%s1105_s1 + $0x14] ss:$8 sps:$4 sm:$0xff]  }
   0x2   :  { %v731_v1 = vld [vmem:[%s1105_s1 + $0x104] ss:$8 sps:$4 sm:$0xff]   ;;  %443 = vmatprep.subr.bf16.mxu1 %v729_v0  ;;  %v734_v3 = vld [vmem:[%s1105_s1 + $0x100] ss:$8 sps:$4 sm:$0xff]   ;;  %v737_v5 = vld [vmem:[%s1105_s1 + $0x114] ss:$8 sps:$4 sm:$0xff]  }
   0x3   :  { %486 = vmatprep.subr.bf16.mxu0 %v731_v1  ;;  %444 = vmatpush1.bf16.msra.mxu1 %v733_v2  ;;  %v739_v6 = vld [vmem:[%s1105_s1 + $0x10] ss:$8 sps:$4 sm:$0xff]   ;;  %v741_v8 = vld [vmem:[%s1105_s1 + $0x24] ss:$8 sps:$4 sm:$0xff]   ;;  %v745_v10 = vld [vmem:[%s1105_s1 + $0x20] ss:$8 sps:$4 sm:$0xff]  }
   0x4   :  { %487 = vmatpush1.bf16.msra.mxu0 %v734_v3  ;;  %445 = vmatprep.subr.bf16.mxu1 %v735_v4  ;;  %v740_v7 = vld [vmem:[%s1105_s1 + $0x110] ss:$8 sps:$4 sm:$0xff]   ;;  %v743_v9 = vld [vmem:[%s1105_s1 + $0x124] ss:$8 sps:$4 sm:$0xff]   ;;  %v746_v11 = vld [vmem:[%s1105_s1 + $0x120] ss:$8 sps:$4 sm:$0xff]   ;;  %v546_v4 = vlaneseq }
   0x5   :  { %488 = vmatprep.subr.bf16.mxu0 %v737_v5  ;;  %v747_v12 = vld [vmem:[%s1105_s1 + $0x34] ss:$8 sps:$4 sm:$0xff]   ;;  %v751_v14 = vld [vmem:[%s1105_s1 + $0x30] ss:$8 sps:$4 sm:$0xff]   ;;  %v753_v16 = vld [vmem:[%s1105_s1 + $0x44] ss:$8 sps:$4 sm:$0xff]  }
   0x6   :  { %v749_v13 = vld [vmem:[%s1105_s1 + $0x134] ss:$8 sps:$4 sm:$0xff]   ;;  %v752_v15 = vld [vmem:[%s1105_s1 + $0x130] ss:$8 sps:$4 sm:$0xff]   ;;  %v755_v17 = vld [vmem:[%s1105_s1 + $0x144] ss:$8 sps:$4 sm:$0xff]  }
   0x7   :  { %446 = vmatpush1.bf16.msra.mxu1 %v739_v6  ;;  %v757_v18 = vld [vmem:[%s1105_s1 + $0x40] ss:$8 sps:$4 sm:$0xff]   ;;  %v759_v20 = vld [vmem:[%s1105_s1 + $0x54] ss:$8 sps:$4 sm:$0xff]   ;;  %v763_v22 = vld [vmem:[%s1105_s1 + $0x50] ss:$8 sps:$4 sm:$0xff]  }
   0x8   :  { %489 = vmatpush1.bf16.msra.mxu0 %v740_v7  ;;  %447 = vmatprep.subr.bf16.mxu1 %v741_v8  ;;  %v758_v19 = vld [vmem:[%s1105_s1 + $0x140] ss:$8 sps:$4 sm:$0xff]   ;;  %v761_v21 = vld [vmem:[%s1105_s1 + $0x154] ss:$8 sps:$4 sm:$0xff]   ;;  %v764_v23 = vld [vmem:[%s1105_s1 + $0x150] ss:$8 sps:$4 sm:$0xff]  }
   0x9   :  { %490 = vmatprep.subr.bf16.mxu0 %v743_v9  ;;  %v765_v24 = vld [vmem:[%s1105_s1 + $0x64] ss:$8 sps:$4 sm:$0xff]   ;;  %v769_v26 = vld [vmem:[%s1105_s1 + $0x60] ss:$8 sps:$4 sm:$0xff]   ;;  %v771_v28 = vld [vmem:[%s1105_s1 + $0x74] ss:$8 sps:$4 sm:$0xff]  }
   0xa   :  { %v767_v25 = vld [vmem:[%s1105_s1 + $0x164] ss:$8 sps:$4 sm:$0xff]   ;;  %v770_v27 = vld [vmem:[%s1105_s1 + $0x160] ss:$8 sps:$4 sm:$0xff]   ;;  %v773_v29 = vld [vmem:[%s1105_s1 + $0x174] ss:$8 sps:$4 sm:$0xff]  }
   0xb   :  { %448 = vmatpush1.bf16.msra.mxu1 %v745_v10  ;;  %v775_v30 = vld [vmem:[%s1105_s1 + $0x70] ss:$8 sps:$4 sm:$0xff]   ;;  %v777_v32 = vld [vmem:[%s1105_s1 + $0x84] ss:$8 sps:$4 sm:$0xff]   ;;  %v781_v34 = vld [vmem:[%s1105_s1 + $0x80] ss:$8 sps:$4 sm:$0xff]  }
   0xc   :  { %491 = vmatpush1.bf16.msra.mxu0 %v746_v11  ;;  %449 = vmatprep.subr.bf16.mxu1 %v747_v12  ;;  %v776_v31 = vld [vmem:[%s1105_s1 + $0x170] ss:$8 sps:$4 sm:$0xff]   ;;  %v779_v33 = vld [vmem:[%s1105_s1 + $0x184] ss:$8 sps:$4 sm:$0xff]   ;;  %v782_v35 = vld [vmem:[%s1105_s1 + $0x180] ss:$8 sps:$4 sm:$0xff]  }
   0xd   :  { %492 = vmatprep.subr.bf16.mxu0 %v749_v13  ;;  %v783_v36 = vld [vmem:[%s1105_s1 + $0x94] ss:$8 sps:$4 sm:$0xff]   ;;  %v787_v38 = vld [vmem:[%s1105_s1 + $0x90] ss:$8 sps:$4 sm:$0xff]   ;;  %v789_v40 = vld [vmem:[%s1105_s1 + $0xa4] ss:$8 sps:$4 sm:$0xff]  }
   0xe   :  { %v785_v37 = vld [vmem:[%s1105_s1 + $0x194] ss:$8 sps:$4 sm:$0xff]   ;;  %v788_v39 = vld [vmem:[%s1105_s1 + $0x190] ss:$8 sps:$4 sm:$0xff]   ;;  %v791_v41 = vld [vmem:[%s1105_s1 + $0x1a4] ss:$8 sps:$4 sm:$0xff]  }
   0xf   :  { %450 = vmatpush1.bf16.msra.mxu1 %v751_v14  ;;  %v793_v42 = vld [vmem:[%s1105_s1 + $0xa0] ss:$8 sps:$4 sm:$0xff]   ;;  %v795_v44 = vld [vmem:[%s1105_s1 + $0xb4] ss:$8 sps:$4 sm:$0xff]   ;;  %v799_v46 = vld [vmem:[%s1105_s1 + $0xb0] ss:$8 sps:$4 sm:$0xff]  }
  0x10   :  { %493 = vmatpush1.bf16.msra.mxu0 %v752_v15  ;;  %451 = vmatprep.subr.bf16.mxu1 %v753_v16  ;;  %v794_v43 = vld [vmem:[%s1105_s1 + $0x1a0] ss:$8 sps:$4 sm:$0xff]   ;;  %v797_v45 = vld [vmem:[%s1105_s1 + $0x1b4] ss:$8 sps:$4 sm:$0xff]   ;;  %v800_v48 = vld [vmem:[%s1105_s1 + $0x1b0] ss:$8 sps:$4 sm:$0xff]  }
  0x11   :  { %494 = vmatprep.subr.bf16.mxu0 %v755_v17  ;;  %v827_v47 = vld [vmem:[%s1106_s0 + $0x4] ss:$16 sps:$4 sm:$0xff]   ;;  %v830_v51 = vld [vmem:[%s1106_s0 + $0xc] ss:$16 sps:$4 sm:$0xff]   ;;  %v805_v52 = vld [vmem:[%s1105_s1 + $0xc0] ss:$8 sps:$4 sm:$0xff]  }
  0x12   :  { %v801_v49 = vld [vmem:[%s1105_s1 + $0xc4] ss:$8 sps:$4 sm:$0xff]   ;;  %475 = vmatprep.mubr.bf16.mxu1 %v827_v47  ;;  %518 = vmatprep.mubr.bf16.mxu0 %v830_v51  ;;  %v806_v53 = vld [vmem:[%s1105_s1 + $0x1c0] ss:$8 sps:$4 sm:$0xff]   ;;  %v807_v54 = vld [vmem:[%s1105_s1 + $0xd4] ss:$8 sps:$4 sm:$0xff]  }
  0x13   :  { %452 = vmatpush1.bf16.msra.mxu1 %v757_v18  ;;  %v803_v50 = vld [vmem:[%s1105_s1 + $0x1c4] ss:$8 sps:$4 sm:$0xff]   ;;  %v809_v55 = vld [vmem:[%s1105_s1 + $0x1d4] ss:$8 sps:$4 sm:$0xff]   ;;  %v811_v56 = vld [vmem:[%s1105_s1 + $0xd0] ss:$8 sps:$4 sm:$0xff]  }
  0x14   :  { %495 = vmatpush1.bf16.msra.mxu0 %v758_v19  ;;  %453 = vmatprep.subr.bf16.mxu1 %v759_v20  ;;  %v812_v57 = vld [vmem:[%s1105_s1 + $0x1d0] ss:$8 sps:$4 sm:$0xff]   ;;  %v813_v58 = vld [vmem:[%s1105_s1 + $0xe4] ss:$8 sps:$4 sm:$0xff]   ;;  %v817_v60 = vld [vmem:[%s1105_s1 + $0xe0] ss:$8 sps:$4 sm:$0xff]  }
  0x15   :  { %496 = vmatprep.subr.bf16.mxu0 %v761_v21  ;;  %v815_v59 = vld [vmem:[%s1105_s1 + $0x1e4] ss:$8 sps:$4 sm:$0xff]   ;;  %v818_v61 = vld [vmem:[%s1105_s1 + $0x1e0] ss:$8 sps:$4 sm:$0xff]   ;;  %v819_v62 = vld [vmem:[%s1105_s1 + $0xf4] ss:$8 sps:$4 sm:$0xff]  }
  0x16   :  { %v821_v63 = vld [vmem:[%s1105_s1 + $0x1f4] ss:$8 sps:$4 sm:$0xff]   ;;  %v823_v0 = vld [vmem:[%s1105_s1 + $0xf0] ss:$8 sps:$4 sm:$0xff]   ;;  %v547_v5 = vshrl.u32 %v546_v4, 7  ;;  %v560_v9 = vld [vmem:[%s1108_s3] sm:$0xff] }
  0x17   :  { %454 = vmatpush1.bf16.msra.mxu1 %v763_v22  ;;  %v824_v1 = vld [vmem:[%s1105_s1 + $0x1f0] ss:$8 sps:$4 sm:$0xff]   ;;  %v544_v7 = vld [vmem:[%s1107_s2] sm:$0x3]  ;;  %v562_v17 = vunpack.c.l.bf16 %v560_v9  ;;  %v561_v18 = vld [vmem:[%s1108_s3 + $0x8] sm:$0xff]  ;;  %v563_v22 = vunpack.c.h.bf16 %v560_v9 }
  0x18   :  { %497 = vmatpush1.bf16.msra.mxu0 %v764_v23  ;;  %455 = vmatprep.subr.bf16.mxu1 %v765_v24  ;;  %v825_v2 = vld [vmem:[%s1106_s0] ss:$16 sps:$4 sm:$0xff]   ;;  %v828_v3 = vld [vmem:[%s1106_s0 + $0x8] ss:$16 sps:$4 sm:$0xff]   ;;  %v1074_v6 = vsub.s32 0, %v547_v5  ;;  %v1079_v8 = vsub.s32 1, %v547_v5 }
  0x19   :  { %498 = vmatprep.subr.bf16.mxu0 %v767_v25 }
  0x1a   :  { %v549_v10 = vrot.slane %v544_v7, %v1074_v6  ;;  %v553_v13 = vrot.slane %v544_v7, %v1079_v8 }
  0x1b   :  { %456 = vmatpush1.bf16.msra.mxu1 %v769_v26 }
  0x1c   :  { %499 = vmatpush1.bf16.msra.mxu0 %v770_v27  ;;  %457 = vmatprep.subr.bf16.mxu1 %v771_v28 }
  0x1d   :  { %500 = vmatprep.subr.bf16.mxu0 %v773_v29  ;;  %v564_v29 = vunpack.c.l.bf16 %v561_v18 }
  0x1f   :  { %458 = vmatpush1.bf16.msra.mxu1 %v775_v30  ;;  %v565_v30 = vunpack.c.h.bf16 %v561_v18 }
  0x20   :  { %501 = vmatpush1.bf16.msra.mxu0 %v776_v31  ;;  %459 = vmatprep.subr.bf16.mxu1 %v777_v32 }
  0x21   :  { %502 = vmatprep.subr.bf16.mxu0 %v779_v33 }
  0x23   :  { %460 = vmatpush1.bf16.msra.mxu1 %v781_v34 }
  0x24   :  { %503 = vmatpush1.bf16.msra.mxu0 %v782_v35  ;;  %461 = vmatprep.subr.bf16.mxu1 %v783_v36 }
  0x25   :  { %504 = vmatprep.subr.bf16.mxu0 %v785_v37 }
  0x27   :  { %462 = vmatpush1.bf16.msra.mxu1 %v787_v38 }
  0x28   :  { %505 = vmatpush1.bf16.msra.mxu0 %v788_v39  ;;  %463 = vmatprep.subr.bf16.mxu1 %v789_v40 }
  0x29   :  { %506 = vmatprep.subr.bf16.mxu0 %v791_v41 }
  0x2b   :  { %464 = vmatpush1.bf16.msra.mxu1 %v793_v42 }
  0x2c   :  { %507 = vmatpush1.bf16.msra.mxu0 %v794_v43  ;;  %465 = vmatprep.subr.bf16.mxu1 %v795_v44 }
  0x2d   :  { %508 = vmatprep.subr.bf16.mxu0 %v797_v45 }
  0x2f   :  { %466 = vmatpush1.bf16.msra.mxu1 %v799_v46 }
  0x30   :  { %509 = vmatpush1.bf16.msra.mxu0 %v800_v48  ;;  %467 = vmatprep.subr.bf16.mxu1 %v801_v49 }
  0x31   :  { %510 = vmatprep.subr.bf16.mxu0 %v803_v50 }
  0x33   :  { %468 = vmatpush1.bf16.msra.mxu1 %v805_v52 }
  0x34   :  { %511 = vmatpush1.bf16.msra.mxu0 %v806_v53  ;;  %469 = vmatprep.subr.bf16.mxu1 %v807_v54 }
  0x35   :  { %512 = vmatprep.subr.bf16.mxu0 %v809_v55 }
  0x37   :  { %470 = vmatpush1.bf16.msra.mxu1 %v811_v56 }
  0x38   :  { %513 = vmatpush1.bf16.msra.mxu0 %v812_v57  ;;  %471 = vmatprep.subr.bf16.mxu1 %v813_v58 }
  0x39   :  { %514 = vmatprep.subr.bf16.mxu0 %v815_v59  ;;  %v603_v59 = vld [vmem:[%s1109_s4] sm:$0x3] }
  0x3b   :  { %472 = vmatpush1.bf16.msra.mxu1 %v817_v60  ;;  %v619_v60 = vld [vmem:[%s1110_s5] sm:$0x3] }
  0x3c   :  { %515 = vmatpush1.bf16.msra.mxu0 %v818_v61  ;;  %473 = vmatprep.subr.bf16.mxu1 %v819_v62  ;;  %v608_v61 = vrot.slane %v603_v59, %v1074_v6  ;;  %v612_v62 = vrot.slane %v603_v59, %v1079_v8 }
  0x3d   :  { %516 = vmatprep.subr.bf16.mxu0 %v821_v63 }
  0x3f   :  { %474 = vmatpush1.bf16.msra.mxu1 %v823_v0  ;;  %v624_v0 = vrot.slane %v619_v60, %v1074_v6 }
  0x40   :  { %517 = vmatpush1.bf16.msra.mxu0 %v824_v1  ;;  %v628_v1 = vrot.slane %v619_v60, %v1079_v8 }
  0x42   :  { %476 = vmatmul.mubr.bf16.vlgmr.msra.gmra.mrb[0].mxu1 %v825_v2 }
  0x43   :  { %519 = vmatmul.mubr.bf16.vlgmr.msra.gmra.mrb[0].mxu0 %v828_v3 }
 0x115   :  { %v477_v11 = vpop.f32.mrb[0].mxu1 }
 0x116   :  { %v520_v12 = vpop.f32.mrb[0].mxu0  ;;  %v479_v15 = vpop.f32.mrb[1].mxu1 }
 0x117   :  { %v521_v14 = vadd.f32 %v520_v12, %v477_v11  ;;  %v522_v16 = vpop.f32.mrb[1].mxu0  ;;  %v481_v20 = vpop.f32.mrb[2].mxu1 }
 0x118   :  { %v523_v19 = vadd.f32 %v522_v16, %v479_v15  ;;  %v524_v21 = vpop.f32.mrb[2].mxu0  ;;  %v483_v25 = vpop.f32.mrb[3].mxu1 }
 0x119   :  { %v556_v23 = vadd.f32 %v549_v10, %v521_v14  ;;  %v525_v24 = vadd.f32 %v524_v21, %v481_v20  ;;  %v526_v26 = vpop.f32.mrb[3].mxu0 }
 0x11a   :  { %v557_v27 = vadd.f32 %v553_v13, %v523_v19  ;;  %v527_v28 = vadd.f32 %v526_v26, %v483_v25 }
 0x11b   :  { %v558_v31 = vadd.f32 %v549_v10, %v525_v24  ;;  %v566_v32 = vadd.f32 %v562_v17, %v556_v23 }
 0x11c   :  { %v559_v33 = vadd.f32 %v553_v13, %v527_v28  ;;  %v567_v34 = vadd.f32 %v563_v22, %v557_v27 }
 0x11d   :  { %v568_v36 = vadd.f32 %v564_v29, %v558_v31 }
 0x11e   :  { %v570_v35 = vadd.f32 %v567_v34, %v566_v32  ;;  %v569_v37 = vadd.f32 %v565_v30, %v559_v33 }
 0x120   :  { %571 = vadd.xlane.f32.xlu0 %v570_v35  ;;  %v573_v38 = vadd.f32 %v569_v37, %v568_v36 }
 0x124   :  { %574 = vadd.xlane.f32.xlu0 %v573_v38 }
 0x1ad   :  { %v572_v39 = vpop.xlane.xlu0 %571 }
 0x1ae   :  { %v577_v40 = vmul.f32 0.00390625, %v572_v39 }
 0x1b0   :  { %v579_v41 = vsub.f32 %v566_v32, %v577_v40  ;;  %v580_v42 = vsub.f32 %v567_v34, %v577_v40 }
 0x1b1   :  { %v575_v43 = vpop.xlane.xlu0 %574 }
 0x1b2   :  { %v578_v44 = vmul.f32 0.00390625, %v575_v43  ;;  %v583_v45 = vmul.f32 %v579_v41, %v579_v41  ;;  %v584_v46 = vmul.f32 %v580_v42, %v580_v42 }
 0x1b4   :  { %v581_v47 = vsub.f32 %v568_v36, %v578_v44  ;;  %v582_v48 = vsub.f32 %v569_v37, %v578_v44  ;;  %v587_v49 = vadd.f32 %v584_v46, %v583_v45 }
 0x1b6   :  { %588 = vadd.xlane.f32.xlu1 %v587_v49  ;;  %v585_v50 = vmul.f32 %v581_v47, %v581_v47  ;;  %v586_v51 = vmul.f32 %v582_v48, %v582_v48 }
 0x1b8   :  { %v590_v52 = vadd.f32 %v586_v51, %v585_v50 }
 0x1ba   :  { %591 = vadd.xlane.f32.xlu1 %v590_v52 }
 0x243   :  { %v589_v53 = vpop.xlane.xlu1 %588 }
 0x244   :  { %v593_v54 = vmul.f32 0.00390625, %v589_v53 }
 0x246   :  { %v595_v55 = vadd.f32 1e-12, %v593_v54 }
 0x247   :  { %v592_v56 = vpop.xlane.xlu1 %591 }
 0x248   :  { %831 = vrsqrt.f32 %v595_v55  ;;  %v594_v57 = vmul.f32 0.00390625, %v592_v56 }
 0x24a   :  { %v596_v58 = vadd.f32 1e-12, %v594_v57 }
 0x24c   :  { %833 = vrsqrt.f32 %v596_v58 }
 0x252   :  { %v832_v63 = vpop.eup %831 }
 0x253   :  { %v599_v2 = vmul.f32 %v832_v63, %v579_v41  ;;  %v600_v3 = vmul.f32 %v832_v63, %v580_v42 }
 0x255   :  { %v615_v4 = vmul.f32 %v608_v61, %v599_v2  ;;  %v616_v5 = vmul.f32 %v612_v62, %v600_v3 }
 0x256   :  { %v834_v7 = vpop.eup %833 }
 0x257   :  { %v631_v9 = vadd.f32 %v624_v0, %v615_v4  ;;  %v632_v10 = vadd.f32 %v628_v1, %v616_v5  ;;  %v601_v11 = vmul.f32 %v834_v7, %v581_v47  ;;  %v602_v12 = vmul.f32 %v834_v7, %v582_v48 }
 0x259   :  { %v723_v13 = vpack.c.bf16 %v632_v10, %v631_v9  ;;  %v617_v14 = vmul.f32 %v608_v61, %v601_v11  ;;  %v618_v15 = vmul.f32 %v612_v62, %v602_v12 }
 0x25b   :  { %647 = vst [vmem:[%s1111_s6] sm:$0xff] %v723_v13  ;;  %v633_v16 = vadd.f32 %v624_v0, %v617_v14  ;;  %v634_v6 = vadd.f32 %v628_v1, %v618_v15 }
 0x25d   :  { %v724_v17 = vpack.c.bf16 %v634_v6, %v633_v16 }
 0x25f   :  { %648 = vst [vmem:[%s1111_s6 + $0x8] sm:$0xff] %v724_v17 }

// kernel: instruction_bert_encoder_forward.18
= control target key start
LH: loop header
LB: loop body
LE: loop exit
PB: predicated region body
PF: predicated region fallthrough
CT: control target
= control target key end

     0   :  { %s1490_s1 = inlined_call_operand.vmem [shape: bf16[256,768], index: 1, kind: input, shape index: {}]   ;;  %s1491_s0 = inlined_call_operand.vmem [shape: bf16[16,256], index: 0, kind: input, shape index: {}]   ;;  %s1492_s2 = inlined_call_operand.vmem [shape: f32[1,768], index: 2, kind: input, shape index: {}]   ;;  %s1493_s3 = inlined_call_operand.vmem [shape: bf16[16,768], index: 3, kind: output, shape index: {}]  }
   0x1   :  { %v998_v0 = vld [vmem:[%s1490_s1 + $0x4] ss:$24 sps:$4 sm:$0xff]   ;;  %v1000_v1 = vld [vmem:[%s1490_s1] ss:$24 sps:$4 sm:$0xff]   ;;  %v1001_v2 = vld [vmem:[%s1490_s1 + $0x34] ss:$24 sps:$4 sm:$0xff]  }
   0x2   :  { %630 = vmatprep.subr.bf16.mxu0 %v998_v0  ;;  %v1003_v3 = vld [vmem:[%s1490_s1 + $0x30] ss:$24 sps:$4 sm:$0xff]   ;;  %v1004_v4 = vld [vmem:[%s1490_s1 + $0x64] ss:$24 sps:$4 sm:$0xff]   ;;  %v1006_v5 = vld [vmem:[%s1490_s1 + $0x60] ss:$24 sps:$4 sm:$0xff]  }
   0x3   :  { %631 = vmatpush1.bf16.msra.mxu0 %v1000_v1  ;;  %v1007_v6 = vld [vmem:[%s1490_s1 + $0x94] ss:$24 sps:$4 sm:$0xff]   ;;  %v1009_v7 = vld [vmem:[%s1490_s1 + $0x90] ss:$24 sps:$4 sm:$0xff]   ;;  %v1010_v8 = vld [vmem:[%s1490_s1 + $0xc4] ss:$24 sps:$4 sm:$0xff]  }
   0x4   :  { %632 = vmatprep.subr.bf16.mxu0 %v1001_v2  ;;  %v1012_v9 = vld [vmem:[%s1490_s1 + $0xc0] ss:$24 sps:$4 sm:$0xff]   ;;  %v1013_v10 = vld [vmem:[%s1490_s1 + $0xf4] ss:$24 sps:$4 sm:$0xff]   ;;  %v1015_v11 = vld [vmem:[%s1490_s1 + $0xf0] ss:$24 sps:$4 sm:$0xff]  }
   0x5   :  { %v1016_v12 = vld [vmem:[%s1490_s1 + $0x124] ss:$24 sps:$4 sm:$0xff]   ;;  %v1048_v14 = vld [vmem:[%s1490_s1 + $0x8] ss:$24 sps:$4 sm:$0xff]   ;;  %v1019_v17 = vld [vmem:[%s1490_s1 + $0x154] ss:$24 sps:$4 sm:$0xff]  }
   0x6   :  { %v1046_v13 = vld [vmem:[%s1490_s1 + $0xc] ss:$24 sps:$4 sm:$0xff]   ;;  %v1018_v15 = vld [vmem:[%s1490_s1 + $0x120] ss:$24 sps:$4 sm:$0xff]   ;;  %v1055_v18 = vld [vmem:[%s1490_s1 + $0x3c] ss:$24 sps:$4 sm:$0xff]  }
   0x7   :  { %633 = vmatpush1.bf16.msra.mxu0 %v1003_v3  ;;  %v1216_v16 = vld [vmem:[%s1491_s0 + $0x4] ss:$8 sps:$4 sm:$0xff]   ;;  %673 = vmatprep.subr.bf16.mxu1 %v1046_v13  ;;  %v1057_v19 = vld [vmem:[%s1490_s1 + $0x38] ss:$24 sps:$4 sm:$0xff]   ;;  %v1063_v23 = vld [vmem:[%s1490_s1 + $0x68] ss:$24 sps:$4 sm:$0xff]  }
   0x8   :  { %634 = vmatprep.subr.bf16.mxu0 %v1004_v4  ;;  %674 = vmatpush1.bf16.msra.mxu1 %v1048_v14  ;;  %v1021_v20 = vld [vmem:[%s1490_s1 + $0x150] ss:$24 sps:$4 sm:$0xff]   ;;  %v1022_v21 = vld [vmem:[%s1490_s1 + $0x184] ss:$24 sps:$4 sm:$0xff]   ;;  %v1024_v24 = vld [vmem:[%s1490_s1 + $0x180] ss:$24 sps:$4 sm:$0xff]  }
   0x9   :  { %662 = vmatprep.mubr.bf16.mxu0 %v1216_v16  ;;  %705 = vmatprep.mubr.bf16.mxu1 %v1216_v16  ;;  %v1061_v22 = vld [vmem:[%s1490_s1 + $0x6c] ss:$24 sps:$4 sm:$0xff]   ;;  %v1067_v25 = vld [vmem:[%s1490_s1 + $0x9c] ss:$24 sps:$4 sm:$0xff]   ;;  %v1069_v27 = vld [vmem:[%s1490_s1 + $0x98] ss:$24 sps:$4 sm:$0xff]  }
   0xa   :  { %675 = vmatprep.subr.bf16.mxu1 %v1055_v18  ;;  %v1025_v26 = vld [vmem:[%s1490_s1 + $0x1b4] ss:$24 sps:$4 sm:$0xff]   ;;  %v1027_v29 = vld [vmem:[%s1490_s1 + $0x1b0] ss:$24 sps:$4 sm:$0xff]   ;;  %v1028_v30 = vld [vmem:[%s1490_s1 + $0x1e4] ss:$24 sps:$4 sm:$0xff]  }
   0xb   :  { %635 = vmatpush1.bf16.msra.mxu0 %v1006_v5  ;;  %v1073_v28 = vld [vmem:[%s1490_s1 + $0xcc] ss:$24 sps:$4 sm:$0xff]   ;;  %v1075_v31 = vld [vmem:[%s1490_s1 + $0xc8] ss:$24 sps:$4 sm:$0xff]   ;;  %v1079_v32 = vld [vmem:[%s1490_s1 + $0xfc] ss:$24 sps:$4 sm:$0xff]  }
   0xc   :  { %636 = vmatprep.subr.bf16.mxu0 %v1007_v6  ;;  %676 = vmatpush1.bf16.msra.mxu1 %v1057_v19  ;;  %v1030_v33 = vld [vmem:[%s1490_s1 + $0x1e0] ss:$24 sps:$4 sm:$0xff]   ;;  %v1031_v34 = vld [vmem:[%s1490_s1 + $0x214] ss:$24 sps:$4 sm:$0xff]   ;;  %v1033_v37 = vld [vmem:[%s1490_s1 + $0x210] ss:$24 sps:$4 sm:$0xff]  }
   0xd   :  { %677 = vmatprep.subr.bf16.mxu1 %v1061_v22  ;;  %v1081_v35 = vld [vmem:[%s1490_s1 + $0xf8] ss:$24 sps:$4 sm:$0xff]   ;;  %v1085_v36 = vld [vmem:[%s1490_s1 + $0x12c] ss:$24 sps:$4 sm:$0xff]   ;;  %v1087_v39 = vld [vmem:[%s1490_s1 + $0x128] ss:$24 sps:$4 sm:$0xff]  }
   0xe   :  { %v1034_v38 = vld [vmem:[%s1490_s1 + $0x244] ss:$24 sps:$4 sm:$0xff]   ;;  %v1036_v41 = vld [vmem:[%s1490_s1 + $0x240] ss:$24 sps:$4 sm:$0xff]   ;;  %v1037_v42 = vld [vmem:[%s1490_s1 + $0x274] ss:$24 sps:$4 sm:$0xff]  }
   0xf   :  { %637 = vmatpush1.bf16.msra.mxu0 %v1009_v7  ;;  %v1091_v40 = vld [vmem:[%s1490_s1 + $0x15c] ss:$24 sps:$4 sm:$0xff]   ;;  %v1093_v43 = vld [vmem:[%s1490_s1 + $0x158] ss:$24 sps:$4 sm:$0xff]   ;;  %v1097_v44 = vld [vmem:[%s1490_s1 + $0x18c] ss:$24 sps:$4 sm:$0xff]  }
  0x10   :  { %638 = vmatprep.subr.bf16.mxu0 %v1010_v8  ;;  %678 = vmatpush1.bf16.msra.mxu1 %v1063_v23  ;;  %v1039_v45 = vld [vmem:[%s1490_s1 + $0x270] ss:$24 sps:$4 sm:$0xff]   ;;  %v1040_v46 = vld [vmem:[%s1490_s1 + $0x2a4] ss:$24 sps:$4 sm:$0xff]   ;;  %v1042_v49 = vld [vmem:[%s1490_s1 + $0x2a0] ss:$24 sps:$4 sm:$0xff]  }
  0x11   :  { %679 = vmatprep.subr.bf16.mxu1 %v1067_v25  ;;  %v1099_v47 = vld [vmem:[%s1490_s1 + $0x188] ss:$24 sps:$4 sm:$0xff]   ;;  %v1103_v48 = vld [vmem:[%s1490_s1 + $0x1bc] ss:$24 sps:$4 sm:$0xff]   ;;  %v1105_v51 = vld [vmem:[%s1490_s1 + $0x1b8] ss:$24 sps:$4 sm:$0xff]  }
  0x12   :  { %v1043_v50 = vld [vmem:[%s1490_s1 + $0x2d4] ss:$24 sps:$4 sm:$0xff]   ;;  %v1045_v53 = vld [vmem:[%s1490_s1 + $0x2d0] ss:$24 sps:$4 sm:$0xff]   ;;  %v1060_v59 = vld [vmem:[%s1490_s1 + $0x44] ss:$24 sps:$4 sm:$0xff]  }
  0x13   :  { %639 = vmatpush1.bf16.msra.mxu0 %v1012_v9  ;;  %v1109_v52 = vld [vmem:[%s1490_s1 + $0x1ec] ss:$24 sps:$4 sm:$0xff]   ;;  %v1111_v55 = vld [vmem:[%s1490_s1 + $0x1e8] ss:$24 sps:$4 sm:$0xff]   ;;  %v1115_v57 = vld [vmem:[%s1490_s1 + $0x21c] ss:$24 sps:$4 sm:$0xff]  }
  0x14   :  { %640 = vmatprep.subr.bf16.mxu0 %v1013_v10  ;;  %680 = vmatpush1.bf16.msra.mxu1 %v1069_v27  ;;  %v1054_v54 = vld [vmem:[%s1490_s1 + $0x14] ss:$24 sps:$4 sm:$0xff]   ;;  %v1340_v56 = vld [vmem:[%s1491_s0] ss:$8 sps:$4 sm:$0xff]   ;;  %v1117_v60 = vld [vmem:[%s1490_s1 + $0x218] ss:$24 sps:$4 sm:$0xff]  }
  0x15   :  { %681 = vmatprep.subr.bf16.mxu1 %v1073_v28  ;;  %v1052_v58 = vld [vmem:[%s1490_s1 + $0x10] ss:$24 sps:$4 sm:$0xff]   ;;  %v1121_v61 = vld [vmem:[%s1490_s1 + $0x24c] ss:$24 sps:$4 sm:$0xff]   ;;  %v1058_v62 = vld [vmem:[%s1490_s1 + $0x40] ss:$24 sps:$4 sm:$0xff]  }
  0x16   :  { %v1066_v63 = vld [vmem:[%s1490_s1 + $0x74] ss:$24 sps:$4 sm:$0xff]   ;;  %v1123_v0 = vld [vmem:[%s1490_s1 + $0x248] ss:$24 sps:$4 sm:$0xff]   ;;  %v1072_v3 = vld [vmem:[%s1490_s1 + $0xa4] ss:$24 sps:$4 sm:$0xff]  }
  0x17   :  { %641 = vmatpush1.bf16.msra.mxu0 %v1015_v11  ;;  %v1127_v1 = vld [vmem:[%s1490_s1 + $0x27c] ss:$24 sps:$4 sm:$0xff]   ;;  %v1064_v2 = vld [vmem:[%s1490_s1 + $0x70] ss:$24 sps:$4 sm:$0xff]   ;;  %v1133_v5 = vld [vmem:[%s1490_s1 + $0x2ac] ss:$24 sps:$4 sm:$0xff]  }
  0x18   :  { %642 = vmatprep.subr.bf16.mxu0 %v1016_v12  ;;  %682 = vmatpush1.bf16.msra.mxu1 %v1075_v31  ;;  %v1129_v4 = vld [vmem:[%s1490_s1 + $0x278] ss:$24 sps:$4 sm:$0xff]   ;;  %v1078_v7 = vld [vmem:[%s1490_s1 + $0xd4] ss:$24 sps:$4 sm:$0xff]   ;;  %v1135_v8 = vld [vmem:[%s1490_s1 + $0x2a8] ss:$24 sps:$4 sm:$0xff]  }
  0x19   :  { %683 = vmatprep.subr.bf16.mxu1 %v1079_v32  ;;  %v1070_v6 = vld [vmem:[%s1490_s1 + $0xa0] ss:$24 sps:$4 sm:$0xff]   ;;  %v1139_v9 = vld [vmem:[%s1490_s1 + $0x2dc] ss:$24 sps:$4 sm:$0xff]   ;;  %v1076_v10 = vld [vmem:[%s1490_s1 + $0xd0] ss:$24 sps:$4 sm:$0xff]  }
  0x1a   :  { %v1084_v11 = vld [vmem:[%s1490_s1 + $0x104] ss:$24 sps:$4 sm:$0xff]   ;;  %v1141_v12 = vld [vmem:[%s1490_s1 + $0x2d8] ss:$24 sps:$4 sm:$0xff]   ;;  %v1090_v14 = vld [vmem:[%s1490_s1 + $0x134] ss:$24 sps:$4 sm:$0xff]  }
  0x1b   :  { %643 = vmatpush1.bf16.msra.mxu0 %v1018_v15  ;;  %v1082_v13 = vld [vmem:[%s1490_s1 + $0x100] ss:$24 sps:$4 sm:$0xff]   ;;  %v1088_v15 = vld [vmem:[%s1490_s1 + $0x130] ss:$24 sps:$4 sm:$0xff]   ;;  %v1102_v18 = vld [vmem:[%s1490_s1 + $0x194] ss:$24 sps:$4 sm:$0xff]  }
  0x1c   :  { %644 = vmatprep.subr.bf16.mxu0 %v1019_v17  ;;  %684 = vmatpush1.bf16.msra.mxu1 %v1081_v35  ;;  %v1094_v17 = vld [vmem:[%s1490_s1 + $0x160] ss:$24 sps:$4 sm:$0xff]   ;;  %v1100_v19 = vld [vmem:[%s1490_s1 + $0x190] ss:$24 sps:$4 sm:$0xff]   ;;  %v1114_v22 = vld [vmem:[%s1490_s1 + $0x1f4] ss:$24 sps:$4 sm:$0xff]  }
  0x1d   :  { %685 = vmatprep.subr.bf16.mxu1 %v1085_v36  ;;  %v1112_v23 = vld [vmem:[%s1490_s1 + $0x1f0] ss:$24 sps:$4 sm:$0xff]   ;;  %v1118_v25 = vld [vmem:[%s1490_s1 + $0x220] ss:$24 sps:$4 sm:$0xff]   ;;  %v1132_v28 = vld [vmem:[%s1490_s1 + $0x284] ss:$24 sps:$4 sm:$0xff]  }
  0x1e   :  { %v1124_v27 = vld [vmem:[%s1490_s1 + $0x250] ss:$24 sps:$4 sm:$0xff]   ;;  %v1144_v32 = vld [vmem:[%s1490_s1 + $0x2e4] ss:$24 sps:$4 sm:$0xff]  }
  0x1f   :  { %645 = vmatpush1.bf16.msra.mxu0 %v1021_v20  ;;  %v1108_v20 = vld [vmem:[%s1490_s1 + $0x1c4] ss:$24 sps:$4 sm:$0xff]   ;;  %v1136_v31 = vld [vmem:[%s1490_s1 + $0x2b0] ss:$24 sps:$4 sm:$0xff]  }
  0x20   :  { %646 = vmatprep.subr.bf16.mxu0 %v1022_v21  ;;  %686 = vmatpush1.bf16.msra.mxu1 %v1087_v39  ;;  %v1106_v21 = vld [vmem:[%s1490_s1 + $0x1c0] ss:$24 sps:$4 sm:$0xff]  }
  0x21   :  { %687 = vmatprep.subr.bf16.mxu1 %v1091_v40 }
  0x23   :  { %647 = vmatpush1.bf16.msra.mxu0 %v1024_v24  ;;  %v1120_v24 = vld [vmem:[%s1490_s1 + $0x224] ss:$24 sps:$4 sm:$0xff]  }
  0x24   :  { %648 = vmatprep.subr.bf16.mxu0 %v1025_v26  ;;  %688 = vmatpush1.bf16.msra.mxu1 %v1093_v43  ;;  %v1126_v26 = vld [vmem:[%s1490_s1 + $0x254] ss:$24 sps:$4 sm:$0xff]  }
  0x25   :  { %689 = vmatprep.subr.bf16.mxu1 %v1097_v44 }
  0x27   :  { %649 = vmatpush1.bf16.msra.mxu0 %v1027_v29  ;;  %v1130_v29 = vld [vmem:[%s1490_s1 + $0x280] ss:$24 sps:$4 sm:$0xff]  }
  0x28   :  { %650 = vmatprep.subr.bf16.mxu0 %v1028_v30  ;;  %690 = vmatpush1.bf16.msra.mxu1 %v1099_v47  ;;  %v1138_v30 = vld [vmem:[%s1490_s1 + $0x2b4] ss:$24 sps:$4 sm:$0xff]  }
  0x29   :  { %691 = vmatprep.subr.bf16.mxu1 %v1103_v48 }
  0x2b   :  { %651 = vmatpush1.bf16.msra.mxu0 %v1030_v33  ;;  %v1142_v33 = vld [vmem:[%s1490_s1 + $0x2e0] ss:$24 sps:$4 sm:$0xff]  }
  0x2c   :  { %652 = vmatprep.subr.bf16.mxu0 %v1031_v34  ;;  %692 = vmatpush1.bf16.msra.mxu1 %v1105_v51  ;;  %v800_v34 = vlaneseq }
  0x2d   :  { %693 = vmatprep.subr.bf16.mxu1 %v1109_v52 }
  0x2e   :  { %v801_v35 = vshrl.u32 %v800_v34, 7 }
  0x2f   :  { %653 = vmatpush1.bf16.msra.mxu0 %v1033_v37  ;;  %v798_v37 = vld [vmem:[%s1492_s2] sm:$0x3f] }
  0x30   :  { %654 = vmatprep.subr.bf16.mxu0 %v1034_v38  ;;  %694 = vmatpush1.bf16.msra.mxu1 %v1111_v55  ;;  %v818_v36 = vsub.s32 4, %v801_v35  ;;  %v822_v38 = vsub.s32 5, %v801_v35  ;;  %v810_v55 = vsub.s32 2, %v801_v35 }
  0x31   :  { %695 = vmatprep.subr.bf16.mxu1 %v1115_v57 }
  0x32   :  { %v819_v39 = vrot.slane %v798_v37, %v818_v36  ;;  %v823_v40 = vrot.slane %v798_v37, %v822_v38  ;;  %v811_v57 = vrot.slane %v798_v37, %v810_v55 }
  0x33   :  { %655 = vmatpush1.bf16.msra.mxu0 %v1036_v41  ;;  %v802_v41 = vsub.s32 0, %v801_v35 }
  0x34   :  { %656 = vmatprep.subr.bf16.mxu0 %v1037_v42  ;;  %696 = vmatpush1.bf16.msra.mxu1 %v1117_v60  ;;  %v806_v42 = vsub.s32 1, %v801_v35 }
  0x35   :  { %697 = vmatprep.subr.bf16.mxu1 %v1121_v61  ;;  %v803_v43 = vrot.slane %v798_v37, %v802_v41 }
  0x36   :  { %v807_v44 = vrot.slane %v798_v37, %v806_v42 }
  0x37   :  { %657 = vmatpush1.bf16.msra.mxu0 %v1039_v45 }
  0x38   :  { %658 = vmatprep.subr.bf16.mxu0 %v1040_v46  ;;  %698 = vmatpush1.bf16.msra.mxu1 %v1123_v0 }
  0x39   :  { %699 = vmatprep.subr.bf16.mxu1 %v1127_v1 }
  0x3b   :  { %659 = vmatpush1.bf16.msra.mxu0 %v1042_v49 }
  0x3c   :  { %660 = vmatprep.subr.bf16.mxu0 %v1043_v50  ;;  %700 = vmatpush1.bf16.msra.mxu1 %v1129_v4 }
  0x3d   :  { %701 = vmatprep.subr.bf16.mxu1 %v1133_v5 }
  0x3f   :  { %661 = vmatpush1.bf16.msra.mxu0 %v1045_v53 }
  0x40   :  { %716 = vmatprep.subr.bf16.mxu0 %v1054_v54  ;;  %702 = vmatpush1.bf16.msra.mxu1 %v1135_v8 }
  0x41   :  { %703 = vmatprep.subr.bf16.mxu1 %v1139_v9 }
  0x42   :  { %663 = vmatmul.mubr.bf16.vlgmr.msra.gmra.mrb[0].mxu0 %v1340_v56 }
  0x43   :  { %717 = vmatpush1.bf16.msra.mxu0 %v1052_v58  ;;  %748 = vmatprep.mubr.bf16.mxu0 %v1216_v16  ;;  %v1096_v16 = vld [vmem:[%s1490_s1 + $0x164] ss:$24 sps:$4 sm:$0xff]  }
  0x44   :  { %718 = vmatprep.subr.bf16.mxu0 %v1060_v59  ;;  %704 = vmatpush1.bf16.msra.mxu1 %v1141_v12 }
  0x47   :  { %719 = vmatpush1.bf16.msra.mxu0 %v1058_v62  ;;  %706 = vmatmul.mubr.bf16.vlgmr.msra.gmra.mrb[0].mxu1 %v1340_v56 }
  0x48   :  { %720 = vmatprep.subr.bf16.mxu0 %v1066_v63 }
  0x4b   :  { %721 = vmatpush1.bf16.msra.mxu0 %v1064_v2 }
  0x4c   :  { %722 = vmatprep.subr.bf16.mxu0 %v1072_v3 }
  0x4f   :  { %723 = vmatpush1.bf16.msra.mxu0 %v1070_v6 }
  0x50   :  { %724 = vmatprep.subr.bf16.mxu0 %v1078_v7 }
  0x53   :  { %725 = vmatpush1.bf16.msra.mxu0 %v1076_v10 }
  0x54   :  { %726 = vmatprep.subr.bf16.mxu0 %v1084_v11 }
  0x57   :  { %727 = vmatpush1.bf16.msra.mxu0 %v1082_v13 }
  0x58   :  { %728 = vmatprep.subr.bf16.mxu0 %v1090_v14 }
  0x5b   :  { %729 = vmatpush1.bf16.msra.mxu0 %v1088_v15 }
  0x5c   :  { %730 = vmatprep.subr.bf16.mxu0 %v1096_v16 }
  0x5f   :  { %731 = vmatpush1.bf16.msra.mxu0 %v1094_v17 }
  0x60   :  { %732 = vmatprep.subr.bf16.mxu0 %v1102_v18 }
  0x63   :  { %733 = vmatpush1.bf16.msra.mxu0 %v1100_v19 }
  0x64   :  { %734 = vmatprep.subr.bf16.mxu0 %v1108_v20 }
  0x67   :  { %735 = vmatpush1.bf16.msra.mxu0 %v1106_v21 }
  0x68   :  { %736 = vmatprep.subr.bf16.mxu0 %v1114_v22 }
  0x6b   :  { %737 = vmatpush1.bf16.msra.mxu0 %v1112_v23 }
  0x6c   :  { %738 = vmatprep.subr.bf16.mxu0 %v1120_v24 }
  0x6f   :  { %739 = vmatpush1.bf16.msra.mxu0 %v1118_v25 }
  0x70   :  { %740 = vmatprep.subr.bf16.mxu0 %v1126_v26 }
  0x73   :  { %741 = vmatpush1.bf16.msra.mxu0 %v1124_v27 }
  0x74   :  { %742 = vmatprep.subr.bf16.mxu0 %v1132_v28 }
  0x77   :  { %743 = vmatpush1.bf16.msra.mxu0 %v1130_v29 }
  0x78   :  { %744 = vmatprep.subr.bf16.mxu0 %v1138_v30 }
  0x7b   :  { %745 = vmatpush1.bf16.msra.mxu0 %v1136_v31 }
  0x7c   :  { %746 = vmatprep.subr.bf16.mxu0 %v1144_v32 }
  0x7f   :  { %747 = vmatpush1.bf16.msra.mxu0 %v1142_v33 }
  0x82   :  { %749 = vmatmul.mubr.bf16.vlgmr.msra.gmra.mrb[4].mxu0 %v1340_v56  ;;  %v814_v56 = vsub.s32 3, %v801_v35 }
  0x84   :  { %v815_v58 = vrot.slane %v798_v37, %v814_v56 }
 0x115   :  { %v664_v45 = vpop.f32.mrb[0].mxu0 }
 0x116   :  { %v830_v46 = vadd.f32 %v803_v43, %v664_v45  ;;  %v666_v47 = vpop.f32.mrb[1].mxu0 }
 0x117   :  { %v831_v48 = vadd.f32 %v807_v44, %v666_v47  ;;  %v668_v49 = vpop.f32.mrb[2].mxu0 }
 0x118   :  { %v836_v50 = vadd.f32 %v803_v43, %v668_v49  ;;  %v670_v51 = vpop.f32.mrb[3].mxu0 }
 0x119   :  { %v992_v52 = vpack.c.bf16 %v831_v48, %v830_v46  ;;  %v837_v53 = vadd.f32 %v807_v44, %v670_v51 }
 0x11a   :  { %v707_v59 = vpop.f32.mrb[0].mxu1 }
 0x11b   :  { %878 = vst [vmem:[%s1493_s3] sm:$0xff] %v992_v52  ;;  %v995_v54 = vpack.c.bf16 %v837_v53, %v836_v50  ;;  %v832_v60 = vadd.f32 %v811_v57, %v707_v59  ;;  %v709_v61 = vpop.f32.mrb[1].mxu1 }
 0x11c   :  { %v833_v62 = vadd.f32 %v815_v58, %v709_v61  ;;  %v711_v63 = vpop.f32.mrb[2].mxu1 }
 0x11d   :  { %881 = vst [vmem:[%s1493_s3 + $0x18] sm:$0xff] %v995_v54  ;;  %v838_v0 = vadd.f32 %v811_v57, %v711_v63  ;;  %v713_v1 = vpop.f32.mrb[3].mxu1 }
 0x11e   :  { %v993_v2 = vpack.c.bf16 %v833_v62, %v832_v60  ;;  %v839_v3 = vadd.f32 %v815_v58, %v713_v1 }
 0x120   :  { %879 = vst [vmem:[%s1493_s3 + $0x8] sm:$0xff] %v993_v2  ;;  %v996_v4 = vpack.c.bf16 %v839_v3, %v838_v0 }
 0x122   :  { %882 = vst [vmem:[%s1493_s3 + $0x20] sm:$0xff] %v996_v4 }
 0x155   :  { %v750_v5 = vpop.f32.mrb[4].mxu0 }
 0x156   :  { %v834_v6 = vadd.f32 %v819_v39, %v750_v5  ;;  %v752_v7 = vpop.f32.mrb[5].mxu0 }
 0x157   :  { %v835_v8 = vadd.f32 %v823_v40, %v752_v7  ;;  %v754_v9 = vpop.f32.mrb[6].mxu0 }
 0x158   :  { %v840_v10 = vadd.f32 %v819_v39, %v754_v9  ;;  %v756_v11 = vpop.f32.mrb[7].mxu0 }
 0x159   :  { %v994_v12 = vpack.c.bf16 %v835_v8, %v834_v6  ;;  %v841_v13 = vadd.f32 %v823_v40, %v756_v11 }
 0x15b   :  { %880 = vst [vmem:[%s1493_s3 + $0x10] sm:$0xff] %v994_v12  ;;  %v997_v14 = vpack.c.bf16 %v841_v13, %v840_v10 }
 0x15d   :  { %883 = vst [vmem:[%s1493_s3 + $0x28] sm:$0xff] %v997_v14 }

// kernel: instruction_bert_encoder_forward.23
= control target key start
LH: loop header
LB: loop body
LE: loop exit
PB: predicated region body
PF: predicated region fallthrough
CT: control target
= control target key end

     0   :  { %v56_v9 = vlaneseq  ;;  %v1093_v10 = vmov 1966171168   ;;  %s1452_s0 = inlined_call_operand.vmem [shape: bf16[2,256], index: 0, kind: input, shape index: {}]   ;;  %s1453_s1 = inlined_call_operand.vmem [shape: bf16[256,256], index: 1, kind: input, shape index: {}]   ;;  %s1454_s2 = inlined_call_operand.vmem [shape: f32[1,256], index: 2, kind: input, shape index: {}]   ;;  %s1455_s3 = inlined_call_operand.vmem [shape: bf16[256,512], index: 3, kind: input, shape index: {}]   ;;  %s1456_s4 = inlined_call_operand.vmem [shape: f32[1,512], index: 4, kind: input, shape index: {}]   ;;  %s1457_s5 = inlined_call_operand.hbm [shape: f32[2,512], index: 5, kind: output, shape index: {}]  }
   0x1   :  { %v921_v0 = vld [vmem:[%s1453_s1 + $0x4] ss:$8 sps:$4 sm:$0xff]   ;;  %v923_v1 = vld [vmem:[%s1453_s1] ss:$8 sps:$4 sm:$0xff]   ;;  %v924_v2 = vld [vmem:[%s1453_s1 + $0x14] ss:$8 sps:$4 sm:$0xff]   ;;  %v76_v11 = vunpack.c.l.s4 %v1093_v10 }
   0x2   :  { %251 = vmatprep.subr.bf16.mxu0 %v921_v0  ;;  %v926_v3 = vld [vmem:[%s1453_s1 + $0x10] ss:$8 sps:$4 sm:$0xff]   ;;  %v927_v4 = vld [vmem:[%s1453_s1 + $0x24] ss:$8 sps:$4 sm:$0xff]   ;;  %v929_v5 = vld [vmem:[%s1453_s1 + $0x20] ss:$8 sps:$4 sm:$0xff]  }
   0x3   :  { %252 = vmatpush1.bf16.msra.mxu0 %v923_v1  ;;  %v930_v6 = vld [vmem:[%s1453_s1 + $0x34] ss:$8 sps:$4 sm:$0xff]   ;;  %v932_v7 = vld [vmem:[%s1453_s1 + $0x30] ss:$8 sps:$4 sm:$0xff]   ;;  %v933_v8 = vld [vmem:[%s1453_s1 + $0x44] ss:$8 sps:$4 sm:$0xff]   ;;  %v77_v15 = vunpack.c.0.s8 %v76_v11 }
   0x4   :  { %253 = vmatprep.subr.bf16.mxu0 %v924_v2  ;;  %v935_v12 = vld [vmem:[%s1453_s1 + $0x40] ss:$8 sps:$4 sm:$0xff]   ;;  %v936_v13 = vld [vmem:[%s1453_s1 + $0x54] ss:$8 sps:$4 sm:$0xff]   ;;  %v1159_v14 = vshrl.u32 %v56_v9, 7 }
   0x5   :  { %v938_v16 = vld [vmem:[%s1453_s1 + $0x50] ss:$8 sps:$4 sm:$0xff]   ;;  %v939_v17 = vld [vmem:[%s1453_s1 + $0x64] ss:$8 sps:$4 sm:$0xff]   ;;  %v941_v22 = vld [vmem:[%s1453_s1 + $0x60] ss:$8 sps:$4 sm:$0xff]  }
   0x6   :  { %v1168_v18 = vsub.s32 %v77_v15, %v1159_v14  ;;  %v1173_v19 = vld.sshfl [vmem:[%s1452_s0] sm:$0x11 pattern:$0x75316420]  ;;  %v969_v21 = vld [vmem:[%s1455_s3 + $0x4] ss:$16 sps:$4 sm:$0xff]  }
   0x7   :  { %254 = vmatpush1.bf16.msra.mxu0 %v926_v3  ;;  %v74_v20 = vcombine.high %v1173_v19, %v1173_v19  ;;  %v942_v23 = vld [vmem:[%s1453_s1 + $0x74] ss:$8 sps:$4 sm:$0xff]   ;;  %702 = vmatprep.subr.bf16.mxu1 %v969_v21  ;;  %v974_v25 = vld [vmem:[%s1455_s3] ss:$16 sps:$4 sm:$0xff]   ;;  %v945_v28 = vld [vmem:[%s1453_s1 + $0x84] ss:$8 sps:$4 sm:$0xff]  }
   0x8   :  { %255 = vmatprep.subr.bf16.mxu0 %v927_v4  ;;  %v975_v26 = vld [vmem:[%s1455_s3 + $0x24] ss:$16 sps:$4 sm:$0xff]   ;;  %v944_v27 = vld [vmem:[%s1453_s1 + $0x70] ss:$8 sps:$4 sm:$0xff]   ;;  %703 = vmatpush1.bf16.msra.mxu1 %v974_v25  ;;  %v947_v31 = vld [vmem:[%s1453_s1 + $0x80] ss:$8 sps:$4 sm:$0xff]  }
   0x9   :  { %v88_v24 = vrot.slane %v74_v20, %v1168_v18  ;;  %704 = vmatprep.subr.bf16.mxu1 %v975_v26  ;;  %v980_v29 = vld [vmem:[%s1455_s3 + $0x20] ss:$16 sps:$4 sm:$0xff]   ;;  %v981_v30 = vld [vmem:[%s1455_s3 + $0x44] ss:$16 sps:$4 sm:$0xff]  }
   0xa   :  { %v986_v32 = vld [vmem:[%s1455_s3 + $0x40] ss:$16 sps:$4 sm:$0xff]   ;;  %v987_v33 = vld [vmem:[%s1455_s3 + $0x64] ss:$16 sps:$4 sm:$0xff]  }
   0xb   :  { %256 = vmatpush1.bf16.msra.mxu0 %v929_v5  ;;  %283 = vmatprep.mubr.bf16.mxu0 %v88_v24  ;;  %v948_v34 = vld [vmem:[%s1453_s1 + $0x94] ss:$8 sps:$4 sm:$0xff]   ;;  %v950_v35 = vld [vmem:[%s1453_s1 + $0x90] ss:$8 sps:$4 sm:$0xff]   ;;  %v951_v38 = vld [vmem:[%s1453_s1 + $0xa4] ss:$8 sps:$4 sm:$0xff]  }
   0xc   :  { %257 = vmatprep.subr.bf16.mxu0 %v930_v6  ;;  %705 = vmatpush1.bf16.msra.mxu1 %v980_v29  ;;  %v992_v36 = vld [vmem:[%s1455_s3 + $0x60] ss:$16 sps:$4 sm:$0xff]   ;;  %v993_v37 = vld [vmem:[%s1455_s3 + $0x84] ss:$16 sps:$4 sm:$0xff]  }
   0xd   :  { %706 = vmatprep.subr.bf16.mxu1 %v981_v30  ;;  %v953_v39 = vld [vmem:[%s1453_s1 + $0xa0] ss:$8 sps:$4 sm:$0xff]   ;;  %v999_v41 = vld [vmem:[%s1455_s3 + $0xa4] ss:$16 sps:$4 sm:$0xff]   ;;  %v956_v43 = vld [vmem:[%s1453_s1 + $0xb0] ss:$8 sps:$4 sm:$0xff]  }
   0xe   :  { %v998_v40 = vld [vmem:[%s1455_s3 + $0x80] ss:$16 sps:$4 sm:$0xff]   ;;  %v954_v42 = vld [vmem:[%s1453_s1 + $0xb4] ss:$8 sps:$4 sm:$0xff]   ;;  %v957_v46 = vld [vmem:[%s1453_s1 + $0xc4] ss:$8 sps:$4 sm:$0xff]  }
   0xf   :  { %258 = vmatpush1.bf16.msra.mxu0 %v932_v7  ;;  %v1004_v44 = vld [vmem:[%s1455_s3 + $0xa0] ss:$16 sps:$4 sm:$0xff]   ;;  %v1005_v45 = vld [vmem:[%s1455_s3 + $0xc4] ss:$16 sps:$4 sm:$0xff]  }
  0x10   :  { %259 = vmatprep.subr.bf16.mxu0 %v933_v8  ;;  %707 = vmatpush1.bf16.msra.mxu1 %v986_v32  ;;  %v959_v47 = vld [vmem:[%s1453_s1 + $0xc0] ss:$8 sps:$4 sm:$0xff]   ;;  %v1011_v49 = vld [vmem:[%s1455_s3 + $0xe4] ss:$16 sps:$4 sm:$0xff]   ;;  %v962_v51 = vld [vmem:[%s1453_s1 + $0xd0] ss:$8 sps:$4 sm:$0xff]  }
  0x11   :  { %708 = vmatprep.subr.bf16.mxu1 %v987_v33  ;;  %v1010_v48 = vld [vmem:[%s1455_s3 + $0xc0] ss:$16 sps:$4 sm:$0xff]   ;;  %v960_v50 = vld [vmem:[%s1453_s1 + $0xd4] ss:$8 sps:$4 sm:$0xff]   ;;  %v963_v54 = vld [vmem:[%s1453_s1 + $0xe4] ss:$8 sps:$4 sm:$0xff]  }
  0x12   :  { %v1016_v52 = vld [vmem:[%s1455_s3 + $0xe0] ss:$16 sps:$4 sm:$0xff]   ;;  %v1017_v53 = vld [vmem:[%s1455_s3 + $0x104] ss:$16 sps:$4 sm:$0xff]  }
  0x13   :  { %260 = vmatpush1.bf16.msra.mxu0 %v935_v12  ;;  %v965_v55 = vld [vmem:[%s1453_s1 + $0xe0] ss:$8 sps:$4 sm:$0xff]   ;;  %v966_v57 = vld [vmem:[%s1453_s1 + $0xf4] ss:$8 sps:$4 sm:$0xff]   ;;  %v968_v60 = vld [vmem:[%s1453_s1 + $0xf0] ss:$8 sps:$4 sm:$0xff]  }
  0x14   :  { %261 = vmatprep.subr.bf16.mxu0 %v936_v13  ;;  %709 = vmatpush1.bf16.msra.mxu1 %v992_v36  ;;  %v1022_v56 = vld [vmem:[%s1455_s3 + $0x100] ss:$16 sps:$4 sm:$0xff]   ;;  %v1023_v58 = vld [vmem:[%s1455_s3 + $0x124] ss:$16 sps:$4 sm:$0xff]  }
  0x15   :  { %710 = vmatprep.subr.bf16.mxu1 %v993_v37  ;;  %v1028_v59 = vld [vmem:[%s1455_s3 + $0x120] ss:$16 sps:$4 sm:$0xff]   ;;  %v1029_v61 = vld [vmem:[%s1455_s3 + $0x144] ss:$16 sps:$4 sm:$0xff]  }
  0x17   :  { %262 = vmatpush1.bf16.msra.mxu0 %v938_v16 }
  0x18   :  { %263 = vmatprep.subr.bf16.mxu0 %v939_v17  ;;  %711 = vmatpush1.bf16.msra.mxu1 %v998_v40 }
  0x19   :  { %712 = vmatprep.subr.bf16.mxu1 %v999_v41 }
  0x1b   :  { %264 = vmatpush1.bf16.msra.mxu0 %v941_v22 }
  0x1c   :  { %265 = vmatprep.subr.bf16.mxu0 %v942_v23  ;;  %713 = vmatpush1.bf16.msra.mxu1 %v1004_v44 }
  0x1d   :  { %714 = vmatprep.subr.bf16.mxu1 %v1005_v45 }
  0x1f   :  { %266 = vmatpush1.bf16.msra.mxu0 %v944_v27 }
  0x20   :  { %267 = vmatprep.subr.bf16.mxu0 %v945_v28  ;;  %715 = vmatpush1.bf16.msra.mxu1 %v1010_v48 }
  0x21   :  { %716 = vmatprep.subr.bf16.mxu1 %v1011_v49 }
  0x23   :  { %268 = vmatpush1.bf16.msra.mxu0 %v947_v31 }
  0x24   :  { %269 = vmatprep.subr.bf16.mxu0 %v948_v34  ;;  %717 = vmatpush1.bf16.msra.mxu1 %v1016_v52 }
  0x25   :  { %718 = vmatprep.subr.bf16.mxu1 %v1017_v53 }
  0x27   :  { %270 = vmatpush1.bf16.msra.mxu0 %v950_v35 }
  0x28   :  { %271 = vmatprep.subr.bf16.mxu0 %v951_v38  ;;  %719 = vmatpush1.bf16.msra.mxu1 %v1022_v56 }
  0x29   :  { %720 = vmatprep.subr.bf16.mxu1 %v1023_v58 }
  0x2b   :  { %272 = vmatpush1.bf16.msra.mxu0 %v953_v39 }
  0x2c   :  { %273 = vmatprep.subr.bf16.mxu0 %v954_v42 }
  0x2f   :  { %274 = vmatpush1.bf16.msra.mxu0 %v956_v43 }
  0x30   :  { %275 = vmatprep.subr.bf16.mxu0 %v957_v46 }
  0x33   :  { %276 = vmatpush1.bf16.msra.mxu0 %v959_v47 }
  0x34   :  { %277 = vmatprep.subr.bf16.mxu0 %v960_v50 }
  0x37   :  { %278 = vmatpush1.bf16.msra.mxu0 %v962_v51 }
  0x38   :  { %279 = vmatprep.subr.bf16.mxu0 %v963_v54 }
  0x3b   :  { %280 = vmatpush1.bf16.msra.mxu0 %v965_v55 }
  0x3c   :  { %10 = vsyncpa [#allocation3], 0  ;;  %281 = vmatprep.subr.bf16.mxu0 %v966_v57  ;;  %v973_v62 = vld [vmem:[%s1455_s3 + $0xc] ss:$16 sps:$4 sm:$0xff]   ;;  %v81_v63 = vrot.slane %v1173_v19, %v1168_v18  ;;  %721 = vmatpush1.bf16.msra.mxu1 %v1028_v59  ;;  %v1034_v0 = vld [vmem:[%s1455_s3 + $0x140] ss:$16 sps:$4 sm:$0xff]  }
  0x3d   :  { %v971_v1 = vld [vmem:[%s1455_s3 + $0x8] ss:$16 sps:$4 sm:$0xff]   ;;  %722 = vmatprep.subr.bf16.mxu1 %v1029_v61  ;;  %v1035_v2 = vld [vmem:[%s1455_s3 + $0x164] ss:$16 sps:$4 sm:$0xff]   ;;  %v979_v3 = vld [vmem:[%s1455_s3 + $0x2c] ss:$16 sps:$4 sm:$0xff]  }
  0x3e   :  { %v1040_v4 = vld [vmem:[%s1455_s3 + $0x160] ss:$16 sps:$4 sm:$0xff]   ;;  %v977_v5 = vld [vmem:[%s1455_s3 + $0x28] ss:$16 sps:$4 sm:$0xff]   ;;  %v985_v6 = vld [vmem:[%s1455_s3 + $0x4c] ss:$16 sps:$4 sm:$0xff]  }
  0x3f   :  { %282 = vmatpush1.bf16.msra.mxu0 %v968_v60  ;;  %v983_v7 = vld [vmem:[%s1455_s3 + $0x48] ss:$16 sps:$4 sm:$0xff]   ;;  %v991_v8 = vld [vmem:[%s1455_s3 + $0x6c] ss:$16 sps:$4 sm:$0xff]   ;;  %v1041_v27 = vld [vmem:[%s1455_s3 + $0x184] ss:$16 sps:$4 sm:$0xff]  }
  0x40   :  { %743 = vmatprep.subr.bf16.mxu0 %v973_v62  ;;  %723 = vmatpush1.bf16.msra.mxu1 %v1034_v0  ;;  %v989_v9 = vld [vmem:[%s1455_s3 + $0x68] ss:$16 sps:$4 sm:$0xff]   ;;  %v997_v10 = vld [vmem:[%s1455_s3 + $0x8c] ss:$16 sps:$4 sm:$0xff]   ;;  %v1046_v30 = vld [vmem:[%s1455_s3 + $0x180] ss:$16 sps:$4 sm:$0xff]  }
  0x41   :  { %724 = vmatprep.subr.bf16.mxu1 %v1035_v2  ;;  %v995_v11 = vld [vmem:[%s1455_s3 + $0x88] ss:$16 sps:$4 sm:$0xff]   ;;  %v1003_v12 = vld [vmem:[%s1455_s3 + $0xac] ss:$16 sps:$4 sm:$0xff]   ;;  %v1047_v31 = vld [vmem:[%s1455_s3 + $0x1a4] ss:$16 sps:$4 sm:$0xff]  }
  0x42   :  { %284 = vmatmul.mubr.bf16.vlgmr.msra.gmra.mrb[0].mxu0 %v81_v63  ;;  %v1001_v13 = vld [vmem:[%s1455_s3 + $0xa8] ss:$16 sps:$4 sm:$0xff]   ;;  %v1009_v15 = vld [vmem:[%s1455_s3 + $0xcc] ss:$16 sps:$4 sm:$0xff]   ;;  %v1052_v34 = vld [vmem:[%s1455_s3 + $0x1a0] ss:$16 sps:$4 sm:$0xff]  }
  0x43   :  { %744 = vmatpush1.bf16.msra.mxu0 %v971_v1  ;;  %v1007_v16 = vld [vmem:[%s1455_s3 + $0xc8] ss:$16 sps:$4 sm:$0xff]   ;;  %v1015_v17 = vld [vmem:[%s1455_s3 + $0xec] ss:$16 sps:$4 sm:$0xff]   ;;  %v1053_v35 = vld [vmem:[%s1455_s3 + $0x1c4] ss:$16 sps:$4 sm:$0xff]  }
  0x44   :  { %745 = vmatprep.subr.bf16.mxu0 %v979_v3  ;;  %725 = vmatpush1.bf16.msra.mxu1 %v1040_v4  ;;  %v1013_v18 = vld [vmem:[%s1455_s3 + $0xe8] ss:$16 sps:$4 sm:$0xff]   ;;  %v1021_v19 = vld [vmem:[%s1455_s3 + $0x10c] ss:$16 sps:$4 sm:$0xff]   ;;  %v1058_v38 = vld [vmem:[%s1455_s3 + $0x1c0] ss:$16 sps:$4 sm:$0xff]  }
  0x45   :  { %v1019_v20 = vld [vmem:[%s1455_s3 + $0x108] ss:$16 sps:$4 sm:$0xff]   ;;  %v1027_v21 = vld [vmem:[%s1455_s3 + $0x12c] ss:$16 sps:$4 sm:$0xff]   ;;  %726 = vmatprep.subr.bf16.mxu1 %v1041_v27  ;;  %v1059_v39 = vld [vmem:[%s1455_s3 + $0x1e4] ss:$16 sps:$4 sm:$0xff]  }
  0x46   :  { %v1025_v22 = vld [vmem:[%s1455_s3 + $0x128] ss:$16 sps:$4 sm:$0xff]   ;;  %v1033_v23 = vld [vmem:[%s1455_s3 + $0x14c] ss:$16 sps:$4 sm:$0xff]   ;;  %v1064_v42 = vld [vmem:[%s1455_s3 + $0x1e0] ss:$16 sps:$4 sm:$0xff]  }
  0x47   :  { %746 = vmatpush1.bf16.msra.mxu0 %v977_v5  ;;  %v1031_v24 = vld [vmem:[%s1455_s3 + $0x148] ss:$16 sps:$4 sm:$0xff]   ;;  %v1039_v25 = vld [vmem:[%s1455_s3 + $0x16c] ss:$16 sps:$4 sm:$0xff]   ;;  %v58_v43 = vsub.s32 0, %v1159_v14  ;;  %v62_v45 = vsub.s32 1, %v1159_v14 }
  0x48   :  { %747 = vmatprep.subr.bf16.mxu0 %v985_v6  ;;  %v1037_v26 = vld [vmem:[%s1455_s3 + $0x168] ss:$16 sps:$4 sm:$0xff]   ;;  %v1045_v28 = vld [vmem:[%s1455_s3 + $0x18c] ss:$16 sps:$4 sm:$0xff]   ;;  %727 = vmatpush1.bf16.msra.mxu1 %v1046_v30  ;;  %v54_v44 = vld [vmem:[%s1454_s2] sm:$0x3] }
  0x49   :  { %v1043_v29 = vld [vmem:[%s1455_s3 + $0x188] ss:$16 sps:$4 sm:$0xff]   ;;  %v1051_v32 = vld [vmem:[%s1455_s3 + $0x1ac] ss:$16 sps:$4 sm:$0xff]   ;;  %728 = vmatprep.subr.bf16.mxu1 %v1047_v31  ;;  %v59_v46 = vrot.slane %v54_v44, %v58_v43  ;;  %v63_v47 = vrot.slane %v54_v44, %v62_v45  ;;  %v372_v58 = vsub.s32 2, %v1159_v14  ;;  %v376_v60 = vsub.s32 3, %v1159_v14 }
  0x4a   :  { %v1049_v33 = vld [vmem:[%s1455_s3 + $0x1a8] ss:$16 sps:$4 sm:$0xff]   ;;  %v1057_v36 = vld [vmem:[%s1455_s3 + $0x1cc] ss:$16 sps:$4 sm:$0xff]   ;;  %v360_v59 = vld [vmem:[%s1456_s4] sm:$0xf] }
  0x4b   :  { %748 = vmatpush1.bf16.msra.mxu0 %v983_v7  ;;  %v1055_v37 = vld [vmem:[%s1455_s3 + $0x1c8] ss:$16 sps:$4 sm:$0xff]   ;;  %v1063_v40 = vld [vmem:[%s1455_s3 + $0x1ec] ss:$16 sps:$4 sm:$0xff]   ;;  %v1094_v61 = vmov 1983009808   ;;  %v365_v63 = vrot.slane %v360_v59, %v58_v43  ;;  %v373_v0 = vrot.slane %v360_v59, %v372_v58  ;;  %v369_v1 = vrot.slane %v360_v59, %v62_v45 }
  0x4c   :  { %749 = vmatprep.subr.bf16.mxu0 %v991_v8  ;;  %729 = vmatpush1.bf16.msra.mxu1 %v1052_v34  ;;  %v1061_v41 = vld [vmem:[%s1455_s3 + $0x1e8] ss:$16 sps:$4 sm:$0xff]   ;;  %v791_v62 = vunpack.c.l.s4 %v1094_v61  ;;  %v377_v2 = vrot.slane %v360_v59, %v376_v60  ;;  %s1095_s4 = smov [#allocation2]  }
  0x4d   :  { %730 = vmatprep.subr.bf16.mxu1 %v1053_v35  ;;  %s813_s28 = sshll.u32 %s1095_s4, 4  ;;  %s814_s28 = int_to_ptr.vmem [resolvable:$true] %s813_s28 }
  0x4e   :  { %v792_v3 = vunpack.c.0.s8 %v791_v62  ;;  %s1069_s29 = scalar_lea.vmem %s814_s28, 128  ;;  %p1074_p1 = scmp.lt.s32.totalorder %s814_s28, %s814_s28 }
  0x4f   :  { %750 = vmatpush1.bf16.msra.mxu0 %v989_v9  ;;  %p1070_p0 = scmp.ne.s32.totalorder %s814_s28, %s1069_s29  ;;  %p1075_p2 = scmp.lt.s32.totalorder %s1069_s29, %s1069_s29 }
  0x50   :  { %751 = vmatprep.subr.bf16.mxu0 %v997_v10  ;;  %731 = vmatpush1.bf16.msra.mxu1 %v1058_v38 }
  0x51   :  { %732 = vmatprep.subr.bf16.mxu1 %v1059_v39  ;;  %p1076_p3 = por %p1075_p2, %p1074_p1 }
  0x53   :  { %752 = vmatpush1.bf16.msra.mxu0 %v995_v11  ;;  %p1077_p4 = pnand %p1076_p3, %p1070_p0 }
  0x54   :  { %753 = vmatprep.subr.bf16.mxu0 %v1003_v12  ;;  %733 = vmatpush1.bf16.msra.mxu1 %v1064_v42 }
  0x57   :  { %754 = vmatpush1.bf16.msra.mxu0 %v1001_v13 }
  0x58   :  { %755 = vmatprep.subr.bf16.mxu0 %v1009_v15  ;;  %v795_v15 = vsub.s32 %v792_v3, %v1159_v14 }
  0x5b   :  { %756 = vmatpush1.bf16.msra.mxu0 %v1007_v16 }
  0x5c   :  { %757 = vmatprep.subr.bf16.mxu0 %v1015_v17 }
  0x5f   :  { %758 = vmatpush1.bf16.msra.mxu0 %v1013_v18 }
  0x60   :  { %759 = vmatprep.subr.bf16.mxu0 %v1021_v19 }
  0x63   :  { %760 = vmatpush1.bf16.msra.mxu0 %v1019_v20 }
  0x64   :  { %761 = vmatprep.subr.bf16.mxu0 %v1027_v21 }
  0x67   :  { %762 = vmatpush1.bf16.msra.mxu0 %v1025_v22 }
  0x68   :  { %763 = vmatprep.subr.bf16.mxu0 %v1033_v23 }
  0x6b   :  { %764 = vmatpush1.bf16.msra.mxu0 %v1031_v24 }
  0x6c   :  { %765 = vmatprep.subr.bf16.mxu0 %v1039_v25 }
  0x6f   :  { %766 = vmatpush1.bf16.msra.mxu0 %v1037_v26 }
  0x70   :  { %767 = vmatprep.subr.bf16.mxu0 %v1045_v28 }
  0x73   :  { %768 = vmatpush1.bf16.msra.mxu0 %v1043_v29 }
  0x74   :  { %769 = vmatprep.subr.bf16.mxu0 %v1051_v32 }
  0x77   :  { %770 = vmatpush1.bf16.msra.mxu0 %v1049_v33 }
  0x78   :  { %771 = vmatprep.subr.bf16.mxu0 %v1057_v36 }
  0x7b   :  { %772 = vmatpush1.bf16.msra.mxu0 %v1055_v37 }
  0x7c   :  { %773 = vmatprep.subr.bf16.mxu0 %v1063_v40 }
  0x7f   :  { %774 = vmatpush1.bf16.msra.mxu0 %v1061_v41 }
 0x115   :  { %v285_v48 = vpop.f32.mrb[0].mxu0 }
 0x116   :  { %v286_v49 = vadd.f32 %v285_v48, %v59_v46  ;;  %v287_v50 = vpop.f32.mrb[1].mxu0 }
 0x117   :  { %v288_v51 = vadd.f32 %v287_v50, %v63_v47  ;;  %v289_v52 = vpop.f32.mrb[2].mxu0 }
 0x118   :  { %1065 = vtanh.f32 %v286_v49  ;;  %v290_v53 = vpop.f32.mrb[3].mxu0 }
 0x119   :  { %1067 = vtanh.f32 %v288_v51 }
 0x122   :  { %v1066_v54 = vpop.eup %1065 }
 0x123   :  { %v1068_v55 = vpop.eup %1067  ;;  %v294_v57 = vpack.c.bf16 %v1066_v54, %v1066_v54 }
 0x124   :  { %v295_v56 = vpack.c.bf16 %v1068_v55, %v1068_v55 }
 0x126   :  { %734 = vmatprep.mubr.bf16.mxu1 %v295_v56  ;;  %775 = vmatprep.mubr.bf16.mxu0 %v295_v56 }
 0x127   :  { %735 = vmatmul.mubr.bf16.vlgmr.msra.gmra.mrb[0].mxu1 %v294_v57  ;;  %776 = vmatmul.mubr.bf16.vlgmr.msra.gmra.mrb[4].mxu0 %v294_v57 }
 0x1fa   :  { %v736_v4 = vpop.f32.mrb[0].mxu1  ;;  %v777_v5 = vpop.f32.mrb[4].mxu0 }
 0x1fb   :  { %v737_v6 = vadd.f32 %v736_v4, %v365_v63  ;;  %v778_v7 = vadd.f32 %v777_v5, %v373_v0  ;;  %v738_v8 = vpop.f32.mrb[1].mxu1  ;;  %v779_v9 = vpop.f32.mrb[5].mxu0 }
 0x1fc   :  { %v739_v10 = vadd.f32 %v738_v8, %v369_v1  ;;  %v780_v11 = vadd.f32 %v779_v9, %v377_v2  ;;  %v740_v12 = vpop.f32.mrb[2].mxu1  ;;  %v781_v13 = vpop.f32.mrb[6].mxu0 }
 0x1fd   :  { %v741_v16 = vpop.f32.mrb[3].mxu1  ;;  %v782_v17 = vpop.f32.mrb[7].mxu0 }
 0x1fe   :  { %v788_v18 = vcombine.low %v737_v6, %v739_v10  ;;  %v789_v19 = vcombine.low %v778_v7, %v780_v11 }
 0x200   :  { %v796_v20 = vrot.slane %v788_v18, %v795_v15  ;;  %v803_v21 = vrot.slane %v789_v19, %v795_v15 }
 0x202   :  { %v804_v22 = vcombine.low %v796_v20, %v803_v21 }
 0x204   :  { %806 = vst [vmem:[#allocation2] sm:$0xff] %v804_v22 }
 0x205   :  { %1080 = shalt.err (!%p1077_p4)
}
 0x206   :  { %s1081_s7 = scalar_lea.hbm %s1457_s5, 128 }
 0x207   :  { %p1082_p5 = scmp.ne.s32.totalorder %s1457_s5, %s1081_s7  ;;  %p1085_p6 = scmp.lt.u32.totalorder %s1081_s7, %s1457_s5 }
 0x209   :  { %p1087_p7 = pnand %p1085_p6, %p1082_p5 }
 0x20b   :  { %1090 = shalt.err (!%p1087_p7)
}
 0x20c   :  { %816 = dma.vmem_to_hbm [thread:$0]  %s814_s28, 128, %s1457_s5, [#allocation3]  }
 0x20d   :  { %1091 = dma.done.wait [#allocation3], 128  }
 0x20e   :  { %1092 = vsyncadd [#allocation3], 4294967168 }
 0x20f   :  { %820 = vsyncpa [#allocation3], 1 }

</bundles_post_ra>
